<compile_context>
chip_gen: v6e
topology: v6e:2x2x1
jax: 0.10.0
libtpu: 0.0.40
codegen_flags: <defaults>
</compile_context>

<pallas_src>
import jax
import jax.numpy as jnp
from jax import lax
from jax.experimental import pallas as pl
from jax.experimental.pallas import tpu as pltpu

H1 = 16   # gru1 hidden size
H2 = 64   # gru2 hidden size (per direction)


# --------------------------- fused network kernel ---------------------------
def _gru_net_kernel(x_ref,
                    w1i_ref, w1h_ref, b1i_ref, b1h_ref,
                    w2fi_ref, w2fh_ref, b2fi_ref, b2fh_ref,
                    w2bi_ref, w2bh_ref, b2bi_ref, b2bh_ref,
                    wm1_ref, bm1_ref, wm2_ref, bm2_ref,
                    z_ref,
                    out1_scr):
    """Whole forward pass in one kernel; all operands resident in VMEM."""
    T, B, _ = x_ref.shape

    def gru_cell(x, h, wih_t, whh_t, bih, bhh, H):
        # PyTorch nn.GRU gate order: [r, z, n]
        gi = jnp.dot(x, wih_t, preferred_element_type=jnp.float32) + bih
        gh = jnp.dot(h, whh_t, preferred_element_type=jnp.float32) + bhh
        r = jax.nn.sigmoid(gi[:, 0:H] + gh[:, 0:H])
        zg = jax.nn.sigmoid(gi[:, H:2 * H] + gh[:, H:2 * H])
        n = jnp.tanh(gi[:, 2 * H:3 * H] + r * gh[:, 2 * H:3 * H])
        return (1.0 - zg) * n + zg * h

    # Hoist resident weights/biases out of the loops (JAX does not CSE
    # broadcasts/loads per iteration).
    w1i, w1h, b1i, b1h = w1i_ref[...], w1h_ref[...], b1i_ref[...], b1h_ref[...]
    w2fi, w2fh, b2fi, b2fh = (w2fi_ref[...], w2fh_ref[...],
                              b2fi_ref[...], b2fh_ref[...])
    w2bi, w2bh, b2bi, b2bh = (w2bi_ref[...], w2bh_ref[...],
                              b2bi_ref[...], b2bh_ref[...])

    # ---- gru1 (unidirectional): keep the full output sequence in VMEM scratch.
    def g1_body(t, h):
        h_new = gru_cell(x_ref[t], h, w1i, w1h, b1i, b1h, H1)
        out1_scr[t] = h_new
        return h_new

    lax.fori_loop(0, T, g1_body, jnp.zeros((B, H1), jnp.float32), unroll=True)

    # ---- gru2 (bidirectional): both directions advance in the same loop;
    #      backward direction reads out1 at the reversed time index (no flip).
    def g2_body(t, carry):
        h_f, h_b = carry
        h_f = gru_cell(out1_scr[t], h_f, w2fi, w2fh, b2fi, b2fh, H2)
        h_b = gru_cell(out1_scr[T - 1 - t], h_b, w2bi, w2bh, b2bi, b2bh, H2)
        return h_f, h_b

    h0 = jnp.zeros((B, H2), jnp.float32)
    h_f, h_b = lax.fori_loop(0, T, g2_body, (h0, h0), unroll=True)

    # torch.sum(h, 0).reshape(h.shape[1], -1) == sum over the two directions.
    h = h_f + h_b

    # ---- MLP: Linear(64,32) -> Linear(32,O), no activation in between.
    h1 = jnp.dot(h, wm1_ref[...], preferred_element_type=jnp.float32) + bm1_ref[...]
    z_ref[...] = (jnp.dot(h1, wm2_ref[...], preferred_element_type=jnp.float32)
                  + bm2_ref[...]).astype(z_ref.dtype)


# -------------------------------- wrapper ------------------------------------
def gru_forward(params, all_traj):
    """all_traj: (B, T, D_in) float32.  Returns z: (B, output_size)."""
    x = jnp.transpose(all_traj, (1, 0, 2)).astype(jnp.float32)   # time-major (T, B, D)
    T, B, _ = x.shape
    O = params["l2_w"].shape[0]

    # Glue transposes / bias reshapes done once outside the kernel.
    args = (
        x,
        jnp.transpose(params["g1_wih"]), jnp.transpose(params["g1_whh"]),
        params["g1_bih"].reshape(1, -1), params["g1_bhh"].reshape(1, -1),
        jnp.transpose(params["g2_wih_f"]), jnp.transpose(params["g2_whh_f"]),
        params["g2_bih_f"].reshape(1, -1), params["g2_bhh_f"].reshape(1, -1),
        jnp.transpose(params["g2_wih_b"]), jnp.transpose(params["g2_whh_b"]),
        params["g2_bih_b"].reshape(1, -1), params["g2_bhh_b"].reshape(1, -1),
        jnp.transpose(params["l1_w"]), params["l1_b"].reshape(1, -1),
        jnp.transpose(params["l2_w"]), params["l2_b"].reshape(1, -1),
    )

    return pl.pallas_call(
        _gru_net_kernel,
        out_shape=jax.ShapeDtypeStruct((B, O), jnp.float32),
        scratch_shapes=[pltpu.VMEM((T, B, H1), jnp.float32)],   # out1 kept on-chip
    )(*args)


# ---------------------------- parameter init ---------------------------------
def orthogonal_init(key, shape):
    r, c = shape
    a = jax.random.normal(key, (max(r, c), min(r, c)), dtype=jnp.float32)
    q, _ = jnp.linalg.qr(a)
    if r < c:
        q = q.T
    return q[:r, :c]


def init_params(key, input_size, output_size):
    ks = jax.random.split(key, 8)
    p = {}
    # gru1: GRU(input_size -> 16), weights orthogonal, biases zero
    p["g1_wih"] = orthogonal_init(ks[0], (3 * H1, input_size))
    p["g1_whh"] = orthogonal_init(ks[1], (3 * H1, H1))
    p["g1_bih"] = jnp.zeros((3 * H1,), jnp.float32)
    p["g1_bhh"] = jnp.zeros((3 * H1,), jnp.float32)
    # gru2: bidirectional GRU(16 -> 64)
    p["g2_wih_f"] = orthogonal_init(ks[2], (3 * H2, H1))
    p["g2_whh_f"] = orthogonal_init(ks[3], (3 * H2, H2))
    p["g2_bih_f"] = jnp.zeros((3 * H2,), jnp.float32)
    p["g2_bhh_f"] = jnp.zeros((3 * H2,), jnp.float32)
    p["g2_wih_b"] = orthogonal_init(ks[4], (3 * H2, H1))
    p["g2_whh_b"] = orthogonal_init(ks[5], (3 * H2, H2))
    p["g2_bih_b"] = jnp.zeros((3 * H2,), jnp.float32)
    p["g2_bhh_b"] = jnp.zeros((3 * H2,), jnp.float32)
    # mlp: Linear(64,32) -> Linear(32,output_size); weight ~ N(0, 0.0099999), bias 0
    p["l1_w"] = 0.0099999 * jax.random.normal(ks[6], (32, H2), jnp.float32)
    p["l1_b"] = jnp.zeros((32,), jnp.float32)
    p["l2_w"] = 0.0099999 * jax.random.normal(ks[7], (output_size, 32), jnp.float32)
    p["l2_b"] = jnp.zeros((output_size,), jnp.float32)
    return p


# ---------------------- pure-JAX reference (for checking) --------------------
def _gru_layer_ref(x, w_ih, w_hh, b_ih, b_hh):
    H = w_hh.shape[1]

    def cell(h, x_t):
        gi = x_t @ w_ih.T + b_ih
        gh = h @ w_hh.T + b_hh
        r = jax.nn.sigmoid(gi[:, :H] + gh[:, :H])
        z = jax.nn.sigmoid(gi[:, H:2 * H] + gh[:, H:2 * H])
        n = jnp.tanh(gi[:, 2 * H:] + r * gh[:, 2 * H:])
        h_new = (1.0 - z) * n + z * h
        return h_new, h_new

    h0 = jnp.zeros((x.shape[1], H), jnp.float32)
    h_fin, out = lax.scan(cell, h0, x)
    return out, h_fin


def gru_forward_ref(params, all_traj):
    x = jnp.transpose(all_traj, (1, 0, 2)).astype(jnp.float32)
    out1, _ = _gru_layer_ref(x, params["g1_wih"], params["g1_whh"],
                             params["g1_bih"], params["g1_bhh"])
    _, h_f = _gru_layer_ref(out1, params["g2_wih_f"], params["g2_whh_f"],
                            params["g2_bih_f"], params["g2_bhh_f"])
    _, h_b = _gru_layer_ref(out1[::-1], params["g2_wih_b"], params["g2_whh_b"],
                            params["g2_bih_b"], params["g2_bhh_b"])
    h = h_f + h_b
    h1 = h @ params["l1_w"].T + params["l1_b"]
    return h1 @ params["l2_w"].T + params["l2_b"]


# ----------------------------------- main -------------------------------------
if __name__ == "__main__":
    B, T, INPUT_SIZE, OUTPUT_SIZE = 2, 8, 4, 4

    key = jax.random.PRNGKey(0)
    k_data, k_param = jax.random.split(key)
    all_traj = jax.random.normal(k_data, (B, T, INPUT_SIZE), dtype=jnp.float32)
    params = init_params(k_param, INPUT_SIZE, OUTPUT_SIZE)

    z = jax.jit(gru_forward)(params, all_traj)
    jax.block_until_ready(z)
    assert z.shape == (B, OUTPUT_SIZE), z.shape

    z_ref = gru_forward_ref(params, all_traj)
    assert jnp.allclose(z, z_ref, rtol=1e-3, atol=1e-5), (z, z_ref)

    print("KERNEL_OK")
</pallas_src>

<mosaic_0001>
module attributes {stable_mosaic.version = 11 : i64} {
  func.func @_gru_net_kernel(%arg0: memref<8x2x4xf32, #tpu.memory_space<vmem>>, %arg1: memref<4x48xf32, #tpu.memory_space<vmem>>, %arg2: memref<16x48xf32, #tpu.memory_space<vmem>>, %arg3: memref<1x48xf32, #tpu.memory_space<vmem>>, %arg4: memref<1x48xf32, #tpu.memory_space<vmem>>, %arg5: memref<16x192xf32, #tpu.memory_space<vmem>>, %arg6: memref<64x192xf32, #tpu.memory_space<vmem>>, %arg7: memref<1x192xf32, #tpu.memory_space<vmem>>, %arg8: memref<1x192xf32, #tpu.memory_space<vmem>>, %arg9: memref<16x192xf32, #tpu.memory_space<vmem>>, %arg10: memref<64x192xf32, #tpu.memory_space<vmem>>, %arg11: memref<1x192xf32, #tpu.memory_space<vmem>>, %arg12: memref<1x192xf32, #tpu.memory_space<vmem>>, %arg13: memref<64x32xf32, #tpu.memory_space<vmem>>, %arg14: memref<1x32xf32, #tpu.memory_space<vmem>>, %arg15: memref<32x4xf32, #tpu.memory_space<vmem>>, %arg16: memref<1x4xf32, #tpu.memory_space<vmem>>, %arg17: memref<2x4xf32, #tpu.memory_space<vmem>>, %arg18: memref<8x2x16xf32, #tpu.memory_space<vmem>>) attributes {dimension_semantics = [], scalar_prefetch = 0 : i64, scratch_operands = 1 : i64, tpu.core_type = #tpu.core_type<tc>} {
    %c0 = arith.constant 0 : index
    %c0_0 = arith.constant 0 : index
    %0 = vector.load %arg1[%c0, %c0_0] : memref<4x48xf32, #tpu.memory_space<vmem>>, vector<4x48xf32>
    %c0_1 = arith.constant 0 : index
    %c0_2 = arith.constant 0 : index
    %1 = vector.load %arg2[%c0_1, %c0_2] : memref<16x48xf32, #tpu.memory_space<vmem>>, vector<16x48xf32>
    %c0_3 = arith.constant 0 : index
    %c0_4 = arith.constant 0 : index
    %2 = vector.load %arg3[%c0_3, %c0_4] : memref<1x48xf32, #tpu.memory_space<vmem>>, vector<1x48xf32>
    %c0_5 = arith.constant 0 : index
    %c0_6 = arith.constant 0 : index
    %3 = vector.load %arg4[%c0_5, %c0_6] : memref<1x48xf32, #tpu.memory_space<vmem>>, vector<1x48xf32>
    %c0_7 = arith.constant 0 : index
    %c0_8 = arith.constant 0 : index
    %4 = vector.load %arg5[%c0_7, %c0_8] : memref<16x192xf32, #tpu.memory_space<vmem>>, vector<16x192xf32>
    %c0_9 = arith.constant 0 : index
    %c0_10 = arith.constant 0 : index
    %5 = vector.load %arg6[%c0_9, %c0_10] : memref<64x192xf32, #tpu.memory_space<vmem>>, vector<64x192xf32>
    %c0_11 = arith.constant 0 : index
    %c0_12 = arith.constant 0 : index
    %6 = vector.load %arg7[%c0_11, %c0_12] : memref<1x192xf32, #tpu.memory_space<vmem>>, vector<1x192xf32>
    %c0_13 = arith.constant 0 : index
    %c0_14 = arith.constant 0 : index
    %7 = vector.load %arg8[%c0_13, %c0_14] : memref<1x192xf32, #tpu.memory_space<vmem>>, vector<1x192xf32>
    %c0_15 = arith.constant 0 : index
    %c0_16 = arith.constant 0 : index
    %8 = vector.load %arg9[%c0_15, %c0_16] : memref<16x192xf32, #tpu.memory_space<vmem>>, vector<16x192xf32>
    %c0_17 = arith.constant 0 : index
    %c0_18 = arith.constant 0 : index
    %9 = vector.load %arg10[%c0_17, %c0_18] : memref<64x192xf32, #tpu.memory_space<vmem>>, vector<64x192xf32>
    %c0_19 = arith.constant 0 : index
    %c0_20 = arith.constant 0 : index
    %10 = vector.load %arg11[%c0_19, %c0_20] : memref<1x192xf32, #tpu.memory_space<vmem>>, vector<1x192xf32>
    %c0_21 = arith.constant 0 : index
    %c0_22 = arith.constant 0 : index
    %11 = vector.load %arg12[%c0_21, %c0_22] : memref<1x192xf32, #tpu.memory_space<vmem>>, vector<1x192xf32>
    %cst = arith.constant 0.000000e+00 : f32
    %12 = vector.broadcast %cst : f32 to vector<2x16xf32>
    %c0_i32 = arith.constant 0 : i32
    %13 = arith.index_cast %c0_i32 : i32 to index
    %c0_23 = arith.constant 0 : index
    %c0_24 = arith.constant 0 : index
    %14 = vector.load %arg0[%13, %c0_23, %c0_24] : memref<8x2x4xf32, #tpu.memory_space<vmem>>, vector<1x2x4xf32>
    %15 = vector.shape_cast %14 : vector<1x2x4xf32> to vector<2x4xf32>
    %cst_25 = arith.constant dense<0.000000e+00> : vector<2x48xf32>
    %16 = tpu.matmul %15, %0, %cst_25 {dimension_numbers = #tpu.dot_dimension_numbers<[1], [0], [0], [1], [0, 0, 1, 1], [], []>} : vector<2x4xf32>, vector<4x48xf32>, vector<2x48xf32> -> vector<2x48xf32>
    %17 = vector.broadcast %2 : vector<1x48xf32> to vector<2x48xf32>
    %18 = arith.addf %16, %17 : vector<2x48xf32>
    %cst_26 = arith.constant dense<0.000000e+00> : vector<2x48xf32>
    %19 = tpu.matmul %12, %1, %cst_26 {dimension_numbers = #tpu.dot_dimension_numbers<[1], [0], [0], [1], [0, 0, 1, 1], [], []>} : vector<2x16xf32>, vector<16x48xf32>, vector<2x48xf32> -> vector<2x48xf32>
    %20 = vector.broadcast %3 : vector<1x48xf32> to vector<2x48xf32>
    %21 = arith.addf %19, %20 : vector<2x48xf32>
    %22 = vector.extract_strided_slice %18 {offsets = [0, 0], sizes = [2, 16], strides = [1, 1]} : vector<2x48xf32> to vector<2x16xf32>
    %23 = vector.extract_strided_slice %21 {offsets = [0, 0], sizes = [2, 16], strides = [1, 1]} : vector<2x48xf32> to vector<2x16xf32>
    %24 = arith.addf %22, %23 : vector<2x16xf32>
    %25 = arith.negf %24 : vector<2x16xf32>
    %26 = math.exp %25 : vector<2x16xf32>
    %cst_27 = arith.constant 1.000000e+00 : f32
    %27 = vector.broadcast %cst_27 : f32 to vector<2x16xf32>
    %28 = arith.addf %27, %26 : vector<2x16xf32>
    %29 = arith.divf %27, %28 : vector<2x16xf32>
    %30 = vector.extract_strided_slice %18 {offsets = [0, 16], sizes = [2, 16], strides = [1, 1]} : vector<2x48xf32> to vector<2x16xf32>
    %31 = vector.extract_strided_slice %21 {offsets = [0, 16], sizes = [2, 16], strides = [1, 1]} : vector<2x48xf32> to vector<2x16xf32>
    %32 = arith.addf %30, %31 : vector<2x16xf32>
    %33 = arith.negf %32 : vector<2x16xf32>
    %34 = math.exp %33 : vector<2x16xf32>
    %cst_28 = arith.constant 1.000000e+00 : f32
    %35 = vector.broadcast %cst_28 : f32 to vector<2x16xf32>
    %36 = arith.addf %35, %34 : vector<2x16xf32>
    %37 = arith.divf %35, %36 : vector<2x16xf32>
    %38 = vector.extract_strided_slice %18 {offsets = [0, 32], sizes = [2, 16], strides = [1, 1]} : vector<2x48xf32> to vector<2x16xf32>
    %39 = vector.extract_strided_slice %21 {offsets = [0, 32], sizes = [2, 16], strides = [1, 1]} : vector<2x48xf32> to vector<2x16xf32>
    %40 = arith.mulf %29, %39 : vector<2x16xf32>
    %41 = arith.addf %38, %40 : vector<2x16xf32>
    %42 = math.tanh %41 : vector<2x16xf32>
    %cst_29 = arith.constant 1.000000e+00 : f32
    %43 = vector.broadcast %cst_29 : f32 to vector<2x16xf32>
    %44 = arith.subf %43, %37 : vector<2x16xf32>
    %45 = arith.mulf %44, %42 : vector<2x16xf32>
    %46 = arith.mulf %37, %12 : vector<2x16xf32>
    %47 = arith.addf %45, %46 : vector<2x16xf32>
    %48 = arith.index_cast %c0_i32 : i32 to index
    %c0_30 = arith.constant 0 : index
    %c0_31 = arith.constant 0 : index
    %49 = vector.load %arg18[%48, %c0_30, %c0_31] : memref<8x2x16xf32, #tpu.memory_space<vmem>>, vector<1x2x16xf32>
    %50 = vector.shape_cast %49 : vector<1x2x16xf32> to vector<2x16xf32>
    %51 = vector.shape_cast %47 : vector<2x16xf32> to vector<1x2x16xf32>
    tpu.vector_store %arg18[%48, %c0_30, %c0_31], %51 {strides = array<i32>} : memref<8x2x16xf32, #tpu.memory_space<vmem>>, vector<1x2x16xf32>,
    %c1_i32 = arith.constant 1 : i32
    %52 = arith.index_cast %c1_i32 : i32 to index
    %c0_32 = arith.constant 0 : index
    %c0_33 = arith.constant 0 : index
    %53 = vector.load %arg0[%52, %c0_32, %c0_33] : memref<8x2x4xf32, #tpu.memory_space<vmem>>, vector<1x2x4xf32>
    %54 = vector.shape_cast %53 : vector<1x2x4xf32> to vector<2x4xf32>
    %cst_34 = arith.constant dense<0.000000e+00> : vector<2x48xf32>
    %55 = tpu.matmul %54, %0, %cst_34 {dimension_numbers = #tpu.dot_dimension_numbers<[1], [0], [0], [1], [0, 0, 1, 1], [], []>} : vector<2x4xf32>, vector<4x48xf32>, vector<2x48xf32> -> vector<2x48xf32>
    %56 = vector.broadcast %2 : vector<1x48xf32> to vector<2x48xf32>
    %57 = arith.addf %55, %56 : vector<2x48xf32>
    %cst_35 = arith.constant dense<0.000000e+00> : vector<2x48xf32>
    %58 = tpu.matmul %47, %1, %cst_35 {dimension_numbers = #tpu.dot_dimension_numbers<[1], [0], [0], [1], [0, 0, 1, 1], [], []>} : vector<2x16xf32>, vector<16x48xf32>, vector<2x48xf32> -> vector<2x48xf32>
    %59 = vector.broadcast %3 : vector<1x48xf32> to vector<2x48xf32>
    %60 = arith.addf %58, %59 : vector<2x48xf32>
    %61 = vector.extract_strided_slice %57 {offsets = [0, 0], sizes = [2, 16], strides = [1, 1]} : vector<2x48xf32> to vector<2x16xf32>
    %62 = vector.extract_strided_slice %60 {offsets = [0, 0], sizes = [2, 16], strides = [1, 1]} : vector<2x48xf32> to vector<2x16xf32>
    %63 = arith.addf %61, %62 : vector<2x16xf32>
    %64 = arith.negf %63 : vector<2x16xf32>
    %65 = math.exp %64 : vector<2x16xf32>
    %cst_36 = arith.constant 1.000000e+00 : f32
    %66 = vector.broadcast %cst_36 : f32 to vector<2x16xf32>
    %67 = arith.addf %66, %65 : vector<2x16xf32>
    %68 = arith.divf %66, %67 : vector<2x16xf32>
    %69 = vector.extract_strided_slice %57 {offsets = [0, 16], sizes = [2, 16], strides = [1, 1]} : vector<2x48xf32> to vector<2x16xf32>
    %70 = vector.extract_strided_slice %60 {offsets = [0, 16], sizes = [2, 16], strides = [1, 1]} : vector<2x48xf32> to vector<2x16xf32>
    %71 = arith.addf %69, %70 : vector<2x16xf32>
    %72 = arith.negf %71 : vector<2x16xf32>
    %73 = math.exp %72 : vector<2x16xf32>
    %cst_37 = arith.constant 1.000000e+00 : f32
    %74 = vector.broadcast %cst_37 : f32 to vector<2x16xf32>
    %75 = arith.addf %74, %73 : vector<2x16xf32>
    %76 = arith.divf %74, %75 : vector<2x16xf32>
    %77 = vector.extract_strided_slice %57 {offsets = [0, 32], sizes = [2, 16], strides = [1, 1]} : vector<2x48xf32> to vector<2x16xf32>
    %78 = vector.extract_strided_slice %60 {offsets = [0, 32], sizes = [2, 16], strides = [1, 1]} : vector<2x48xf32> to vector<2x16xf32>
    %79 = arith.mulf %68, %78 : vector<2x16xf32>
    %80 = arith.addf %77, %79 : vector<2x16xf32>
    %81 = math.tanh %80 : vector<2x16xf32>
    %cst_38 = arith.constant 1.000000e+00 : f32
    %82 = vector.broadcast %cst_38 : f32 to vector<2x16xf32>
    %83 = arith.subf %82, %76 : vector<2x16xf32>
    %84 = arith.mulf %83, %81 : vector<2x16xf32>
    %85 = arith.mulf %76, %47 : vector<2x16xf32>
    %86 = arith.addf %84, %85 : vector<2x16xf32>
    %87 = arith.index_cast %c1_i32 : i32 to index
    %c0_39 = arith.constant 0 : index
    %c0_40 = arith.constant 0 : index
    %88 = vector.load %arg18[%87, %c0_39, %c0_40] : memref<8x2x16xf32, #tpu.memory_space<vmem>>, vector<1x2x16xf32>
    %89 = vector.shape_cast %88 : vector<1x2x16xf32> to vector<2x16xf32>
    %90 = vector.shape_cast %86 : vector<2x16xf32> to vector<1x2x16xf32>
    tpu.vector_store %arg18[%87, %c0_39, %c0_40], %90 {strides = array<i32>} : memref<8x2x16xf32, #tpu.memory_space<vmem>>, vector<1x2x16xf32>,
    %c2_i32 = arith.constant 2 : i32
    %91 = arith.index_cast %c2_i32 : i32 to index
    %c0_41 = arith.constant 0 : index
    %c0_42 = arith.constant 0 : index
    %92 = vector.load %arg0[%91, %c0_41, %c0_42] : memref<8x2x4xf32, #tpu.memory_space<vmem>>, vector<1x2x4xf32>
    %93 = vector.shape_cast %92 : vector<1x2x4xf32> to vector<2x4xf32>
    %cst_43 = arith.constant dense<0.000000e+00> : vector<2x48xf32>
    %94 = tpu.matmul %93, %0, %cst_43 {dimension_numbers = #tpu.dot_dimension_numbers<[1], [0], [0], [1], [0, 0, 1, 1], [], []>} : vector<2x4xf32>, vector<4x48xf32>, vector<2x48xf32> -> vector<2x48xf32>
    %95 = vector.broadcast %2 : vector<1x48xf32> to vector<2x48xf32>
    %96 = arith.addf %94, %95 : vector<2x48xf32>
    %cst_44 = arith.constant dense<0.000000e+00> : vector<2x48xf32>
    %97 = tpu.matmul %86, %1, %cst_44 {dimension_numbers = #tpu.dot_dimension_numbers<[1], [0], [0], [1], [0, 0, 1, 1], [], []>} : vector<2x16xf32>, vector<16x48xf32>, vector<2x48xf32> -> vector<2x48xf32>
    %98 = vector.broadcast %3 : vector<1x48xf32> to vector<2x48xf32>
    %99 = arith.addf %97, %98 : vector<2x48xf32>
    %100 = vector.extract_strided_slice %96 {offsets = [0, 0], sizes = [2, 16], strides = [1, 1]} : vector<2x48xf32> to vector<2x16xf32>
    %101 = vector.extract_strided_slice %99 {offsets = [0, 0], sizes = [2, 16], strides = [1, 1]} : vector<2x48xf32> to vector<2x16xf32>
    %102 = arith.addf %100, %101 : vector<2x16xf32>
    %103 = arith.negf %102 : vector<2x16xf32>
    %104 = math.exp %103 : vector<2x16xf32>
    %cst_45 = arith.constant 1.000000e+00 : f32
    %105 = vector.broadcast %cst_45 : f32 to vector<2x16xf32>
    %106 = arith.addf %105, %104 : vector<2x16xf32>
    %107 = arith.divf %105, %106 : vector<2x16xf32>
    %108 = vector.extract_strided_slice %96 {offsets = [0, 16], sizes = [2, 16], strides = [1, 1]} : vector<2x48xf32> to vector<2x16xf32>
    %109 = vector.extract_strided_slice %99 {offsets = [0, 16], sizes = [2, 16], strides = [1, 1]} : vector<2x48xf32> to vector<2x16xf32>
    %110 = arith.addf %108, %109 : vector<2x16xf32>
    %111 = arith.negf %110 : vector<2x16xf32>
    %112 = math.exp %111 : vector<2x16xf32>
    %cst_46 = arith.constant 1.000000e+00 : f32
    %113 = vector.broadcast %cst_46 : f32 to vector<2x16xf32>
    %114 = arith.addf %113, %112 : vector<2x16xf32>
    %115 = arith.divf %113, %114 : vector<2x16xf32>
    %116 = vector.extract_strided_slice %96 {offsets = [0, 32], sizes = [2, 16], strides = [1, 1]} : vector<2x48xf32> to vector<2x16xf32>
    %117 = vector.extract_strided_slice %99 {offsets = [0, 32], sizes = [2, 16], strides = [1, 1]} : vector<2x48xf32> to vector<2x16xf32>
    %118 = arith.mulf %107, %117 : vector<2x16xf32>
    %119 = arith.addf %116, %118 : vector<2x16xf32>
    %120 = math.tanh %119 : vector<2x16xf32>
    %cst_47 = arith.constant 1.000000e+00 : f32
    %121 = vector.broadcast %cst_47 : f32 to vector<2x16xf32>
    %122 = arith.subf %121, %115 : vector<2x16xf32>
    %123 = arith.mulf %122, %120 : vector<2x16xf32>
    %124 = arith.mulf %115, %86 : vector<2x16xf32>
    %125 = arith.addf %123, %124 : vector<2x16xf32>
    %126 = arith.index_cast %c2_i32 : i32 to index
    %c0_48 = arith.constant 0 : index
    %c0_49 = arith.constant 0 : index
    %127 = vector.load %arg18[%126, %c0_48, %c0_49] : memref<8x2x16xf32, #tpu.memory_space<vmem>>, vector<1x2x16xf32>
    %128 = vector.shape_cast %127 : vector<1x2x16xf32> to vector<2x16xf32>
    %129 = vector.shape_cast %125 : vector<2x16xf32> to vector<1x2x16xf32>
    tpu.vector_store %arg18[%126, %c0_48, %c0_49], %129 {strides = array<i32>} : memref<8x2x16xf32, #tpu.memory_space<vmem>>, vector<1x2x16xf32>,
    %c3_i32 = arith.constant 3 : i32
    %130 = arith.index_cast %c3_i32 : i32 to index
    %c0_50 = arith.constant 0 : index
    %c0_51 = arith.constant 0 : index
    %131 = vector.load %arg0[%130, %c0_50, %c0_51] : memref<8x2x4xf32, #tpu.memory_space<vmem>>, vector<1x2x4xf32>
    %132 = vector.shape_cast %131 : vector<1x2x4xf32> to vector<2x4xf32>
    %cst_52 = arith.constant dense<0.000000e+00> : vector<2x48xf32>
    %133 = tpu.matmul %132, %0, %cst_52 {dimension_numbers = #tpu.dot_dimension_numbers<[1], [0], [0], [1], [0, 0, 1, 1], [], []>} : vector<2x4xf32>, vector<4x48xf32>, vector<2x48xf32> -> vector<2x48xf32>
    %134 = vector.broadcast %2 : vector<1x48xf32> to vector<2x48xf32>
    %135 = arith.addf %133, %134 : vector<2x48xf32>
    %cst_53 = arith.constant dense<0.000000e+00> : vector<2x48xf32>
    %136 = tpu.matmul %125, %1, %cst_53 {dimension_numbers = #tpu.dot_dimension_numbers<[1], [0], [0], [1], [0, 0, 1, 1], [], []>} : vector<2x16xf32>, vector<16x48xf32>, vector<2x48xf32> -> vector<2x48xf32>
    %137 = vector.broadcast %3 : vector<1x48xf32> to vector<2x48xf32>
    %138 = arith.addf %136, %137 : vector<2x48xf32>
    %139 = vector.extract_strided_slice %135 {offsets = [0, 0], sizes = [2, 16], strides = [1, 1]} : vector<2x48xf32> to vector<2x16xf32>
    %140 = vector.extract_strided_slice %138 {offsets = [0, 0], sizes = [2, 16], strides = [1, 1]} : vector<2x48xf32> to vector<2x16xf32>
    %141 = arith.addf %139, %140 : vector<2x16xf32>
    %142 = arith.negf %141 : vector<2x16xf32>
    %143 = math.exp %142 : vector<2x16xf32>
    %cst_54 = arith.constant 1.000000e+00 : f32
    %144 = vector.broadcast %cst_54 : f32 to vector<2x16xf32>
    %145 = arith.addf %144, %143 : vector<2x16xf32>
    %146 = arith.divf %144, %145 : vector<2x16xf32>
    %147 = vector.extract_strided_slice %135 {offsets = [0, 16], sizes = [2, 16], strides = [1, 1]} : vector<2x48xf32> to vector<2x16xf32>
    %148 = vector.extract_strided_slice %138 {offsets = [0, 16], sizes = [2, 16], strides = [1, 1]} : vector<2x48xf32> to vector<2x16xf32>
    %149 = arith.addf %147, %148 : vector<2x16xf32>
    %150 = arith.negf %149 : vector<2x16xf32>
    %151 = math.exp %150 : vector<2x16xf32>
    %cst_55 = arith.constant 1.000000e+00 : f32
    %152 = vector.broadcast %cst_55 : f32 to vector<2x16xf32>
    %153 = arith.addf %152, %151 : vector<2x16xf32>
    %154 = arith.divf %152, %153 : vector<2x16xf32>
    %155 = vector.extract_strided_slice %135 {offsets = [0, 32], sizes = [2, 16], strides = [1, 1]} : vector<2x48xf32> to vector<2x16xf32>
    %156 = vector.extract_strided_slice %138 {offsets = [0, 32], sizes = [2, 16], strides = [1, 1]} : vector<2x48xf32> to vector<2x16xf32>
    %157 = arith.mulf %146, %156 : vector<2x16xf32>
    %158 = arith.addf %155, %157 : vector<2x16xf32>
    %159 = math.tanh %158 : vector<2x16xf32>
    %cst_56 = arith.constant 1.000000e+00 : f32
    %160 = vector.broadcast %cst_56 : f32 to vector<2x16xf32>
    %161 = arith.subf %160, %154 : vector<2x16xf32>
    %162 = arith.mulf %161, %159 : vector<2x16xf32>
    %163 = arith.mulf %154, %125 : vector<2x16xf32>
    %164 = arith.addf %162, %163 : vector<2x16xf32>
    %165 = arith.index_cast %c3_i32 : i32 to index
    %c0_57 = arith.constant 0 : index
    %c0_58 = arith.constant 0 : index
    %166 = vector.load %arg18[%165, %c0_57, %c0_58] : memref<8x2x16xf32, #tpu.memory_space<vmem>>, vector<1x2x16xf32>
    %167 = vector.shape_cast %166 : vector<1x2x16xf32> to vector<2x16xf32>
    %168 = vector.shape_cast %164 : vector<2x16xf32> to vector<1x2x16xf32>
    tpu.vector_store %arg18[%165, %c0_57, %c0_58], %168 {strides = array<i32>} : memref<8x2x16xf32, #tpu.memory_space<vmem>>, vector<1x2x16xf32>,
    %c4_i32 = arith.constant 4 : i32
    %169 = arith.index_cast %c4_i32 : i32 to index
    %c0_59 = arith.constant 0 : index
    %c0_60 = arith.constant 0 : index
    %170 = vector.load %arg0[%169, %c0_59, %c0_60] : memref<8x2x4xf32, #tpu.memory_space<vmem>>, vector<1x2x4xf32>
    %171 = vector.shape_cast %170 : vector<1x2x4xf32> to vector<2x4xf32>
    %cst_61 = arith.constant dense<0.000000e+00> : vector<2x48xf32>
    %172 = tpu.matmul %171, %0, %cst_61 {dimension_numbers = #tpu.dot_dimension_numbers<[1], [0], [0], [1], [0, 0, 1, 1], [], []>} : vector<2x4xf32>, vector<4x48xf32>, vector<2x48xf32> -> vector<2x48xf32>
    %173 = vector.broadcast %2 : vector<1x48xf32> to vector<2x48xf32>
    %174 = arith.addf %172, %173 : vector<2x48xf32>
    %cst_62 = arith.constant dense<0.000000e+00> : vector<2x48xf32>
    %175 = tpu.matmul %164, %1, %cst_62 {dimension_numbers = #tpu.dot_dimension_numbers<[1], [0], [0], [1], [0, 0, 1, 1], [], []>} : vector<2x16xf32>, vector<16x48xf32>, vector<2x48xf32> -> vector<2x48xf32>
    %176 = vector.broadcast %3 : vector<1x48xf32> to vector<2x48xf32>
    %177 = arith.addf %175, %176 : vector<2x48xf32>
    %178 = vector.extract_strided_slice %174 {offsets = [0, 0], sizes = [2, 16], strides = [1, 1]} : vector<2x48xf32> to vector<2x16xf32>
    %179 = vector.extract_strided_slice %177 {offsets = [0, 0], sizes = [2, 16], strides = [1, 1]} : vector<2x48xf32> to vector<2x16xf32>
    %180 = arith.addf %178, %179 : vector<2x16xf32>
    %181 = arith.negf %180 : vector<2x16xf32>
    %182 = math.exp %181 : vector<2x16xf32>
    %cst_63 = arith.constant 1.000000e+00 : f32
    %183 = vector.broadcast %cst_63 : f32 to vector<2x16xf32>
    %184 = arith.addf %183, %182 : vector<2x16xf32>
    %185 = arith.divf %183, %184 : vector<2x16xf32>
    %186 = vector.extract_strided_slice %174 {offsets = [0, 16], sizes = [2, 16], strides = [1, 1]} : vector<2x48xf32> to vector<2x16xf32>
    %187 = vector.extract_strided_slice %177 {offsets = [0, 16], sizes = [2, 16], strides = [1, 1]} : vector<2x48xf32> to vector<2x16xf32>
    %188 = arith.addf %186, %187 : vector<2x16xf32>
    %189 = arith.negf %188 : vector<2x16xf32>
    %190 = math.exp %189 : vector<2x16xf32>
    %cst_64 = arith.constant 1.000000e+00 : f32
    %191 = vector.broadcast %cst_64 : f32 to vector<2x16xf32>
    %192 = arith.addf %191, %190 : vector<2x16xf32>
    %193 = arith.divf %191, %192 : vector<2x16xf32>
    %194 = vector.extract_strided_slice %174 {offsets = [0, 32], sizes = [2, 16], strides = [1, 1]} : vector<2x48xf32> to vector<2x16xf32>
    %195 = vector.extract_strided_slice %177 {offsets = [0, 32], sizes = [2, 16], strides = [1, 1]} : vector<2x48xf32> to vector<2x16xf32>
    %196 = arith.mulf %185, %195 : vector<2x16xf32>
    %197 = arith.addf %194, %196 : vector<2x16xf32>
    %198 = math.tanh %197 : vector<2x16xf32>
    %cst_65 = arith.constant 1.000000e+00 : f32
    %199 = vector.broadcast %cst_65 : f32 to vector<2x16xf32>
    %200 = arith.subf %199, %193 : vector<2x16xf32>
    %201 = arith.mulf %200, %198 : vector<2x16xf32>
    %202 = arith.mulf %193, %164 : vector<2x16xf32>
    %203 = arith.addf %201, %202 : vector<2x16xf32>
    %204 = arith.index_cast %c4_i32 : i32 to index
    %c0_66 = arith.constant 0 : index
    %c0_67 = arith.constant 0 : index
    %205 = vector.load %arg18[%204, %c0_66, %c0_67] : memref<8x2x16xf32, #tpu.memory_space<vmem>>, vector<1x2x16xf32>
    %206 = vector.shape_cast %205 : vector<1x2x16xf32> to vector<2x16xf32>
    %207 = vector.shape_cast %203 : vector<2x16xf32> to vector<1x2x16xf32>
    tpu.vector_store %arg18[%204, %c0_66, %c0_67], %207 {strides = array<i32>} : memref<8x2x16xf32, #tpu.memory_space<vmem>>, vector<1x2x16xf32>,
    %c5_i32 = arith.constant 5 : i32
    %208 = arith.index_cast %c5_i32 : i32 to index
    %c0_68 = arith.constant 0 : index
    %c0_69 = arith.constant 0 : index
    %209 = vector.load %arg0[%208, %c0_68, %c0_69] : memref<8x2x4xf32, #tpu.memory_space<vmem>>, vector<1x2x4xf32>
    %210 = vector.shape_cast %209 : vector<1x2x4xf32> to vector<2x4xf32>
    %cst_70 = arith.constant dense<0.000000e+00> : vector<2x48xf32>
    %211 = tpu.matmul %210, %0, %cst_70 {dimension_numbers = #tpu.dot_dimension_numbers<[1], [0], [0], [1], [0, 0, 1, 1], [], []>} : vector<2x4xf32>, vector<4x48xf32>, vector<2x48xf32> -> vector<2x48xf32>
    %212 = vector.broadcast %2 : vector<1x48xf32> to vector<2x48xf32>
    %213 = arith.addf %211, %212 : vector<2x48xf32>
    %cst_71 = arith.constant dense<0.000000e+00> : vector<2x48xf32>
    %214 = tpu.matmul %203, %1, %cst_71 {dimension_numbers = #tpu.dot_dimension_numbers<[1], [0], [0], [1], [0, 0, 1, 1], [], []>} : vector<2x16xf32>, vector<16x48xf32>, vector<2x48xf32> -> vector<2x48xf32>
    %215 = vector.broadcast %3 : vector<1x48xf32> to vector<2x48xf32>
    %216 = arith.addf %214, %215 : vector<2x48xf32>
    %217 = vector.extract_strided_slice %213 {offsets = [0, 0], sizes = [2, 16], strides = [1, 1]} : vector<2x48xf32> to vector<2x16xf32>
    %218 = vector.extract_strided_slice %216 {offsets = [0, 0], sizes = [2, 16], strides = [1, 1]} : vector<2x48xf32> to vector<2x16xf32>
    %219 = arith.addf %217, %218 : vector<2x16xf32>
    %220 = arith.negf %219 : vector<2x16xf32>
    %221 = math.exp %220 : vector<2x16xf32>
    %cst_72 = arith.constant 1.000000e+00 : f32
    %222 = vector.broadcast %cst_72 : f32 to vector<2x16xf32>
    %223 = arith.addf %222, %221 : vector<2x16xf32>
    %224 = arith.divf %222, %223 : vector<2x16xf32>
    %225 = vector.extract_strided_slice %213 {offsets = [0, 16], sizes = [2, 16], strides = [1, 1]} : vector<2x48xf32> to vector<2x16xf32>
    %226 = vector.extract_strided_slice %216 {offsets = [0, 16], sizes = [2, 16], strides = [1, 1]} : vector<2x48xf32> to vector<2x16xf32>
    %227 = arith.addf %225, %226 : vector<2x16xf32>
    %228 = arith.negf %227 : vector<2x16xf32>
    %229 = math.exp %228 : vector<2x16xf32>
    %cst_73 = arith.constant 1.000000e+00 : f32
    %230 = vector.broadcast %cst_73 : f32 to vector<2x16xf32>
    %231 = arith.addf %230, %229 : vector<2x16xf32>
    %232 = arith.divf %230, %231 : vector<2x16xf32>
    %233 = vector.extract_strided_slice %213 {offsets = [0, 32], sizes = [2, 16], strides = [1, 1]} : vector<2x48xf32> to vector<2x16xf32>
    %234 = vector.extract_strided_slice %216 {offsets = [0, 32], sizes = [2, 16], strides = [1, 1]} : vector<2x48xf32> to vector<2x16xf32>
    %235 = arith.mulf %224, %234 : vector<2x16xf32>
    %236 = arith.addf %233, %235 : vector<2x16xf32>
    %237 = math.tanh %236 : vector<2x16xf32>
    %cst_74 = arith.constant 1.000000e+00 : f32
    %238 = vector.broadcast %cst_74 : f32 to vector<2x16xf32>
    %239 = arith.subf %238, %232 : vector<2x16xf32>
    %240 = arith.mulf %239, %237 : vector<2x16xf32>
    %241 = arith.mulf %232, %203 : vector<2x16xf32>
    %242 = arith.addf %240, %241 : vector<2x16xf32>
    %243 = arith.index_cast %c5_i32 : i32 to index
    %c0_75 = arith.constant 0 : index
    %c0_76 = arith.constant 0 : index
    %244 = vector.load %arg18[%243, %c0_75, %c0_76] : memref<8x2x16xf32, #tpu.memory_space<vmem>>, vector<1x2x16xf32>
    %245 = vector.shape_cast %244 : vector<1x2x16xf32> to vector<2x16xf32>
    %246 = vector.shape_cast %242 : vector<2x16xf32> to vector<1x2x16xf32>
    tpu.vector_store %arg18[%243, %c0_75, %c0_76], %246 {strides = array<i32>} : memref<8x2x16xf32, #tpu.memory_space<vmem>>, vector<1x2x16xf32>,
    %c6_i32 = arith.constant 6 : i32
    %247 = arith.index_cast %c6_i32 : i32 to index
    %c0_77 = arith.constant 0 : index
    %c0_78 = arith.constant 0 : index
    %248 = vector.load %arg0[%247, %c0_77, %c0_78] : memref<8x2x4xf32, #tpu.memory_space<vmem>>, vector<1x2x4xf32>
    %249 = vector.shape_cast %248 : vector<1x2x4xf32> to vector<2x4xf32>
    %cst_79 = arith.constant dense<0.000000e+00> : vector<2x48xf32>
    %250 = tpu.matmul %249, %0, %cst_79 {dimension_numbers = #tpu.dot_dimension_numbers<[1], [0], [0], [1], [0, 0, 1, 1], [], []>} : vector<2x4xf32>, vector<4x48xf32>, vector<2x48xf32> -> vector<2x48xf32>
    %251 = vector.broadcast %2 : vector<1x48xf32> to vector<2x48xf32>
    %252 = arith.addf %250, %251 : vector<2x48xf32>
    %cst_80 = arith.constant dense<0.000000e+00> : vector<2x48xf32>
    %253 = tpu.matmul %242, %1, %cst_80 {dimension_numbers = #tpu.dot_dimension_numbers<[1], [0], [0], [1], [0, 0, 1, 1], [], []>} : vector<2x16xf32>, vector<16x48xf32>, vector<2x48xf32> -> vector<2x48xf32>
    %254 = vector.broadcast %3 : vector<1x48xf32> to vector<2x48xf32>
    %255 = arith.addf %253, %254 : vector<2x48xf32>
    %256 = vector.extract_strided_slice %252 {offsets = [0, 0], sizes = [2, 16], strides = [1, 1]} : vector<2x48xf32> to vector<2x16xf32>
    %257 = vector.extract_strided_slice %255 {offsets = [0, 0], sizes = [2, 16], strides = [1, 1]} : vector<2x48xf32> to vector<2x16xf32>
    %258 = arith.addf %256, %257 : vector<2x16xf32>
    %259 = arith.negf %258 : vector<2x16xf32>
    %260 = math.exp %259 : vector<2x16xf32>
    %cst_81 = arith.constant 1.000000e+00 : f32
    %261 = vector.broadcast %cst_81 : f32 to vector<2x16xf32>
    %262 = arith.addf %261, %260 : vector<2x16xf32>
    %263 = arith.divf %261, %262 : vector<2x16xf32>
    %264 = vector.extract_strided_slice %252 {offsets = [0, 16], sizes = [2, 16], strides = [1, 1]} : vector<2x48xf32> to vector<2x16xf32>
    %265 = vector.extract_strided_slice %255 {offsets = [0, 16], sizes = [2, 16], strides = [1, 1]} : vector<2x48xf32> to vector<2x16xf32>
    %266 = arith.addf %264, %265 : vector<2x16xf32>
    %267 = arith.negf %266 : vector<2x16xf32>
    %268 = math.exp %267 : vector<2x16xf32>
    %cst_82 = arith.constant 1.000000e+00 : f32
    %269 = vector.broadcast %cst_82 : f32 to vector<2x16xf32>
    %270 = arith.addf %269, %268 : vector<2x16xf32>
    %271 = arith.divf %269, %270 : vector<2x16xf32>
    %272 = vector.extract_strided_slice %252 {offsets = [0, 32], sizes = [2, 16], strides = [1, 1]} : vector<2x48xf32> to vector<2x16xf32>
    %273 = vector.extract_strided_slice %255 {offsets = [0, 32], sizes = [2, 16], strides = [1, 1]} : vector<2x48xf32> to vector<2x16xf32>
    %274 = arith.mulf %263, %273 : vector<2x16xf32>
    %275 = arith.addf %272, %274 : vector<2x16xf32>
    %276 = math.tanh %275 : vector<2x16xf32>
    %cst_83 = arith.constant 1.000000e+00 : f32
    %277 = vector.broadcast %cst_83 : f32 to vector<2x16xf32>
    %278 = arith.subf %277, %271 : vector<2x16xf32>
    %279 = arith.mulf %278, %276 : vector<2x16xf32>
    %280 = arith.mulf %271, %242 : vector<2x16xf32>
    %281 = arith.addf %279, %280 : vector<2x16xf32>
    %282 = arith.index_cast %c6_i32 : i32 to index
    %c0_84 = arith.constant 0 : index
    %c0_85 = arith.constant 0 : index
    %283 = vector.load %arg18[%282, %c0_84, %c0_85] : memref<8x2x16xf32, #tpu.memory_space<vmem>>, vector<1x2x16xf32>
    %284 = vector.shape_cast %283 : vector<1x2x16xf32> to vector<2x16xf32>
    %285 = vector.shape_cast %281 : vector<2x16xf32> to vector<1x2x16xf32>
    tpu.vector_store %arg18[%282, %c0_84, %c0_85], %285 {strides = array<i32>} : memref<8x2x16xf32, #tpu.memory_space<vmem>>, vector<1x2x16xf32>,
    %c7_i32 = arith.constant 7 : i32
    %286 = arith.index_cast %c7_i32 : i32 to index
    %c0_86 = arith.constant 0 : index
    %c0_87 = arith.constant 0 : index
    %287 = vector.load %arg0[%286, %c0_86, %c0_87] : memref<8x2x4xf32, #tpu.memory_space<vmem>>, vector<1x2x4xf32>
    %288 = vector.shape_cast %287 : vector<1x2x4xf32> to vector<2x4xf32>
    %cst_88 = arith.constant dense<0.000000e+00> : vector<2x48xf32>
    %289 = tpu.matmul %288, %0, %cst_88 {dimension_numbers = #tpu.dot_dimension_numbers<[1], [0], [0], [1], [0, 0, 1, 1], [], []>} : vector<2x4xf32>, vector<4x48xf32>, vector<2x48xf32> -> vector<2x48xf32>
    %290 = vector.broadcast %2 : vector<1x48xf32> to vector<2x48xf32>
    %291 = arith.addf %289, %290 : vector<2x48xf32>
    %cst_89 = arith.constant dense<0.000000e+00> : vector<2x48xf32>
    %292 = tpu.matmul %281, %1, %cst_89 {dimension_numbers = #tpu.dot_dimension_numbers<[1], [0], [0], [1], [0, 0, 1, 1], [], []>} : vector<2x16xf32>, vector<16x48xf32>, vector<2x48xf32> -> vector<2x48xf32>
    %293 = vector.broadcast %3 : vector<1x48xf32> to vector<2x48xf32>
    %294 = arith.addf %292, %293 : vector<2x48xf32>
    %295 = vector.extract_strided_slice %291 {offsets = [0, 0], sizes = [2, 16], strides = [1, 1]} : vector<2x48xf32> to vector<2x16xf32>
    %296 = vector.extract_strided_slice %294 {offsets = [0, 0], sizes = [2, 16], strides = [1, 1]} : vector<2x48xf32> to vector<2x16xf32>
    %297 = arith.addf %295, %296 : vector<2x16xf32>
    %298 = arith.negf %297 : vector<2x16xf32>
    %299 = math.exp %298 : vector<2x16xf32>
    %cst_90 = arith.constant 1.000000e+00 : f32
    %300 = vector.broadcast %cst_90 : f32 to vector<2x16xf32>
    %301 = arith.addf %300, %299 : vector<2x16xf32>
    %302 = arith.divf %300, %301 : vector<2x16xf32>
    %303 = vector.extract_strided_slice %291 {offsets = [0, 16], sizes = [2, 16], strides = [1, 1]} : vector<2x48xf32> to vector<2x16xf32>
    %304 = vector.extract_strided_slice %294 {offsets = [0, 16], sizes = [2, 16], strides = [1, 1]} : vector<2x48xf32> to vector<2x16xf32>
    %305 = arith.addf %303, %304 : vector<2x16xf32>
    %306 = arith.negf %305 : vector<2x16xf32>
    %307 = math.exp %306 : vector<2x16xf32>
    %cst_91 = arith.constant 1.000000e+00 : f32
    %308 = vector.broadcast %cst_91 : f32 to vector<2x16xf32>
    %309 = arith.addf %308, %307 : vector<2x16xf32>
    %310 = arith.divf %308, %309 : vector<2x16xf32>
    %311 = vector.extract_strided_slice %291 {offsets = [0, 32], sizes = [2, 16], strides = [1, 1]} : vector<2x48xf32> to vector<2x16xf32>
    %312 = vector.extract_strided_slice %294 {offsets = [0, 32], sizes = [2, 16], strides = [1, 1]} : vector<2x48xf32> to vector<2x16xf32>
    %313 = arith.mulf %302, %312 : vector<2x16xf32>
    %314 = arith.addf %311, %313 : vector<2x16xf32>
    %315 = math.tanh %314 : vector<2x16xf32>
    %cst_92 = arith.constant 1.000000e+00 : f32
    %316 = vector.broadcast %cst_92 : f32 to vector<2x16xf32>
    %317 = arith.subf %316, %310 : vector<2x16xf32>
    %318 = arith.mulf %317, %315 : vector<2x16xf32>
    %319 = arith.mulf %310, %281 : vector<2x16xf32>
    %320 = arith.addf %318, %319 : vector<2x16xf32>
    %321 = arith.index_cast %c7_i32 : i32 to index
    %c0_93 = arith.constant 0 : index
    %c0_94 = arith.constant 0 : index
    %322 = vector.load %arg18[%321, %c0_93, %c0_94] : memref<8x2x16xf32, #tpu.memory_space<vmem>>, vector<1x2x16xf32>
    %323 = vector.shape_cast %322 : vector<1x2x16xf32> to vector<2x16xf32>
    %324 = vector.shape_cast %320 : vector<2x16xf32> to vector<1x2x16xf32>
    tpu.vector_store %arg18[%321, %c0_93, %c0_94], %324 {strides = array<i32>} : memref<8x2x16xf32, #tpu.memory_space<vmem>>, vector<1x2x16xf32>,
    %c8_i32 = arith.constant 8 : i32
    %cst_95 = arith.constant 0.000000e+00 : f32
    %325 = vector.broadcast %cst_95 : f32 to vector<2x64xf32>
    %c0_i32_96 = arith.constant 0 : i32
    %326 = arith.index_cast %c0_i32_96 : i32 to index
    %c0_97 = arith.constant 0 : index
    %c0_98 = arith.constant 0 : index
    %327 = vector.load %arg18[%326, %c0_97, %c0_98] : memref<8x2x16xf32, #tpu.memory_space<vmem>>, vector<1x2x16xf32>
    %328 = vector.shape_cast %327 : vector<1x2x16xf32> to vector<2x16xf32>
    %cst_99 = arith.constant dense<0.000000e+00> : vector<2x192xf32>
    %329 = tpu.matmul %328, %4, %cst_99 {dimension_numbers = #tpu.dot_dimension_numbers<[1], [0], [0], [1], [0, 0, 1, 1], [], []>} : vector<2x16xf32>, vector<16x192xf32>, vector<2x192xf32> -> vector<2x192xf32>
    %330 = vector.broadcast %6 : vector<1x192xf32> to vector<2x192xf32>
    %331 = arith.addf %329, %330 : vector<2x192xf32>
    %cst_100 = arith.constant dense<0.000000e+00> : vector<2x192xf32>
    %332 = tpu.matmul %325, %5, %cst_100 {dimension_numbers = #tpu.dot_dimension_numbers<[1], [0], [0], [1], [0, 0, 1, 1], [], []>} : vector<2x64xf32>, vector<64x192xf32>, vector<2x192xf32> -> vector<2x192xf32>
    %333 = vector.broadcast %7 : vector<1x192xf32> to vector<2x192xf32>
    %334 = arith.addf %332, %333 : vector<2x192xf32>
    %335 = vector.extract_strided_slice %331 {offsets = [0, 0], sizes = [2, 64], strides = [1, 1]} : vector<2x192xf32> to vector<2x64xf32>
    %336 = vector.extract_strided_slice %334 {offsets = [0, 0], sizes = [2, 64], strides = [1, 1]} : vector<2x192xf32> to vector<2x64xf32>
    %337 = arith.addf %335, %336 : vector<2x64xf32>
    %338 = arith.negf %337 : vector<2x64xf32>
    %339 = math.exp %338 : vector<2x64xf32>
    %cst_101 = arith.constant 1.000000e+00 : f32
    %340 = vector.broadcast %cst_101 : f32 to vector<2x64xf32>
    %341 = arith.addf %340, %339 : vector<2x64xf32>
    %342 = arith.divf %340, %341 : vector<2x64xf32>
    %343 = vector.extract_strided_slice %331 {offsets = [0, 64], sizes = [2, 64], strides = [1, 1]} : vector<2x192xf32> to vector<2x64xf32>
    %344 = vector.extract_strided_slice %334 {offsets = [0, 64], sizes = [2, 64], strides = [1, 1]} : vector<2x192xf32> to vector<2x64xf32>
    %345 = arith.addf %343, %344 : vector<2x64xf32>
    %346 = arith.negf %345 : vector<2x64xf32>
    %347 = math.exp %346 : vector<2x64xf32>
    %cst_102 = arith.constant 1.000000e+00 : f32
    %348 = vector.broadcast %cst_102 : f32 to vector<2x64xf32>
    %349 = arith.addf %348, %347 : vector<2x64xf32>
    %350 = arith.divf %348, %349 : vector<2x64xf32>
    %351 = vector.extract_strided_slice %331 {offsets = [0, 128], sizes = [2, 64], strides = [1, 1]} : vector<2x192xf32> to vector<2x64xf32>
    %352 = vector.extract_strided_slice %334 {offsets = [0, 128], sizes = [2, 64], strides = [1, 1]} : vector<2x192xf32> to vector<2x64xf32>
    %353 = arith.mulf %342, %352 : vector<2x64xf32>
    %354 = arith.addf %351, %353 : vector<2x64xf32>
    %355 = math.tanh %354 : vector<2x64xf32>
    %cst_103 = arith.constant 1.000000e+00 : f32
    %356 = vector.broadcast %cst_103 : f32 to vector<2x64xf32>
    %357 = arith.subf %356, %350 : vector<2x64xf32>
    %358 = arith.mulf %357, %355 : vector<2x64xf32>
    %359 = arith.mulf %350, %325 : vector<2x64xf32>
    %360 = arith.addf %358, %359 : vector<2x64xf32>
    %c7_i32_104 = arith.constant 7 : i32
    %361 = arith.subi %c7_i32_104, %c0_i32_96 : i32
    %362 = arith.index_cast %361 : i32 to index
    %c0_105 = arith.constant 0 : index
    %c0_106 = arith.constant 0 : index
    %363 = vector.load %arg18[%362, %c0_105, %c0_106] : memref<8x2x16xf32, #tpu.memory_space<vmem>>, vector<1x2x16xf32>
    %364 = vector.shape_cast %363 : vector<1x2x16xf32> to vector<2x16xf32>
    %cst_107 = arith.constant dense<0.000000e+00> : vector<2x192xf32>
    %365 = tpu.matmul %364, %8, %cst_107 {dimension_numbers = #tpu.dot_dimension_numbers<[1], [0], [0], [1], [0, 0, 1, 1], [], []>} : vector<2x16xf32>, vector<16x192xf32>, vector<2x192xf32> -> vector<2x192xf32>
    %366 = vector.broadcast %10 : vector<1x192xf32> to vector<2x192xf32>
    %367 = arith.addf %365, %366 : vector<2x192xf32>
    %cst_108 = arith.constant dense<0.000000e+00> : vector<2x192xf32>
    %368 = tpu.matmul %325, %9, %cst_108 {dimension_numbers = #tpu.dot_dimension_numbers<[1], [0], [0], [1], [0, 0, 1, 1], [], []>} : vector<2x64xf32>, vector<64x192xf32>, vector<2x192xf32> -> vector<2x192xf32>
    %369 = vector.broadcast %11 : vector<1x192xf32> to vector<2x192xf32>
    %370 = arith.addf %368, %369 : vector<2x192xf32>
    %371 = vector.extract_strided_slice %367 {offsets = [0, 0], sizes = [2, 64], strides = [1, 1]} : vector<2x192xf32> to vector<2x64xf32>
    %372 = vector.extract_strided_slice %370 {offsets = [0, 0], sizes = [2, 64], strides = [1, 1]} : vector<2x192xf32> to vector<2x64xf32>
    %373 = arith.addf %371, %372 : vector<2x64xf32>
    %374 = arith.negf %373 : vector<2x64xf32>
    %375 = math.exp %374 : vector<2x64xf32>
    %cst_109 = arith.constant 1.000000e+00 : f32
    %376 = vector.broadcast %cst_109 : f32 to vector<2x64xf32>
    %377 = arith.addf %376, %375 : vector<2x64xf32>
    %378 = arith.divf %376, %377 : vector<2x64xf32>
    %379 = vector.extract_strided_slice %367 {offsets = [0, 64], sizes = [2, 64], strides = [1, 1]} : vector<2x192xf32> to vector<2x64xf32>
    %380 = vector.extract_strided_slice %370 {offsets = [0, 64], sizes = [2, 64], strides = [1, 1]} : vector<2x192xf32> to vector<2x64xf32>
    %381 = arith.addf %379, %380 : vector<2x64xf32>
    %382 = arith.negf %381 : vector<2x64xf32>
    %383 = math.exp %382 : vector<2x64xf32>
    %cst_110 = arith.constant 1.000000e+00 : f32
    %384 = vector.broadcast %cst_110 : f32 to vector<2x64xf32>
    %385 = arith.addf %384, %383 : vector<2x64xf32>
    %386 = arith.divf %384, %385 : vector<2x64xf32>
    %387 = vector.extract_strided_slice %367 {offsets = [0, 128], sizes = [2, 64], strides = [1, 1]} : vector<2x192xf32> to vector<2x64xf32>
    %388 = vector.extract_strided_slice %370 {offsets = [0, 128], sizes = [2, 64], strides = [1, 1]} : vector<2x192xf32> to vector<2x64xf32>
    %389 = arith.mulf %378, %388 : vector<2x64xf32>
    %390 = arith.addf %387, %389 : vector<2x64xf32>
    %391 = math.tanh %390 : vector<2x64xf32>
    %cst_111 = arith.constant 1.000000e+00 : f32
    %392 = vector.broadcast %cst_111 : f32 to vector<2x64xf32>
    %393 = arith.subf %392, %386 : vector<2x64xf32>
    %394 = arith.mulf %393, %391 : vector<2x64xf32>
    %395 = arith.mulf %386, %325 : vector<2x64xf32>
    %396 = arith.addf %394, %395 : vector<2x64xf32>
    %c1_i32_112 = arith.constant 1 : i32
    %397 = arith.index_cast %c1_i32_112 : i32 to index
    %c0_113 = arith.constant 0 : index
    %c0_114 = arith.constant 0 : index
    %398 = vector.load %arg18[%397, %c0_113, %c0_114] : memref<8x2x16xf32, #tpu.memory_space<vmem>>, vector<1x2x16xf32>
    %399 = vector.shape_cast %398 : vector<1x2x16xf32> to vector<2x16xf32>
    %cst_115 = arith.constant dense<0.000000e+00> : vector<2x192xf32>
    %400 = tpu.matmul %399, %4, %cst_115 {dimension_numbers = #tpu.dot_dimension_numbers<[1], [0], [0], [1], [0, 0, 1, 1], [], []>} : vector<2x16xf32>, vector<16x192xf32>, vector<2x192xf32> -> vector<2x192xf32>
    %401 = vector.broadcast %6 : vector<1x192xf32> to vector<2x192xf32>
    %402 = arith.addf %400, %401 : vector<2x192xf32>
    %cst_116 = arith.constant dense<0.000000e+00> : vector<2x192xf32>
    %403 = tpu.matmul %360, %5, %cst_116 {dimension_numbers = #tpu.dot_dimension_numbers<[1], [0], [0], [1], [0, 0, 1, 1], [], []>} : vector<2x64xf32>, vector<64x192xf32>, vector<2x192xf32> -> vector<2x192xf32>
    %404 = vector.broadcast %7 : vector<1x192xf32> to vector<2x192xf32>
    %405 = arith.addf %403, %404 : vector<2x192xf32>
    %406 = vector.extract_strided_slice %402 {offsets = [0, 0], sizes = [2, 64], strides = [1, 1]} : vector<2x192xf32> to vector<2x64xf32>
    %407 = vector.extract_strided_slice %405 {offsets = [0, 0], sizes = [2, 64], strides = [1, 1]} : vector<2x192xf32> to vector<2x64xf32>
    %408 = arith.addf %406, %407 : vector<2x64xf32>
    %409 = arith.negf %408 : vector<2x64xf32>
    %410 = math.exp %409 : vector<2x64xf32>
    %cst_117 = arith.constant 1.000000e+00 : f32
    %411 = vector.broadcast %cst_117 : f32 to vector<2x64xf32>
    %412 = arith.addf %411, %410 : vector<2x64xf32>
    %413 = arith.divf %411, %412 : vector<2x64xf32>
    %414 = vector.extract_strided_slice %402 {offsets = [0, 64], sizes = [2, 64], strides = [1, 1]} : vector<2x192xf32> to vector<2x64xf32>
    %415 = vector.extract_strided_slice %405 {offsets = [0, 64], sizes = [2, 64], strides = [1, 1]} : vector<2x192xf32> to vector<2x64xf32>
    %416 = arith.addf %414, %415 : vector<2x64xf32>
    %417 = arith.negf %416 : vector<2x64xf32>
    %418 = math.exp %417 : vector<2x64xf32>
    %cst_118 = arith.constant 1.000000e+00 : f32
    %419 = vector.broadcast %cst_118 : f32 to vector<2x64xf32>
    %420 = arith.addf %419, %418 : vector<2x64xf32>
    %421 = arith.divf %419, %420 : vector<2x64xf32>
    %422 = vector.extract_strided_slice %402 {offsets = [0, 128], sizes = [2, 64], strides = [1, 1]} : vector<2x192xf32> to vector<2x64xf32>
    %423 = vector.extract_strided_slice %405 {offsets = [0, 128], sizes = [2, 64], strides = [1, 1]} : vector<2x192xf32> to vector<2x64xf32>
    %424 = arith.mulf %413, %423 : vector<2x64xf32>
    %425 = arith.addf %422, %424 : vector<2x64xf32>
    %426 = math.tanh %425 : vector<2x64xf32>
    %cst_119 = arith.constant 1.000000e+00 : f32
    %427 = vector.broadcast %cst_119 : f32 to vector<2x64xf32>
    %428 = arith.subf %427, %421 : vector<2x64xf32>
    %429 = arith.mulf %428, %426 : vector<2x64xf32>
    %430 = arith.mulf %421, %360 : vector<2x64xf32>
    %431 = arith.addf %429, %430 : vector<2x64xf32>
    %c7_i32_120 = arith.constant 7 : i32
    %432 = arith.subi %c7_i32_120, %c1_i32_112 : i32
    %433 = arith.index_cast %432 : i32 to index
    %c0_121 = arith.constant 0 : index
    %c0_122 = arith.constant 0 : index
    %434 = vector.load %arg18[%433, %c0_121, %c0_122] : memref<8x2x16xf32, #tpu.memory_space<vmem>>, vector<1x2x16xf32>
    %435 = vector.shape_cast %434 : vector<1x2x16xf32> to vector<2x16xf32>
    %cst_123 = arith.constant dense<0.000000e+00> : vector<2x192xf32>
    %436 = tpu.matmul %435, %8, %cst_123 {dimension_numbers = #tpu.dot_dimension_numbers<[1], [0], [0], [1], [0, 0, 1, 1], [], []>} : vector<2x16xf32>, vector<16x192xf32>, vector<2x192xf32> -> vector<2x192xf32>
    %437 = vector.broadcast %10 : vector<1x192xf32> to vector<2x192xf32>
    %438 = arith.addf %436, %437 : vector<2x192xf32>
    %cst_124 = arith.constant dense<0.000000e+00> : vector<2x192xf32>
    %439 = tpu.matmul %396, %9, %cst_124 {dimension_numbers = #tpu.dot_dimension_numbers<[1], [0], [0], [1], [0, 0, 1, 1], [], []>} : vector<2x64xf32>, vector<64x192xf32>, vector<2x192xf32> -> vector<2x192xf32>
    %440 = vector.broadcast %11 : vector<1x192xf32> to vector<2x192xf32>
    %441 = arith.addf %439, %440 : vector<2x192xf32>
    %442 = vector.extract_strided_slice %438 {offsets = [0, 0], sizes = [2, 64], strides = [1, 1]} : vector<2x192xf32> to vector<2x64xf32>
    %443 = vector.extract_strided_slice %441 {offsets = [0, 0], sizes = [2, 64], strides = [1, 1]} : vector<2x192xf32> to vector<2x64xf32>
    %444 = arith.addf %442, %443 : vector<2x64xf32>
    %445 = arith.negf %444 : vector<2x64xf32>
    %446 = math.exp %445 : vector<2x64xf32>
    %cst_125 = arith.constant 1.000000e+00 : f32
    %447 = vector.broadcast %cst_125 : f32 to vector<2x64xf32>
    %448 = arith.addf %447, %446 : vector<2x64xf32>
    %449 = arith.divf %447, %448 : vector<2x64xf32>
    %450 = vector.extract_strided_slice %438 {offsets = [0, 64], sizes = [2, 64], strides = [1, 1]} : vector<2x192xf32> to vector<2x64xf32>
    %451 = vector.extract_strided_slice %441 {offsets = [0, 64], sizes = [2, 64], strides = [1, 1]} : vector<2x192xf32> to vector<2x64xf32>
    %452 = arith.addf %450, %451 : vector<2x64xf32>
    %453 = arith.negf %452 : vector<2x64xf32>
    %454 = math.exp %453 : vector<2x64xf32>
    %cst_126 = arith.constant 1.000000e+00 : f32
    %455 = vector.broadcast %cst_126 : f32 to vector<2x64xf32>
    %456 = arith.addf %455, %454 : vector<2x64xf32>
    %457 = arith.divf %455, %456 : vector<2x64xf32>
    %458 = vector.extract_strided_slice %438 {offsets = [0, 128], sizes = [2, 64], strides = [1, 1]} : vector<2x192xf32> to vector<2x64xf32>
    %459 = vector.extract_strided_slice %441 {offsets = [0, 128], sizes = [2, 64], strides = [1, 1]} : vector<2x192xf32> to vector<2x64xf32>
    %460 = arith.mulf %449, %459 : vector<2x64xf32>
    %461 = arith.addf %458, %460 : vector<2x64xf32>
    %462 = math.tanh %461 : vector<2x64xf32>
    %cst_127 = arith.constant 1.000000e+00 : f32
    %463 = vector.broadcast %cst_127 : f32 to vector<2x64xf32>
    %464 = arith.subf %463, %457 : vector<2x64xf32>
    %465 = arith.mulf %464, %462 : vector<2x64xf32>
    %466 = arith.mulf %457, %396 : vector<2x64xf32>
    %467 = arith.addf %465, %466 : vector<2x64xf32>
    %c2_i32_128 = arith.constant 2 : i32
    %468 = arith.index_cast %c2_i32_128 : i32 to index
    %c0_129 = arith.constant 0 : index
    %c0_130 = arith.constant 0 : index
    %469 = vector.load %arg18[%468, %c0_129, %c0_130] : memref<8x2x16xf32, #tpu.memory_space<vmem>>, vector<1x2x16xf32>
    %470 = vector.shape_cast %469 : vector<1x2x16xf32> to vector<2x16xf32>
    %cst_131 = arith.constant dense<0.000000e+00> : vector<2x192xf32>
    %471 = tpu.matmul %470, %4, %cst_131 {dimension_numbers = #tpu.dot_dimension_numbers<[1], [0], [0], [1], [0, 0, 1, 1], [], []>} : vector<2x16xf32>, vector<16x192xf32>, vector<2x192xf32> -> vector<2x192xf32>
    %472 = vector.broadcast %6 : vector<1x192xf32> to vector<2x192xf32>
    %473 = arith.addf %471, %472 : vector<2x192xf32>
    %cst_132 = arith.constant dense<0.000000e+00> : vector<2x192xf32>
    %474 = tpu.matmul %431, %5, %cst_132 {dimension_numbers = #tpu.dot_dimension_numbers<[1], [0], [0], [1], [0, 0, 1, 1], [], []>} : vector<2x64xf32>, vector<64x192xf32>, vector<2x192xf32> -> vector<2x192xf32>
    %475 = vector.broadcast %7 : vector<1x192xf32> to vector<2x192xf32>
    %476 = arith.addf %474, %475 : vector<2x192xf32>
    %477 = vector.extract_strided_slice %473 {offsets = [0, 0], sizes = [2, 64], strides = [1, 1]} : vector<2x192xf32> to vector<2x64xf32>
    %478 = vector.extract_strided_slice %476 {offsets = [0, 0], sizes = [2, 64], strides = [1, 1]} : vector<2x192xf32> to vector<2x64xf32>
    %479 = arith.addf %477, %478 : vector<2x64xf32>
    %480 = arith.negf %479 : vector<2x64xf32>
    %481 = math.exp %480 : vector<2x64xf32>
    %cst_133 = arith.constant 1.000000e+00 : f32
    %482 = vector.broadcast %cst_133 : f32 to vector<2x64xf32>
    %483 = arith.addf %482, %481 : vector<2x64xf32>
    %484 = arith.divf %482, %483 : vector<2x64xf32>
    %485 = vector.extract_strided_slice %473 {offsets = [0, 64], sizes = [2, 64], strides = [1, 1]} : vector<2x192xf32> to vector<2x64xf32>
    %486 = vector.extract_strided_slice %476 {offsets = [0, 64], sizes = [2, 64], strides = [1, 1]} : vector<2x192xf32> to vector<2x64xf32>
    %487 = arith.addf %485, %486 : vector<2x64xf32>
    %488 = arith.negf %487 : vector<2x64xf32>
    %489 = math.exp %488 : vector<2x64xf32>
    %cst_134 = arith.constant 1.000000e+00 : f32
    %490 = vector.broadcast %cst_134 : f32 to vector<2x64xf32>
    %491 = arith.addf %490, %489 : vector<2x64xf32>
    %492 = arith.divf %490, %491 : vector<2x64xf32>
    %493 = vector.extract_strided_slice %473 {offsets = [0, 128], sizes = [2, 64], strides = [1, 1]} : vector<2x192xf32> to vector<2x64xf32>
    %494 = vector.extract_strided_slice %476 {offsets = [0, 128], sizes = [2, 64], strides = [1, 1]} : vector<2x192xf32> to vector<2x64xf32>
    %495 = arith.mulf %484, %494 : vector<2x64xf32>
    %496 = arith.addf %493, %495 : vector<2x64xf32>
    %497 = math.tanh %496 : vector<2x64xf32>
    %cst_135 = arith.constant 1.000000e+00 : f32
    %498 = vector.broadcast %cst_135 : f32 to vector<2x64xf32>
    %499 = arith.subf %498, %492 : vector<2x64xf32>
    %500 = arith.mulf %499, %497 : vector<2x64xf32>
    %501 = arith.mulf %492, %431 : vector<2x64xf32>
    %502 = arith.addf %500, %501 : vector<2x64xf32>
    %c7_i32_136 = arith.constant 7 : i32
    %503 = arith.subi %c7_i32_136, %c2_i32_128 : i32
    %504 = arith.index_cast %503 : i32 to index
    %c0_137 = arith.constant 0 : index
    %c0_138 = arith.constant 0 : index
    %505 = vector.load %arg18[%504, %c0_137, %c0_138] : memref<8x2x16xf32, #tpu.memory_space<vmem>>, vector<1x2x16xf32>
    %506 = vector.shape_cast %505 : vector<1x2x16xf32> to vector<2x16xf32>
    %cst_139 = arith.constant dense<0.000000e+00> : vector<2x192xf32>
    %507 = tpu.matmul %506, %8, %cst_139 {dimension_numbers = #tpu.dot_dimension_numbers<[1], [0], [0], [1], [0, 0, 1, 1], [], []>} : vector<2x16xf32>, vector<16x192xf32>, vector<2x192xf32> -> vector<2x192xf32>
    %508 = vector.broadcast %10 : vector<1x192xf32> to vector<2x192xf32>
    %509 = arith.addf %507, %508 : vector<2x192xf32>
    %cst_140 = arith.constant dense<0.000000e+00> : vector<2x192xf32>
    %510 = tpu.matmul %467, %9, %cst_140 {dimension_numbers = #tpu.dot_dimension_numbers<[1], [0], [0], [1], [0, 0, 1, 1], [], []>} : vector<2x64xf32>, vector<64x192xf32>, vector<2x192xf32> -> vector<2x192xf32>
    %511 = vector.broadcast %11 : vector<1x192xf32> to vector<2x192xf32>
    %512 = arith.addf %510, %511 : vector<2x192xf32>
    %513 = vector.extract_strided_slice %509 {offsets = [0, 0], sizes = [2, 64], strides = [1, 1]} : vector<2x192xf32> to vector<2x64xf32>
    %514 = vector.extract_strided_slice %512 {offsets = [0, 0], sizes = [2, 64], strides = [1, 1]} : vector<2x192xf32> to vector<2x64xf32>
    %515 = arith.addf %513, %514 : vector<2x64xf32>
    %516 = arith.negf %515 : vector<2x64xf32>
    %517 = math.exp %516 : vector<2x64xf32>
    %cst_141 = arith.constant 1.000000e+00 : f32
    %518 = vector.broadcast %cst_141 : f32 to vector<2x64xf32>
    %519 = arith.addf %518, %517 : vector<2x64xf32>
    %520 = arith.divf %518, %519 : vector<2x64xf32>
    %521 = vector.extract_strided_slice %509 {offsets = [0, 64], sizes = [2, 64], strides = [1, 1]} : vector<2x192xf32> to vector<2x64xf32>
    %522 = vector.extract_strided_slice %512 {offsets = [0, 64], sizes = [2, 64], strides = [1, 1]} : vector<2x192xf32> to vector<2x64xf32>
    %523 = arith.addf %521, %522 : vector<2x64xf32>
    %524 = arith.negf %523 : vector<2x64xf32>
    %525 = math.exp %524 : vector<2x64xf32>
    %cst_142 = arith.constant 1.000000e+00 : f32
    %526 = vector.broadcast %cst_142 : f32 to vector<2x64xf32>
    %527 = arith.addf %526, %525 : vector<2x64xf32>
    %528 = arith.divf %526, %527 : vector<2x64xf32>
    %529 = vector.extract_strided_slice %509 {offsets = [0, 128], sizes = [2, 64], strides = [1, 1]} : vector<2x192xf32> to vector<2x64xf32>
    %530 = vector.extract_strided_slice %512 {offsets = [0, 128], sizes = [2, 64], strides = [1, 1]} : vector<2x192xf32> to vector<2x64xf32>
    %531 = arith.mulf %520, %530 : vector<2x64xf32>
    %532 = arith.addf %529, %531 : vector<2x64xf32>
    %533 = math.tanh %532 : vector<2x64xf32>
    %cst_143 = arith.constant 1.000000e+00 : f32
    %534 = vector.broadcast %cst_143 : f32 to vector<2x64xf32>
    %535 = arith.subf %534, %528 : vector<2x64xf32>
    %536 = arith.mulf %535, %533 : vector<2x64xf32>
    %537 = arith.mulf %528, %467 : vector<2x64xf32>
    %538 = arith.addf %536, %537 : vector<2x64xf32>
    %c3_i32_144 = arith.constant 3 : i32
    %539 = arith.index_cast %c3_i32_144 : i32 to index
    %c0_145 = arith.constant 0 : index
    %c0_146 = arith.constant 0 : index
    %540 = vector.load %arg18[%539, %c0_145, %c0_146] : memref<8x2x16xf32, #tpu.memory_space<vmem>>, vector<1x2x16xf32>
    %541 = vector.shape_cast %540 : vector<1x2x16xf32> to vector<2x16xf32>
    %cst_147 = arith.constant dense<0.000000e+00> : vector<2x192xf32>
    %542 = tpu.matmul %541, %4, %cst_147 {dimension_numbers = #tpu.dot_dimension_numbers<[1], [0], [0], [1], [0, 0, 1, 1], [], []>} : vector<2x16xf32>, vector<16x192xf32>, vector<2x192xf32> -> vector<2x192xf32>
    %543 = vector.broadcast %6 : vector<1x192xf32> to vector<2x192xf32>
    %544 = arith.addf %542, %543 : vector<2x192xf32>
    %cst_148 = arith.constant dense<0.000000e+00> : vector<2x192xf32>
    %545 = tpu.matmul %502, %5, %cst_148 {dimension_numbers = #tpu.dot_dimension_numbers<[1], [0], [0], [1], [0, 0, 1, 1], [], []>} : vector<2x64xf32>, vector<64x192xf32>, vector<2x192xf32> -> vector<2x192xf32>
    %546 = vector.broadcast %7 : vector<1x192xf32> to vector<2x192xf32>
    %547 = arith.addf %545, %546 : vector<2x192xf32>
    %548 = vector.extract_strided_slice %544 {offsets = [0, 0], sizes = [2, 64], strides = [1, 1]} : vector<2x192xf32> to vector<2x64xf32>
    %549 = vector.extract_strided_slice %547 {offsets = [0, 0], sizes = [2, 64], strides = [1, 1]} : vector<2x192xf32> to vector<2x64xf32>
    %550 = arith.addf %548, %549 : vector<2x64xf32>
    %551 = arith.negf %550 : vector<2x64xf32>
    %552 = math.exp %551 : vector<2x64xf32>
    %cst_149 = arith.constant 1.000000e+00 : f32
    %553 = vector.broadcast %cst_149 : f32 to vector<2x64xf32>
    %554 = arith.addf %553, %552 : vector<2x64xf32>
    %555 = arith.divf %553, %554 : vector<2x64xf32>
    %556 = vector.extract_strided_slice %544 {offsets = [0, 64], sizes = [2, 64], strides = [1, 1]} : vector<2x192xf32> to vector<2x64xf32>
    %557 = vector.extract_strided_slice %547 {offsets = [0, 64], sizes = [2, 64], strides = [1, 1]} : vector<2x192xf32> to vector<2x64xf32>
    %558 = arith.addf %556, %557 : vector<2x64xf32>
    %559 = arith.negf %558 : vector<2x64xf32>
    %560 = math.exp %559 : vector<2x64xf32>
    %cst_150 = arith.constant 1.000000e+00 : f32
    %561 = vector.broadcast %cst_150 : f32 to vector<2x64xf32>
    %562 = arith.addf %561, %560 : vector<2x64xf32>
    %563 = arith.divf %561, %562 : vector<2x64xf32>
    %564 = vector.extract_strided_slice %544 {offsets = [0, 128], sizes = [2, 64], strides = [1, 1]} : vector<2x192xf32> to vector<2x64xf32>
    %565 = vector.extract_strided_slice %547 {offsets = [0, 128], sizes = [2, 64], strides = [1, 1]} : vector<2x192xf32> to vector<2x64xf32>
    %566 = arith.mulf %555, %565 : vector<2x64xf32>
    %567 = arith.addf %564, %566 : vector<2x64xf32>
    %568 = math.tanh %567 : vector<2x64xf32>
    %cst_151 = arith.constant 1.000000e+00 : f32
    %569 = vector.broadcast %cst_151 : f32 to vector<2x64xf32>
    %570 = arith.subf %569, %563 : vector<2x64xf32>
    %571 = arith.mulf %570, %568 : vector<2x64xf32>
    %572 = arith.mulf %563, %502 : vector<2x64xf32>
    %573 = arith.addf %571, %572 : vector<2x64xf32>
    %c7_i32_152 = arith.constant 7 : i32
    %574 = arith.subi %c7_i32_152, %c3_i32_144 : i32
    %575 = arith.index_cast %574 : i32 to index
    %c0_153 = arith.constant 0 : index
    %c0_154 = arith.constant 0 : index
    %576 = vector.load %arg18[%575, %c0_153, %c0_154] : memref<8x2x16xf32, #tpu.memory_space<vmem>>, vector<1x2x16xf32>
    %577 = vector.shape_cast %576 : vector<1x2x16xf32> to vector<2x16xf32>
    %cst_155 = arith.constant dense<0.000000e+00> : vector<2x192xf32>
    %578 = tpu.matmul %577, %8, %cst_155 {dimension_numbers = #tpu.dot_dimension_numbers<[1], [0], [0], [1], [0, 0, 1, 1], [], []>} : vector<2x16xf32>, vector<16x192xf32>, vector<2x192xf32> -> vector<2x192xf32>
    %579 = vector.broadcast %10 : vector<1x192xf32> to vector<2x192xf32>
    %580 = arith.addf %578, %579 : vector<2x192xf32>
    %cst_156 = arith.constant dense<0.000000e+00> : vector<2x192xf32>
    %581 = tpu.matmul %538, %9, %cst_156 {dimension_numbers = #tpu.dot_dimension_numbers<[1], [0], [0], [1], [0, 0, 1, 1], [], []>} : vector<2x64xf32>, vector<64x192xf32>, vector<2x192xf32> -> vector<2x192xf32>
    %582 = vector.broadcast %11 : vector<1x192xf32> to vector<2x192xf32>
    %583 = arith.addf %581, %582 : vector<2x192xf32>
    %584 = vector.extract_strided_slice %580 {offsets = [0, 0], sizes = [2, 64], strides = [1, 1]} : vector<2x192xf32> to vector<2x64xf32>
    %585 = vector.extract_strided_slice %583 {offsets = [0, 0], sizes = [2, 64], strides = [1, 1]} : vector<2x192xf32> to vector<2x64xf32>
    %586 = arith.addf %584, %585 : vector<2x64xf32>
    %587 = arith.negf %586 : vector<2x64xf32>
    %588 = math.exp %587 : vector<2x64xf32>
    %cst_157 = arith.constant 1.000000e+00 : f32
    %589 = vector.broadcast %cst_157 : f32 to vector<2x64xf32>
    %590 = arith.addf %589, %588 : vector<2x64xf32>
    %591 = arith.divf %589, %590 : vector<2x64xf32>
    %592 = vector.extract_strided_slice %580 {offsets = [0, 64], sizes = [2, 64], strides = [1, 1]} : vector<2x192xf32> to vector<2x64xf32>
    %593 = vector.extract_strided_slice %583 {offsets = [0, 64], sizes = [2, 64], strides = [1, 1]} : vector<2x192xf32> to vector<2x64xf32>
    %594 = arith.addf %592, %593 : vector<2x64xf32>
    %595 = arith.negf %594 : vector<2x64xf32>
    %596 = math.exp %595 : vector<2x64xf32>
    %cst_158 = arith.constant 1.000000e+00 : f32
    %597 = vector.broadcast %cst_158 : f32 to vector<2x64xf32>
    %598 = arith.addf %597, %596 : vector<2x64xf32>
    %599 = arith.divf %597, %598 : vector<2x64xf32>
    %600 = vector.extract_strided_slice %580 {offsets = [0, 128], sizes = [2, 64], strides = [1, 1]} : vector<2x192xf32> to vector<2x64xf32>
    %601 = vector.extract_strided_slice %583 {offsets = [0, 128], sizes = [2, 64], strides = [1, 1]} : vector<2x192xf32> to vector<2x64xf32>
    %602 = arith.mulf %591, %601 : vector<2x64xf32>
    %603 = arith.addf %600, %602 : vector<2x64xf32>
    %604 = math.tanh %603 : vector<2x64xf32>
    %cst_159 = arith.constant 1.000000e+00 : f32
    %605 = vector.broadcast %cst_159 : f32 to vector<2x64xf32>
    %606 = arith.subf %605, %599 : vector<2x64xf32>
    %607 = arith.mulf %606, %604 : vector<2x64xf32>
    %608 = arith.mulf %599, %538 : vector<2x64xf32>
    %609 = arith.addf %607, %608 : vector<2x64xf32>
    %c4_i32_160 = arith.constant 4 : i32
    %610 = arith.index_cast %c4_i32_160 : i32 to index
    %c0_161 = arith.constant 0 : index
    %c0_162 = arith.constant 0 : index
    %611 = vector.load %arg18[%610, %c0_161, %c0_162] : memref<8x2x16xf32, #tpu.memory_space<vmem>>, vector<1x2x16xf32>
    %612 = vector.shape_cast %611 : vector<1x2x16xf32> to vector<2x16xf32>
    %cst_163 = arith.constant dense<0.000000e+00> : vector<2x192xf32>
    %613 = tpu.matmul %612, %4, %cst_163 {dimension_numbers = #tpu.dot_dimension_numbers<[1], [0], [0], [1], [0, 0, 1, 1], [], []>} : vector<2x16xf32>, vector<16x192xf32>, vector<2x192xf32> -> vector<2x192xf32>
    %614 = vector.broadcast %6 : vector<1x192xf32> to vector<2x192xf32>
    %615 = arith.addf %613, %614 : vector<2x192xf32>
    %cst_164 = arith.constant dense<0.000000e+00> : vector<2x192xf32>
    %616 = tpu.matmul %573, %5, %cst_164 {dimension_numbers = #tpu.dot_dimension_numbers<[1], [0], [0], [1], [0, 0, 1, 1], [], []>} : vector<2x64xf32>, vector<64x192xf32>, vector<2x192xf32> -> vector<2x192xf32>
    %617 = vector.broadcast %7 : vector<1x192xf32> to vector<2x192xf32>
    %618 = arith.addf %616, %617 : vector<2x192xf32>
    %619 = vector.extract_strided_slice %615 {offsets = [0, 0], sizes = [2, 64], strides = [1, 1]} : vector<2x192xf32> to vector<2x64xf32>
    %620 = vector.extract_strided_slice %618 {offsets = [0, 0], sizes = [2, 64], strides = [1, 1]} : vector<2x192xf32> to vector<2x64xf32>
    %621 = arith.addf %619, %620 : vector<2x64xf32>
    %622 = arith.negf %621 : vector<2x64xf32>
    %623 = math.exp %622 : vector<2x64xf32>
    %cst_165 = arith.constant 1.000000e+00 : f32
    %624 = vector.broadcast %cst_165 : f32 to vector<2x64xf32>
    %625 = arith.addf %624, %623 : vector<2x64xf32>
    %626 = arith.divf %624, %625 : vector<2x64xf32>
    %627 = vector.extract_strided_slice %615 {offsets = [0, 64], sizes = [2, 64], strides = [1, 1]} : vector<2x192xf32> to vector<2x64xf32>
    %628 = vector.extract_strided_slice %618 {offsets = [0, 64], sizes = [2, 64], strides = [1, 1]} : vector<2x192xf32> to vector<2x64xf32>
    %629 = arith.addf %627, %628 : vector<2x64xf32>
    %630 = arith.negf %629 : vector<2x64xf32>
    %631 = math.exp %630 : vector<2x64xf32>
    %cst_166 = arith.constant 1.000000e+00 : f32
    %632 = vector.broadcast %cst_166 : f32 to vector<2x64xf32>
    %633 = arith.addf %632, %631 : vector<2x64xf32>
    %634 = arith.divf %632, %633 : vector<2x64xf32>
    %635 = vector.extract_strided_slice %615 {offsets = [0, 128], sizes = [2, 64], strides = [1, 1]} : vector<2x192xf32> to vector<2x64xf32>
    %636 = vector.extract_strided_slice %618 {offsets = [0, 128], sizes = [2, 64], strides = [1, 1]} : vector<2x192xf32> to vector<2x64xf32>
    %637 = arith.mulf %626, %636 : vector<2x64xf32>
    %638 = arith.addf %635, %637 : vector<2x64xf32>
    %639 = math.tanh %638 : vector<2x64xf32>
    %cst_167 = arith.constant 1.000000e+00 : f32
    %640 = vector.broadcast %cst_167 : f32 to vector<2x64xf32>
    %641 = arith.subf %640, %634 : vector<2x64xf32>
    %642 = arith.mulf %641, %639 : vector<2x64xf32>
    %643 = arith.mulf %634, %573 : vector<2x64xf32>
    %644 = arith.addf %642, %643 : vector<2x64xf32>
    %c7_i32_168 = arith.constant 7 : i32
    %645 = arith.subi %c7_i32_168, %c4_i32_160 : i32
    %646 = arith.index_cast %645 : i32 to index
    %c0_169 = arith.constant 0 : index
    %c0_170 = arith.constant 0 : index
    %647 = vector.load %arg18[%646, %c0_169, %c0_170] : memref<8x2x16xf32, #tpu.memory_space<vmem>>, vector<1x2x16xf32>
    %648 = vector.shape_cast %647 : vector<1x2x16xf32> to vector<2x16xf32>
    %cst_171 = arith.constant dense<0.000000e+00> : vector<2x192xf32>
    %649 = tpu.matmul %648, %8, %cst_171 {dimension_numbers = #tpu.dot_dimension_numbers<[1], [0], [0], [1], [0, 0, 1, 1], [], []>} : vector<2x16xf32>, vector<16x192xf32>, vector<2x192xf32> -> vector<2x192xf32>
    %650 = vector.broadcast %10 : vector<1x192xf32> to vector<2x192xf32>
    %651 = arith.addf %649, %650 : vector<2x192xf32>
    %cst_172 = arith.constant dense<0.000000e+00> : vector<2x192xf32>
    %652 = tpu.matmul %609, %9, %cst_172 {dimension_numbers = #tpu.dot_dimension_numbers<[1], [0], [0], [1], [0, 0, 1, 1], [], []>} : vector<2x64xf32>, vector<64x192xf32>, vector<2x192xf32> -> vector<2x192xf32>
    %653 = vector.broadcast %11 : vector<1x192xf32> to vector<2x192xf32>
    %654 = arith.addf %652, %653 : vector<2x192xf32>
    %655 = vector.extract_strided_slice %651 {offsets = [0, 0], sizes = [2, 64], strides = [1, 1]} : vector<2x192xf32> to vector<2x64xf32>
    %656 = vector.extract_strided_slice %654 {offsets = [0, 0], sizes = [2, 64], strides = [1, 1]} : vector<2x192xf32> to vector<2x64xf32>
    %657 = arith.addf %655, %656 : vector<2x64xf32>
    %658 = arith.negf %657 : vector<2x64xf32>
    %659 = math.exp %658 : vector<2x64xf32>
    %cst_173 = arith.constant 1.000000e+00 : f32
    %660 = vector.broadcast %cst_173 : f32 to vector<2x64xf32>
    %661 = arith.addf %660, %659 : vector<2x64xf32>
    %662 = arith.divf %660, %661 : vector<2x64xf32>
    %663 = vector.extract_strided_slice %651 {offsets = [0, 64], sizes = [2, 64], strides = [1, 1]} : vector<2x192xf32> to vector<2x64xf32>
    %664 = vector.extract_strided_slice %654 {offsets = [0, 64], sizes = [2, 64], strides = [1, 1]} : vector<2x192xf32> to vector<2x64xf32>
    %665 = arith.addf %663, %664 : vector<2x64xf32>
    %666 = arith.negf %665 : vector<2x64xf32>
    %667 = math.exp %666 : vector<2x64xf32>
    %cst_174 = arith.constant 1.000000e+00 : f32
    %668 = vector.broadcast %cst_174 : f32 to vector<2x64xf32>
    %669 = arith.addf %668, %667 : vector<2x64xf32>
    %670 = arith.divf %668, %669 : vector<2x64xf32>
    %671 = vector.extract_strided_slice %651 {offsets = [0, 128], sizes = [2, 64], strides = [1, 1]} : vector<2x192xf32> to vector<2x64xf32>
    %672 = vector.extract_strided_slice %654 {offsets = [0, 128], sizes = [2, 64], strides = [1, 1]} : vector<2x192xf32> to vector<2x64xf32>
    %673 = arith.mulf %662, %672 : vector<2x64xf32>
    %674 = arith.addf %671, %673 : vector<2x64xf32>
    %675 = math.tanh %674 : vector<2x64xf32>
    %cst_175 = arith.constant 1.000000e+00 : f32
    %676 = vector.broadcast %cst_175 : f32 to vector<2x64xf32>
    %677 = arith.subf %676, %670 : vector<2x64xf32>
    %678 = arith.mulf %677, %675 : vector<2x64xf32>
    %679 = arith.mulf %670, %609 : vector<2x64xf32>
    %680 = arith.addf %678, %679 : vector<2x64xf32>
    %c5_i32_176 = arith.constant 5 : i32
    %681 = arith.index_cast %c5_i32_176 : i32 to index
    %c0_177 = arith.constant 0 : index
    %c0_178 = arith.constant 0 : index
    %682 = vector.load %arg18[%681, %c0_177, %c0_178] : memref<8x2x16xf32, #tpu.memory_space<vmem>>, vector<1x2x16xf32>
    %683 = vector.shape_cast %682 : vector<1x2x16xf32> to vector<2x16xf32>
    %cst_179 = arith.constant dense<0.000000e+00> : vector<2x192xf32>
    %684 = tpu.matmul %683, %4, %cst_179 {dimension_numbers = #tpu.dot_dimension_numbers<[1], [0], [0], [1], [0, 0, 1, 1], [], []>} : vector<2x16xf32>, vector<16x192xf32>, vector<2x192xf32> -> vector<2x192xf32>
    %685 = vector.broadcast %6 : vector<1x192xf32> to vector<2x192xf32>
    %686 = arith.addf %684, %685 : vector<2x192xf32>
    %cst_180 = arith.constant dense<0.000000e+00> : vector<2x192xf32>
    %687 = tpu.matmul %644, %5, %cst_180 {dimension_numbers = #tpu.dot_dimension_numbers<[1], [0], [0], [1], [0, 0, 1, 1], [], []>} : vector<2x64xf32>, vector<64x192xf32>, vector<2x192xf32> -> vector<2x192xf32>
    %688 = vector.broadcast %7 : vector<1x192xf32> to vector<2x192xf32>
    %689 = arith.addf %687, %688 : vector<2x192xf32>
    %690 = vector.extract_strided_slice %686 {offsets = [0, 0], sizes = [2, 64], strides = [1, 1]} : vector<2x192xf32> to vector<2x64xf32>
    %691 = vector.extract_strided_slice %689 {offsets = [0, 0], sizes = [2, 64], strides = [1, 1]} : vector<2x192xf32> to vector<2x64xf32>
    %692 = arith.addf %690, %691 : vector<2x64xf32>
    %693 = arith.negf %692 : vector<2x64xf32>
    %694 = math.exp %693 : vector<2x64xf32>
    %cst_181 = arith.constant 1.000000e+00 : f32
    %695 = vector.broadcast %cst_181 : f32 to vector<2x64xf32>
    %696 = arith.addf %695, %694 : vector<2x64xf32>
    %697 = arith.divf %695, %696 : vector<2x64xf32>
    %698 = vector.extract_strided_slice %686 {offsets = [0, 64], sizes = [2, 64], strides = [1, 1]} : vector<2x192xf32> to vector<2x64xf32>
    %699 = vector.extract_strided_slice %689 {offsets = [0, 64], sizes = [2, 64], strides = [1, 1]} : vector<2x192xf32> to vector<2x64xf32>
    %700 = arith.addf %698, %699 : vector<2x64xf32>
    %701 = arith.negf %700 : vector<2x64xf32>
    %702 = math.exp %701 : vector<2x64xf32>
    %cst_182 = arith.constant 1.000000e+00 : f32
    %703 = vector.broadcast %cst_182 : f32 to vector<2x64xf32>
    %704 = arith.addf %703, %702 : vector<2x64xf32>
    %705 = arith.divf %703, %704 : vector<2x64xf32>
    %706 = vector.extract_strided_slice %686 {offsets = [0, 128], sizes = [2, 64], strides = [1, 1]} : vector<2x192xf32> to vector<2x64xf32>
    %707 = vector.extract_strided_slice %689 {offsets = [0, 128], sizes = [2, 64], strides = [1, 1]} : vector<2x192xf32> to vector<2x64xf32>
    %708 = arith.mulf %697, %707 : vector<2x64xf32>
    %709 = arith.addf %706, %708 : vector<2x64xf32>
    %710 = math.tanh %709 : vector<2x64xf32>
    %cst_183 = arith.constant 1.000000e+00 : f32
    %711 = vector.broadcast %cst_183 : f32 to vector<2x64xf32>
    %712 = arith.subf %711, %705 : vector<2x64xf32>
    %713 = arith.mulf %712, %710 : vector<2x64xf32>
    %714 = arith.mulf %705, %644 : vector<2x64xf32>
    %715 = arith.addf %713, %714 : vector<2x64xf32>
    %c7_i32_184 = arith.constant 7 : i32
    %716 = arith.subi %c7_i32_184, %c5_i32_176 : i32
    %717 = arith.index_cast %716 : i32 to index
    %c0_185 = arith.constant 0 : index
    %c0_186 = arith.constant 0 : index
    %718 = vector.load %arg18[%717, %c0_185, %c0_186] : memref<8x2x16xf32, #tpu.memory_space<vmem>>, vector<1x2x16xf32>
    %719 = vector.shape_cast %718 : vector<1x2x16xf32> to vector<2x16xf32>
    %cst_187 = arith.constant dense<0.000000e+00> : vector<2x192xf32>
    %720 = tpu.matmul %719, %8, %cst_187 {dimension_numbers = #tpu.dot_dimension_numbers<[1], [0], [0], [1], [0, 0, 1, 1], [], []>} : vector<2x16xf32>, vector<16x192xf32>, vector<2x192xf32> -> vector<2x192xf32>
    %721 = vector.broadcast %10 : vector<1x192xf32> to vector<2x192xf32>
    %722 = arith.addf %720, %721 : vector<2x192xf32>
    %cst_188 = arith.constant dense<0.000000e+00> : vector<2x192xf32>
    %723 = tpu.matmul %680, %9, %cst_188 {dimension_numbers = #tpu.dot_dimension_numbers<[1], [0], [0], [1], [0, 0, 1, 1], [], []>} : vector<2x64xf32>, vector<64x192xf32>, vector<2x192xf32> -> vector<2x192xf32>
    %724 = vector.broadcast %11 : vector<1x192xf32> to vector<2x192xf32>
    %725 = arith.addf %723, %724 : vector<2x192xf32>
    %726 = vector.extract_strided_slice %722 {offsets = [0, 0], sizes = [2, 64], strides = [1, 1]} : vector<2x192xf32> to vector<2x64xf32>
    %727 = vector.extract_strided_slice %725 {offsets = [0, 0], sizes = [2, 64], strides = [1, 1]} : vector<2x192xf32> to vector<2x64xf32>
    %728 = arith.addf %726, %727 : vector<2x64xf32>
    %729 = arith.negf %728 : vector<2x64xf32>
    %730 = math.exp %729 : vector<2x64xf32>
    %cst_189 = arith.constant 1.000000e+00 : f32
    %731 = vector.broadcast %cst_189 : f32 to vector<2x64xf32>
    %732 = arith.addf %731, %730 : vector<2x64xf32>
    %733 = arith.divf %731, %732 : vector<2x64xf32>
    %734 = vector.extract_strided_slice %722 {offsets = [0, 64], sizes = [2, 64], strides = [1, 1]} : vector<2x192xf32> to vector<2x64xf32>
    %735 = vector.extract_strided_slice %725 {offsets = [0, 64], sizes = [2, 64], strides = [1, 1]} : vector<2x192xf32> to vector<2x64xf32>
    %736 = arith.addf %734, %735 : vector<2x64xf32>
    %737 = arith.negf %736 : vector<2x64xf32>
    %738 = math.exp %737 : vector<2x64xf32>
    %cst_190 = arith.constant 1.000000e+00 : f32
    %739 = vector.broadcast %cst_190 : f32 to vector<2x64xf32>
    %740 = arith.addf %739, %738 : vector<2x64xf32>
    %741 = arith.divf %739, %740 : vector<2x64xf32>
    %742 = vector.extract_strided_slice %722 {offsets = [0, 128], sizes = [2, 64], strides = [1, 1]} : vector<2x192xf32> to vector<2x64xf32>
    %743 = vector.extract_strided_slice %725 {offsets = [0, 128], sizes = [2, 64], strides = [1, 1]} : vector<2x192xf32> to vector<2x64xf32>
    %744 = arith.mulf %733, %743 : vector<2x64xf32>
    %745 = arith.addf %742, %744 : vector<2x64xf32>
    %746 = math.tanh %745 : vector<2x64xf32>
    %cst_191 = arith.constant 1.000000e+00 : f32
    %747 = vector.broadcast %cst_191 : f32 to vector<2x64xf32>
    %748 = arith.subf %747, %741 : vector<2x64xf32>
    %749 = arith.mulf %748, %746 : vector<2x64xf32>
    %750 = arith.mulf %741, %680 : vector<2x64xf32>
    %751 = arith.addf %749, %750 : vector<2x64xf32>
    %c6_i32_192 = arith.constant 6 : i32
    %752 = arith.index_cast %c6_i32_192 : i32 to index
    %c0_193 = arith.constant 0 : index
    %c0_194 = arith.constant 0 : index
    %753 = vector.load %arg18[%752, %c0_193, %c0_194] : memref<8x2x16xf32, #tpu.memory_space<vmem>>, vector<1x2x16xf32>
    %754 = vector.shape_cast %753 : vector<1x2x16xf32> to vector<2x16xf32>
    %cst_195 = arith.constant dense<0.000000e+00> : vector<2x192xf32>
    %755 = tpu.matmul %754, %4, %cst_195 {dimension_numbers = #tpu.dot_dimension_numbers<[1], [0], [0], [1], [0, 0, 1, 1], [], []>} : vector<2x16xf32>, vector<16x192xf32>, vector<2x192xf32> -> vector<2x192xf32>
    %756 = vector.broadcast %6 : vector<1x192xf32> to vector<2x192xf32>
    %757 = arith.addf %755, %756 : vector<2x192xf32>
    %cst_196 = arith.constant dense<0.000000e+00> : vector<2x192xf32>
    %758 = tpu.matmul %715, %5, %cst_196 {dimension_numbers = #tpu.dot_dimension_numbers<[1], [0], [0], [1], [0, 0, 1, 1], [], []>} : vector<2x64xf32>, vector<64x192xf32>, vector<2x192xf32> -> vector<2x192xf32>
    %759 = vector.broadcast %7 : vector<1x192xf32> to vector<2x192xf32>
    %760 = arith.addf %758, %759 : vector<2x192xf32>
    %761 = vector.extract_strided_slice %757 {offsets = [0, 0], sizes = [2, 64], strides = [1, 1]} : vector<2x192xf32> to vector<2x64xf32>
    %762 = vector.extract_strided_slice %760 {offsets = [0, 0], sizes = [2, 64], strides = [1, 1]} : vector<2x192xf32> to vector<2x64xf32>
    %763 = arith.addf %761, %762 : vector<2x64xf32>
    %764 = arith.negf %763 : vector<2x64xf32>
    %765 = math.exp %764 : vector<2x64xf32>
    %cst_197 = arith.constant 1.000000e+00 : f32
    %766 = vector.broadcast %cst_197 : f32 to vector<2x64xf32>
    %767 = arith.addf %766, %765 : vector<2x64xf32>
    %768 = arith.divf %766, %767 : vector<2x64xf32>
    %769 = vector.extract_strided_slice %757 {offsets = [0, 64], sizes = [2, 64], strides = [1, 1]} : vector<2x192xf32> to vector<2x64xf32>
    %770 = vector.extract_strided_slice %760 {offsets = [0, 64], sizes = [2, 64], strides = [1, 1]} : vector<2x192xf32> to vector<2x64xf32>
    %771 = arith.addf %769, %770 : vector<2x64xf32>
    %772 = arith.negf %771 : vector<2x64xf32>
    %773 = math.exp %772 : vector<2x64xf32>
    %cst_198 = arith.constant 1.000000e+00 : f32
    %774 = vector.broadcast %cst_198 : f32 to vector<2x64xf32>
    %775 = arith.addf %774, %773 : vector<2x64xf32>
    %776 = arith.divf %774, %775 : vector<2x64xf32>
    %777 = vector.extract_strided_slice %757 {offsets = [0, 128], sizes = [2, 64], strides = [1, 1]} : vector<2x192xf32> to vector<2x64xf32>
    %778 = vector.extract_strided_slice %760 {offsets = [0, 128], sizes = [2, 64], strides = [1, 1]} : vector<2x192xf32> to vector<2x64xf32>
    %779 = arith.mulf %768, %778 : vector<2x64xf32>
    %780 = arith.addf %777, %779 : vector<2x64xf32>
    %781 = math.tanh %780 : vector<2x64xf32>
    %cst_199 = arith.constant 1.000000e+00 : f32
    %782 = vector.broadcast %cst_199 : f32 to vector<2x64xf32>
    %783 = arith.subf %782, %776 : vector<2x64xf32>
    %784 = arith.mulf %783, %781 : vector<2x64xf32>
    %785 = arith.mulf %776, %715 : vector<2x64xf32>
    %786 = arith.addf %784, %785 : vector<2x64xf32>
    %c7_i32_200 = arith.constant 7 : i32
    %787 = arith.subi %c7_i32_200, %c6_i32_192 : i32
    %788 = arith.index_cast %787 : i32 to index
    %c0_201 = arith.constant 0 : index
    %c0_202 = arith.constant 0 : index
    %789 = vector.load %arg18[%788, %c0_201, %c0_202] : memref<8x2x16xf32, #tpu.memory_space<vmem>>, vector<1x2x16xf32>
    %790 = vector.shape_cast %789 : vector<1x2x16xf32> to vector<2x16xf32>
    %cst_203 = arith.constant dense<0.000000e+00> : vector<2x192xf32>
    %791 = tpu.matmul %790, %8, %cst_203 {dimension_numbers = #tpu.dot_dimension_numbers<[1], [0], [0], [1], [0, 0, 1, 1], [], []>} : vector<2x16xf32>, vector<16x192xf32>, vector<2x192xf32> -> vector<2x192xf32>
    %792 = vector.broadcast %10 : vector<1x192xf32> to vector<2x192xf32>
    %793 = arith.addf %791, %792 : vector<2x192xf32>
    %cst_204 = arith.constant dense<0.000000e+00> : vector<2x192xf32>
    %794 = tpu.matmul %751, %9, %cst_204 {dimension_numbers = #tpu.dot_dimension_numbers<[1], [0], [0], [1], [0, 0, 1, 1], [], []>} : vector<2x64xf32>, vector<64x192xf32>, vector<2x192xf32> -> vector<2x192xf32>
    %795 = vector.broadcast %11 : vector<1x192xf32> to vector<2x192xf32>
    %796 = arith.addf %794, %795 : vector<2x192xf32>
    %797 = vector.extract_strided_slice %793 {offsets = [0, 0], sizes = [2, 64], strides = [1, 1]} : vector<2x192xf32> to vector<2x64xf32>
    %798 = vector.extract_strided_slice %796 {offsets = [0, 0], sizes = [2, 64], strides = [1, 1]} : vector<2x192xf32> to vector<2x64xf32>
    %799 = arith.addf %797, %798 : vector<2x64xf32>
    %800 = arith.negf %799 : vector<2x64xf32>
    %801 = math.exp %800 : vector<2x64xf32>
    %cst_205 = arith.constant 1.000000e+00 : f32
    %802 = vector.broadcast %cst_205 : f32 to vector<2x64xf32>
    %803 = arith.addf %802, %801 : vector<2x64xf32>
    %804 = arith.divf %802, %803 : vector<2x64xf32>
    %805 = vector.extract_strided_slice %793 {offsets = [0, 64], sizes = [2, 64], strides = [1, 1]} : vector<2x192xf32> to vector<2x64xf32>
    %806 = vector.extract_strided_slice %796 {offsets = [0, 64], sizes = [2, 64], strides = [1, 1]} : vector<2x192xf32> to vector<2x64xf32>
    %807 = arith.addf %805, %806 : vector<2x64xf32>
    %808 = arith.negf %807 : vector<2x64xf32>
    %809 = math.exp %808 : vector<2x64xf32>
    %cst_206 = arith.constant 1.000000e+00 : f32
    %810 = vector.broadcast %cst_206 : f32 to vector<2x64xf32>
    %811 = arith.addf %810, %809 : vector<2x64xf32>
    %812 = arith.divf %810, %811 : vector<2x64xf32>
    %813 = vector.extract_strided_slice %793 {offsets = [0, 128], sizes = [2, 64], strides = [1, 1]} : vector<2x192xf32> to vector<2x64xf32>
    %814 = vector.extract_strided_slice %796 {offsets = [0, 128], sizes = [2, 64], strides = [1, 1]} : vector<2x192xf32> to vector<2x64xf32>
    %815 = arith.mulf %804, %814 : vector<2x64xf32>
    %816 = arith.addf %813, %815 : vector<2x64xf32>
    %817 = math.tanh %816 : vector<2x64xf32>
    %cst_207 = arith.constant 1.000000e+00 : f32
    %818 = vector.broadcast %cst_207 : f32 to vector<2x64xf32>
    %819 = arith.subf %818, %812 : vector<2x64xf32>
    %820 = arith.mulf %819, %817 : vector<2x64xf32>
    %821 = arith.mulf %812, %751 : vector<2x64xf32>
    %822 = arith.addf %820, %821 : vector<2x64xf32>
    %c7_i32_208 = arith.constant 7 : i32
    %823 = arith.index_cast %c7_i32_208 : i32 to index
    %c0_209 = arith.constant 0 : index
    %c0_210 = arith.constant 0 : index
    %824 = vector.load %arg18[%823, %c0_209, %c0_210] : memref<8x2x16xf32, #tpu.memory_space<vmem>>, vector<1x2x16xf32>
    %825 = vector.shape_cast %824 : vector<1x2x16xf32> to vector<2x16xf32>
    %cst_211 = arith.constant dense<0.000000e+00> : vector<2x192xf32>
    %826 = tpu.matmul %825, %4, %cst_211 {dimension_numbers = #tpu.dot_dimension_numbers<[1], [0], [0], [1], [0, 0, 1, 1], [], []>} : vector<2x16xf32>, vector<16x192xf32>, vector<2x192xf32> -> vector<2x192xf32>
    %827 = vector.broadcast %6 : vector<1x192xf32> to vector<2x192xf32>
    %828 = arith.addf %826, %827 : vector<2x192xf32>
    %cst_212 = arith.constant dense<0.000000e+00> : vector<2x192xf32>
    %829 = tpu.matmul %786, %5, %cst_212 {dimension_numbers = #tpu.dot_dimension_numbers<[1], [0], [0], [1], [0, 0, 1, 1], [], []>} : vector<2x64xf32>, vector<64x192xf32>, vector<2x192xf32> -> vector<2x192xf32>
    %830 = vector.broadcast %7 : vector<1x192xf32> to vector<2x192xf32>
    %831 = arith.addf %829, %830 : vector<2x192xf32>
    %832 = vector.extract_strided_slice %828 {offsets = [0, 0], sizes = [2, 64], strides = [1, 1]} : vector<2x192xf32> to vector<2x64xf32>
    %833 = vector.extract_strided_slice %831 {offsets = [0, 0], sizes = [2, 64], strides = [1, 1]} : vector<2x192xf32> to vector<2x64xf32>
    %834 = arith.addf %832, %833 : vector<2x64xf32>
    %835 = arith.negf %834 : vector<2x64xf32>
    %836 = math.exp %835 : vector<2x64xf32>
    %cst_213 = arith.constant 1.000000e+00 : f32
    %837 = vector.broadcast %cst_213 : f32 to vector<2x64xf32>
    %838 = arith.addf %837, %836 : vector<2x64xf32>
    %839 = arith.divf %837, %838 : vector<2x64xf32>
    %840 = vector.extract_strided_slice %828 {offsets = [0, 64], sizes = [2, 64], strides = [1, 1]} : vector<2x192xf32> to vector<2x64xf32>
    %841 = vector.extract_strided_slice %831 {offsets = [0, 64], sizes = [2, 64], strides = [1, 1]} : vector<2x192xf32> to vector<2x64xf32>
    %842 = arith.addf %840, %841 : vector<2x64xf32>
    %843 = arith.negf %842 : vector<2x64xf32>
    %844 = math.exp %843 : vector<2x64xf32>
    %cst_214 = arith.constant 1.000000e+00 : f32
    %845 = vector.broadcast %cst_214 : f32 to vector<2x64xf32>
    %846 = arith.addf %845, %844 : vector<2x64xf32>
    %847 = arith.divf %845, %846 : vector<2x64xf32>
    %848 = vector.extract_strided_slice %828 {offsets = [0, 128], sizes = [2, 64], strides = [1, 1]} : vector<2x192xf32> to vector<2x64xf32>
    %849 = vector.extract_strided_slice %831 {offsets = [0, 128], sizes = [2, 64], strides = [1, 1]} : vector<2x192xf32> to vector<2x64xf32>
    %850 = arith.mulf %839, %849 : vector<2x64xf32>
    %851 = arith.addf %848, %850 : vector<2x64xf32>
    %852 = math.tanh %851 : vector<2x64xf32>
    %cst_215 = arith.constant 1.000000e+00 : f32
    %853 = vector.broadcast %cst_215 : f32 to vector<2x64xf32>
    %854 = arith.subf %853, %847 : vector<2x64xf32>
    %855 = arith.mulf %854, %852 : vector<2x64xf32>
    %856 = arith.mulf %847, %786 : vector<2x64xf32>
    %857 = arith.addf %855, %856 : vector<2x64xf32>
    %c7_i32_216 = arith.constant 7 : i32
    %858 = arith.subi %c7_i32_216, %c7_i32_208 : i32
    %859 = arith.index_cast %858 : i32 to index
    %c0_217 = arith.constant 0 : index
    %c0_218 = arith.constant 0 : index
    %860 = vector.load %arg18[%859, %c0_217, %c0_218] : memref<8x2x16xf32, #tpu.memory_space<vmem>>, vector<1x2x16xf32>
    %861 = vector.shape_cast %860 : vector<1x2x16xf32> to vector<2x16xf32>
    %cst_219 = arith.constant dense<0.000000e+00> : vector<2x192xf32>
    %862 = tpu.matmul %861, %8, %cst_219 {dimension_numbers = #tpu.dot_dimension_numbers<[1], [0], [0], [1], [0, 0, 1, 1], [], []>} : vector<2x16xf32>, vector<16x192xf32>, vector<2x192xf32> -> vector<2x192xf32>
    %863 = vector.broadcast %10 : vector<1x192xf32> to vector<2x192xf32>
    %864 = arith.addf %862, %863 : vector<2x192xf32>
    %cst_220 = arith.constant dense<0.000000e+00> : vector<2x192xf32>
    %865 = tpu.matmul %822, %9, %cst_220 {dimension_numbers = #tpu.dot_dimension_numbers<[1], [0], [0], [1], [0, 0, 1, 1], [], []>} : vector<2x64xf32>, vector<64x192xf32>, vector<2x192xf32> -> vector<2x192xf32>
    %866 = vector.broadcast %11 : vector<1x192xf32> to vector<2x192xf32>
    %867 = arith.addf %865, %866 : vector<2x192xf32>
    %868 = vector.extract_strided_slice %864 {offsets = [0, 0], sizes = [2, 64], strides = [1, 1]} : vector<2x192xf32> to vector<2x64xf32>
    %869 = vector.extract_strided_slice %867 {offsets = [0, 0], sizes = [2, 64], strides = [1, 1]} : vector<2x192xf32> to vector<2x64xf32>
    %870 = arith.addf %868, %869 : vector<2x64xf32>
    %871 = arith.negf %870 : vector<2x64xf32>
    %872 = math.exp %871 : vector<2x64xf32>
    %cst_221 = arith.constant 1.000000e+00 : f32
    %873 = vector.broadcast %cst_221 : f32 to vector<2x64xf32>
    %874 = arith.addf %873, %872 : vector<2x64xf32>
    %875 = arith.divf %873, %874 : vector<2x64xf32>
    %876 = vector.extract_strided_slice %864 {offsets = [0, 64], sizes = [2, 64], strides = [1, 1]} : vector<2x192xf32> to vector<2x64xf32>
    %877 = vector.extract_strided_slice %867 {offsets = [0, 64], sizes = [2, 64], strides = [1, 1]} : vector<2x192xf32> to vector<2x64xf32>
    %878 = arith.addf %876, %877 : vector<2x64xf32>
    %879 = arith.negf %878 : vector<2x64xf32>
    %880 = math.exp %879 : vector<2x64xf32>
    %cst_222 = arith.constant 1.000000e+00 : f32
    %881 = vector.broadcast %cst_222 : f32 to vector<2x64xf32>
    %882 = arith.addf %881, %880 : vector<2x64xf32>
    %883 = arith.divf %881, %882 : vector<2x64xf32>
    %884 = vector.extract_strided_slice %864 {offsets = [0, 128], sizes = [2, 64], strides = [1, 1]} : vector<2x192xf32> to vector<2x64xf32>
    %885 = vector.extract_strided_slice %867 {offsets = [0, 128], sizes = [2, 64], strides = [1, 1]} : vector<2x192xf32> to vector<2x64xf32>
    %886 = arith.mulf %875, %885 : vector<2x64xf32>
    %887 = arith.addf %884, %886 : vector<2x64xf32>
    %888 = math.tanh %887 : vector<2x64xf32>
    %cst_223 = arith.constant 1.000000e+00 : f32
    %889 = vector.broadcast %cst_223 : f32 to vector<2x64xf32>
    %890 = arith.subf %889, %883 : vector<2x64xf32>
    %891 = arith.mulf %890, %888 : vector<2x64xf32>
    %892 = arith.mulf %883, %822 : vector<2x64xf32>
    %893 = arith.addf %891, %892 : vector<2x64xf32>
    %c8_i32_224 = arith.constant 8 : i32
    %894 = arith.addf %857, %893 : vector<2x64xf32>
    %c0_225 = arith.constant 0 : index
    %c0_226 = arith.constant 0 : index
    %895 = vector.load %arg13[%c0_225, %c0_226] : memref<64x32xf32, #tpu.memory_space<vmem>>, vector<64x32xf32>
    %cst_227 = arith.constant dense<0.000000e+00> : vector<2x32xf32>
    %896 = tpu.matmul %894, %895, %cst_227 {dimension_numbers = #tpu.dot_dimension_numbers<[1], [0], [0], [1], [0, 0, 1, 1], [], []>} : vector<2x64xf32>, vector<64x32xf32>, vector<2x32xf32> -> vector<2x32xf32>
    %c0_228 = arith.constant 0 : index
    %c0_229 = arith.constant 0 : index
    %897 = vector.load %arg14[%c0_228, %c0_229] : memref<1x32xf32, #tpu.memory_space<vmem>>, vector<1x32xf32>
    %898 = vector.broadcast %897 : vector<1x32xf32> to vector<2x32xf32>
    %899 = arith.addf %896, %898 : vector<2x32xf32>
    %c0_230 = arith.constant 0 : index
    %c0_231 = arith.constant 0 : index
    %900 = vector.load %arg15[%c0_230, %c0_231] : memref<32x4xf32, #tpu.memory_space<vmem>>, vector<32x4xf32>
    %cst_232 = arith.constant dense<0.000000e+00> : vector<2x4xf32>
    %901 = tpu.matmul %899, %900, %cst_232 {dimension_numbers = #tpu.dot_dimension_numbers<[1], [0], [0], [1], [0, 0, 1, 1], [], []>} : vector<2x32xf32>, vector<32x4xf32>, vector<2x4xf32> -> vector<2x4xf32>
    %c0_233 = arith.constant 0 : index
    %c0_234 = arith.constant 0 : index
    %902 = vector.load %arg16[%c0_233, %c0_234] : memref<1x4xf32, #tpu.memory_space<vmem>>, vector<1x4xf32>
    %903 = vector.broadcast %902 : vector<1x4xf32> to vector<2x4xf32>
    %904 = arith.addf %901, %903 : vector<2x4xf32>
    %c0_235 = arith.constant 0 : index
    %c0_236 = arith.constant 0 : index
    %905 = vector.load %arg17[%c0_235, %c0_236] : memref<2x4xf32, #tpu.memory_space<vmem>>, vector<2x4xf32>
    tpu.vector_store %arg17[%c0_235, %c0_236], %904 {strides = array<i32>} : memref<2x4xf32, #tpu.memory_space<vmem>>, vector<2x4xf32>,
    return
  }
}

</mosaic_0001>

<bundles_post_ra>
// kernel: gru_forward.1
= control target key start
LH: loop header
LB: loop body
LE: loop exit
PB: predicated region body
PF: predicated region fallthrough
CT: control target
= control target key end

     0   :  { %s6545_s0 = inlined_call_operand.vmem [shape: f32[8,2,4], index: 0, kind: input, shape index: {}]   ;;  %s6546_s1 = inlined_call_operand.vmem [shape: f32[4,48], index: 1, kind: input, shape index: {}]   ;;  %s6547_s2 = inlined_call_operand.hbm [shape: f32[16,48], index: 2, kind: input, shape index: {}]   ;;  %s6548_s3 = inlined_call_operand.vmem [shape: f32[1,48], index: 3, kind: input, shape index: {}]   ;;  %s6549_s4 = inlined_call_operand.hbm [shape: f32[1,48], index: 4, kind: input, shape index: {}]   ;;  %s6550_s5 = inlined_call_operand.vmem [shape: f32[16,192], index: 5, kind: input, shape index: {}]   ;;  %s6551_s6 = inlined_call_operand.vmem [shape: f32[64,192], index: 6, kind: input, shape index: {}]   ;;  %s6552_s7 = inlined_call_operand.hbm [shape: f32[1,192], index: 7, kind: input, shape index: {}]   ;;  %s6553_s8 = inlined_call_operand.hbm [shape: f32[1,192], index: 8, kind: input, shape index: {}]   ;;  %s6554_s9 = inlined_call_operand.hbm [shape: f32[16,192], index: 9, kind: input, shape index: {}]   ;;  %s6555_s10 = inlined_call_operand.hbm [shape: f32[64,192], index: 10, kind: input, shape index: {}]   ;;  %s6556_s11 = inlined_call_operand.hbm [shape: f32[1,192], index: 11, kind: input, shape index: {}]   ;;  %s6557_s12 = inlined_call_operand.hbm [shape: f32[1,192], index: 12, kind: input, shape index: {}]   ;;  %s6558_s13 = inlined_call_operand.vmem [shape: f32[64,32], index: 13, kind: input, shape index: {}]   ;;  %s6559_s14 = inlined_call_operand.hbm [shape: f32[1,32], index: 14, kind: input, shape index: {}]   ;;  %s6560_s15 = inlined_call_operand.vmem [shape: f32[32,4], index: 15, kind: input, shape index: {}]   ;;  %s6561_s16 = inlined_call_operand.vmem [shape: f32[1,4], index: 16, kind: input, shape index: {}]   ;;  %s6562_s17 = inlined_call_operand.hbm [shape: f32[2,4], index: 17, kind: output, shape index: {}]  }
   0x1   :  { %6580 = sst [smem:[#allocation34_spill]] %s6545_s0 }
   0x2   :  { %6581 = sst [smem:[#allocation35_spill]] %s6546_s1 }
   0x3   :  { %22 = vsyncpa [#allocation4], 0 }
   0x4   :  { %23 = vsyncpa [#allocation7], 0 }
   0x5   :  { %24 = vsyncpa [#allocation10], 0 }
   0x6   :  { %25 = vsyncpa [#allocation13], 0 }
   0x7   :  { %26 = vsyncpa [#allocation16], 0 }
   0x8   :  { %27 = vsyncpa [#allocation5], 0  ;;  %s5261_s24 = smov [#allocation6]   ;;  %s5262_s26 = smov [#allocation9]  }
   0x9   :  { %s52_s25 = sshll.u32 %s5261_s24, 4  ;;  %s76_s27 = sshll.u32 %s5262_s26, 4  ;;  %s53_s25 = int_to_ptr.vmem [resolvable:$true] %s52_s25  ;;  %s77_s27 = int_to_ptr.vmem [resolvable:$true] %s76_s27 }
   0xa   :  { %s5057_s28 = scalar_lea.vmem %s53_s25, 16  ;;  %s5061_s29 = scalar_lea.vmem %s53_s25, 32 }
   0xb   :  { %p5058_p0 = scmp.ne.s32.totalorder %s53_s25, %s5057_s28  ;;  %p5062_p1 = scmp.lt.s32.totalorder %s53_s25, %s53_s25 }
   0xc   :  { %p5063_p2 = scmp.lt.s32.totalorder %s5061_s29, %s5057_s28 }
   0xe   :  { %p5064_p3 = por %p5063_p2, %p5062_p1 }
  0x10   :  { %p5065_p4 = pnand %p5064_p3, %p5058_p0 }
  0x12   :  { %5068 = shalt.err (!%p5065_p4)
}
  0x13   :  { %55 = dma.hbm_to_vmem [thread:$0]  %s6549_s4, 16, %s53_s25, [#allocation7]  }
  0x14   :  { %s5077_s18 = scalar_lea.vmem %s77_s27, 32  ;;  %p5082_p6 = scmp.lt.s32.totalorder %s77_s27, %s77_s27 }
  0x15   :  { %p5078_p5 = scmp.ne.s32.totalorder %s77_s27, %s5077_s18  ;;  %p5083_p7 = scmp.lt.s32.totalorder %s5077_s18, %s5077_s18 }
  0x17   :  { %p5084_p8 = por %p5083_p7, %p5082_p6 }
  0x19   :  { %p5085_p9 = pnand %p5084_p8, %p5078_p5 }
  0x1b   :  { %5088 = shalt.err (!%p5085_p9)
}
  0x1c   :  { %79 = dma.hbm_to_vmem [thread:$0]  %s6553_s8, 32, %s77_s27, [#allocation10]  }
  0x1d   :  { %s5263_s20 = smov [#allocation12]   ;;  %s5264_s22 = smov [#allocation15]  }
  0x1e   :  { %s97_s21 = sshll.u32 %s5263_s20, 4  ;;  %s120_s23 = sshll.u32 %s5264_s22, 4  ;;  %s98_s21 = int_to_ptr.vmem [resolvable:$true] %s97_s21  ;;  %s121_s23 = int_to_ptr.vmem [resolvable:$true] %s120_s23 }
  0x1f   :  { %s5097_s24 = scalar_lea.vmem %s98_s21, 2048  ;;  %p5102_p11 = scmp.lt.s32.totalorder %s98_s21, %s98_s21 }
  0x20   :  { %p5098_p10 = scmp.ne.s32.totalorder %s98_s21, %s5097_s24  ;;  %p5103_p12 = scmp.lt.s32.totalorder %s5097_s24, %s5097_s24 }
  0x22   :  { %p5104_p13 = por %p5103_p12, %p5102_p11 }
  0x24   :  { %p5105_p0 = pnand %p5104_p13, %p5098_p10 }
  0x26   :  { %5108 = shalt.err (!%p5105_p0)
}
  0x27   :  { %s5265_s4 = smov 256   ;;  %s5266_s25 = smov 16  }
  0x28   :  { %103 = dma.hbm_to_vmem [thread:$0]  %s6555_s10, 2048, %s98_s21, [#allocation13], %s5265_s4, %s5265_s4, %s5266_s25  }
  0x29   :  { %s5117_s27 = scalar_lea.vmem %s121_s23, 32  ;;  %p5122_p2 = scmp.lt.s32.totalorder %s121_s23, %s121_s23 }
  0x2a   :  { %p5118_p1 = scmp.ne.s32.totalorder %s121_s23, %s5117_s27  ;;  %p5123_p3 = scmp.lt.s32.totalorder %s5117_s27, %s5117_s27 }
  0x2c   :  { %p5124_p4 = por %p5123_p3, %p5122_p2 }
  0x2e   :  { %p5125_p5 = pnand %p5124_p4, %p5118_p1 }
  0x30   :  { %5128 = shalt.err (!%p5125_p5)
}
  0x31   :  { %123 = dma.hbm_to_vmem [thread:$0]  %s6557_s12, 32, %s121_s23, [#allocation16]  }
  0x32   :  { %s5267_s0 = smov [#allocation3]  }
  0x33   :  { %s37_s30 = sshll.u32 %s5267_s0, 4  ;;  %s38_s30 = int_to_ptr.vmem [resolvable:$true] %s37_s30 }
  0x34   :  { %s5137_s18 = scalar_lea.vmem %s38_s30, 256  ;;  %p5142_p7 = scmp.lt.s32.totalorder %s38_s30, %s38_s30 }
  0x35   :  { %p5138_p6 = scmp.ne.s32.totalorder %s38_s30, %s5137_s18  ;;  %p5143_p8 = scmp.lt.s32.totalorder %s5137_s18, %s5137_s18 }
  0x37   :  { %p5144_p9 = por %p5143_p8, %p5142_p7 }
  0x39   :  { %p5145_p10 = pnand %p5144_p9, %p5138_p6 }
  0x3b   :  { %5148 = shalt.err (!%p5145_p10)
}
  0x3c   :  { %s5268_s10 = smov 128   ;;  %s5269_s19 = smov 8  }
  0x3d   :  { %43 = dma.hbm_to_vmem [thread:$0]  %s6547_s2, 256, %s38_s30, [#allocation4], %s5268_s10, %s5268_s10, %s5269_s19  }
  0x3e   :  { %s5270_s21 = smov [#allocation8]   ;;  %s5271_s12 = smov [#allocation11]  }
  0x3f   :  { %s66_s22 = sshll.u32 %s5270_s21, 4  ;;  %s85_s23 = sshll.u32 %s5271_s12, 4  ;;  %s67_s22 = int_to_ptr.vmem [resolvable:$true] %s66_s22  ;;  %s86_s23 = int_to_ptr.vmem [resolvable:$true] %s85_s23 }
  0x40   :  { %s5157_s24 = scalar_lea.vmem %s67_s22, 32  ;;  %p5162_p12 = scmp.lt.s32.totalorder %s67_s22, %s67_s22 }
  0x41   :  { %p5158_p11 = scmp.ne.s32.totalorder %s67_s22, %s5157_s24  ;;  %p5163_p13 = scmp.lt.s32.totalorder %s5157_s24, %s5157_s24 }
  0x43   :  { %p5164_p0 = por %p5163_p13, %p5162_p12 }
  0x45   :  { %p5165_p1 = pnand %p5164_p0, %p5158_p11 }
  0x47   :  { %5168 = shalt.err (!%p5165_p1)
}
  0x48   :  { %69 = dma.hbm_to_vmem [thread:$0]  %s6552_s7, 32, %s67_s22, [#allocation7]  }
  0x49   :  { %s5177_s27 = scalar_lea.vmem %s86_s23, 512  ;;  %p5182_p3 = scmp.lt.s32.totalorder %s86_s23, %s86_s23 }
  0x4a   :  { %p5178_p2 = scmp.ne.s32.totalorder %s86_s23, %s5177_s27  ;;  %p5183_p4 = scmp.lt.s32.totalorder %s5177_s27, %s5177_s27 }
  0x4c   :  { %p5184_p5 = por %p5183_p4, %p5182_p3 }
  0x4e   :  { %p5185_p6 = pnand %p5184_p5, %p5178_p2 }
  0x50   :  { %5188 = shalt.err (!%p5185_p6)
}
  0x51   :  { %91 = dma.hbm_to_vmem [thread:$0]  %s6554_s9, 512, %s86_s23, [#allocation10], %s5265_s4, %s5265_s4, %s5266_s25  }
  0x52   :  { %s5272_s29 = smov [#allocation14]   ;;  %s5273_s30 = smov [#allocation17]  }
  0x53   :  { %s110_s0 = sshll.u32 %s5272_s29, 4  ;;  %s132_s7 = sshll.u32 %s5273_s30, 4  ;;  %s111_s0 = int_to_ptr.vmem [resolvable:$true] %s110_s0  ;;  %s133_s7 = int_to_ptr.vmem [resolvable:$true] %s132_s7 }
  0x54   :  { %s5197_s18 = scalar_lea.vmem %s111_s0, 32  ;;  %p5202_p8 = scmp.lt.s32.totalorder %s111_s0, %s111_s0 }
  0x55   :  { %p5198_p7 = scmp.ne.s32.totalorder %s111_s0, %s5197_s18  ;;  %p5203_p9 = scmp.lt.s32.totalorder %s5197_s18, %s5197_s18 }
  0x57   :  { %p5204_p10 = por %p5203_p9, %p5202_p8 }
  0x59   :  { %p5205_p11 = pnand %p5204_p10, %p5198_p7 }
  0x5b   :  { %5208 = shalt.err (!%p5205_p11)
}
  0x5c   :  { %113 = dma.hbm_to_vmem [thread:$0]  %s6556_s11, 32, %s111_s0, [#allocation13]  }
  0x5d   :  { %s5217_s1 = scalar_lea.vmem %s133_s7, 16  ;;  %s5221_s9 = scalar_lea.vmem %s133_s7, 32 }
  0x5e   :  { %p5218_p12 = scmp.ne.s32.totalorder %s133_s7, %s5217_s1  ;;  %p5222_p13 = scmp.lt.s32.totalorder %s133_s7, %s133_s7 }
  0x5f   :  { %p5223_p0 = scmp.lt.s32.totalorder %s5221_s9, %s5217_s1 }
  0x61   :  { %p5224_p1 = por %p5223_p0, %p5222_p13 }
  0x63   :  { %p5225_p2 = pnand %p5224_p1, %p5218_p12 }
  0x65   :  { %5228 = shalt.err (!%p5225_p2)
}
  0x66   :  { %135 = dma.hbm_to_vmem [thread:$0]  %s6559_s14, 16, %s133_s7, [#allocation16]  }
  0x67   :  { %5249 = dma.done.wait [#allocation4], 256  }
  0x68   :  { %5250 = vsyncadd [#allocation4], 4294967040 }
  0x69   :  { %5251 = dma.done.wait [#allocation7], 48  }
  0x6a   :  { %5252 = vsyncadd [#allocation7], 4294967248 }
  0x6b   :  { %5253 = dma.done.wait [#allocation10], 544  }
  0x6c   :  { %5254 = vsyncadd [#allocation10], 4294966752 }
  0x6d   :  { %5255 = dma.done.wait [#allocation13], 2080  }
  0x6e   :  { %5256 = vsyncadd [#allocation13], 4294965216 }
  0x6f   :  { %5257 = dma.done.wait [#allocation16], 48  }
  0x70   :  { %5258 = vsyncadd [#allocation16], 4294967248  ;;  %v6564_v0 = vmov 0.0   ;;  %vm5275_vm0 = vmmov 0   ;;  %vm227_vm1 = vcmask 1043456   ;;  %vm223_vm2 = vcmask 31744  }
  0x71   :  { %4721 = vmatprep.subr.mxu1 %v6564_v0  ;;  %4716 = vmatprep.subr.mxu0 %v6564_v0  ;;  %v5410_v1 = vld [vmem:[#allocation3 + $0x8] sm:$0xff]  ;;  %s6582_s20 = sld [smem:[#allocation35_spill]]  ;;  %v5417_v3 = vld [vmem:[#allocation3] sm:$0xff]  ;;  %v5442_v6 = vld [vmem:[#allocation6] ss:$0 sm:$0xff]  ;;  %s5276_s23 = smov 96  }
  0x72   :  { %4718 = vmatprep.mubr.msk.f32.mxu0 %vm5275_vm0, %v6564_v0  ;;  %4725 = vmatprep.mubr.msk.f32.mxu1 %vm5275_vm0, %v6564_v0  ;;  %s6583_s12 = sld [smem:[#allocation34_spill]]  ;;  %v5449_v11 = vld [vmem:[%s6548_s3] ss:$0 sm:$0xff]  ;;  %s5277_s8 = smov 32   ;;  %v5506_v29 = vld [vmem:[%s6550_s5 + $0x18] sm:$0xff]  ;;  %v5519_v31 = vld [vmem:[%s6550_s5 + $0x10] sm:$0xff] }
  0x73   :  { %4722 = vmatpush3.msra.mxu1 %v5410_v1  ;;  %s5278_s30 = smov 112   ;;  %v5524_v32 = vld [vmem:[%s6550_s5 + $0x8] sm:$0xff]  ;;  %v5530_v33 = vld [vmem:[%s6550_s5] sm:$0xff]  ;;  %vm411_vm3 = vcmask 123904   ;;  %vm307_vm4 = vcmask 130048   ;;  %vm1763_vm5 = vcmask 523264  }
  0x74   :  { %4723 = vmatprep.subr.mxu1 %v6564_v0  ;;  %vm4477_vm6 = vcmask 261120   ;;  %s5280_s26 = smov [#allocation18]   ;;  %vm4551_vm7 = vcmask 25600  }
  0x75   :  { %4724 = vmatpush3.msra.mxu1 %v5417_v3  ;;  %s4559_s27 = sshll.u32 %s5280_s26, 4  ;;  %s4560_s27 = int_to_ptr.vmem [resolvable:$true] %s4559_s27 }
  0x76   :  { %4726 = vmatmul.mubr.f32.vlgmr.msra.gmra.mxu1 %v6564_v0  ;;  %4733 = vmatprep.subr.mxu1 %v6564_v0  ;;  %p5234_p4 = scmp.lt.s32.totalorder %s4560_s27, %s4560_s27 }
  0x77   :  { %v5415_v2 = vld [vmem:[%s6582_s20] sm:$0xf]  ;;  %4737 = vmatprep.mubr.msk.f32.mxu1 %vm5275_vm0, %v6564_v0  ;;  %4734 = vmatpush3.msra.mxu1 %v5410_v1 }
  0x78   :  { %4717 = vmatpush3.msk.msra.mxu0 %vm227_vm1, %v5415_v2  ;;  %v216_v4 = vld [vmem:[%s6583_s12] sm:$0x3]  ;;  %4735 = vmatprep.subr.mxu1 %v6564_v0  ;;  %v4577_v22 = vld [vmem:[%s6583_s12 + $0x2] sm:$0x3]  ;;  %v4582_v23 = vld [vmem:[%s6583_s12 + $0x4] sm:$0x3] }
  0x79   :  { %4719 = vmatmul.mubr.msk.f32.vlgmr.msra.gmra.mxu0 %vm223_vm2, %v216_v4  ;;  %4728 = vmatprep.subr.mxu0 %v6564_v0  ;;  %v4587_v24 = vld [vmem:[%s6583_s12 + $0x6] sm:$0x3]  ;;  %v4592_v26 = vld [vmem:[%s6583_s12 + $0x8] sm:$0x3]  ;;  %v4597_v27 = vld [vmem:[%s6583_s12 + $0xa] sm:$0x3] }
  0x7a   :  { %4729 = vmatpush3.msk.msra.mxu0 %vm227_vm1, %v5415_v2  ;;  %4730 = vmatprep.mubr.msk.f32.mxu0 %vm5275_vm0, %v6564_v0  ;;  %v4602_v28 = vld [vmem:[%s6583_s12 + $0xc] sm:$0x3]  ;;  %v4607_v30 = vld [vmem:[%s6583_s12 + $0xe] sm:$0x3] }
  0x7b   :  { %4740 = vmatprep.subr.mxu0 %v6564_v0  ;;  %4736 = vmatpush3.msra.mxu1 %v5417_v3 }
  0x7c   :  { %4745 = vmatprep.subr.mxu1 %v6564_v0 }
  0x7d   :  { %4731 = vmatmul.mubr.msk.f32.vlgmr.msra.gmra.mxu0 %vm223_vm2, %v4577_v22 }
  0x7e   :  { %4741 = vmatpush3.msk.msra.mxu0 %vm227_vm1, %v5415_v2  ;;  %4742 = vmatprep.mubr.msk.f32.mxu0 %vm5275_vm0, %v6564_v0 }
  0x7f   :  { %4752 = vmatprep.subr.mxu0 %v6564_v0 }
  0x81   :  { %4743 = vmatmul.mubr.msk.f32.vlgmr.msra.gmra.mxu0 %vm223_vm2, %v4582_v23 }
  0x82   :  { %4753 = vmatpush3.msk.msra.mxu0 %vm227_vm1, %v5415_v2  ;;  %4754 = vmatprep.mubr.msk.f32.mxu0 %vm5275_vm0, %v6564_v0 }
  0x83   :  { %4764 = vmatprep.subr.mxu0 %v6564_v0 }
  0x85   :  { %4755 = vmatmul.mubr.msk.f32.vlgmr.msra.gmra.mxu0 %vm223_vm2, %v4587_v24 }
  0x86   :  { %4765 = vmatpush3.msk.msra.mxu0 %vm227_vm1, %v5415_v2  ;;  %4766 = vmatprep.mubr.msk.f32.mxu0 %vm5275_vm0, %v6564_v0 }
  0x87   :  { %4776 = vmatprep.subr.mxu0 %v6564_v0 }
  0x89   :  { %4767 = vmatmul.mubr.msk.f32.vlgmr.msra.gmra.mxu0 %vm223_vm2, %v4592_v26 }
  0x8a   :  { %4777 = vmatpush3.msk.msra.mxu0 %vm227_vm1, %v5415_v2  ;;  %4778 = vmatprep.mubr.msk.f32.mxu0 %vm5275_vm0, %v6564_v0 }
  0x8b   :  { %4788 = vmatprep.subr.mxu0 %v6564_v0 }
  0x8d   :  { %4779 = vmatmul.mubr.msk.f32.vlgmr.msra.gmra.mxu0 %vm223_vm2, %v4597_v27 }
  0x8e   :  { %4789 = vmatpush3.msk.msra.mxu0 %vm227_vm1, %v5415_v2  ;;  %4790 = vmatprep.mubr.msk.f32.mxu0 %vm5275_vm0, %v6564_v0 }
  0x8f   :  { %4800 = vmatprep.subr.mxu0 %v6564_v0 }
  0x91   :  { %4791 = vmatmul.mubr.msk.f32.vlgmr.msra.gmra.mxu0 %vm223_vm2, %v4602_v28 }
  0x92   :  { %4801 = vmatpush3.msk.msra.mxu0 %vm227_vm1, %v5415_v2  ;;  %4802 = vmatprep.mubr.msk.f32.mxu0 %vm5275_vm0, %v6564_v0 }
  0x93   :  { %1709 = vmatprep.subr.mxu0 %v5506_v29 }
  0x95   :  { %4803 = vmatmul.mubr.msk.f32.vlgmr.msra.gmra.mxu0 %vm223_vm2, %v4607_v30 }
  0x96   :  { %1710 = vmatpush1.msra.mxu0 %v5519_v31  ;;  %1745 = vmatprep.mubr.f32.mxu0 %v6564_v0 }
  0x97   :  { %1711 = vmatprep.subr.mxu0 %v5524_v32 }
  0x98   :  { %1712 = vmatpush1.msra.mxu0 %v5530_v33 }
 0x136   :  { %v377_v7 = vpop.f32.mrf.mxu1 }
 0x137   :  { %v378_v9 = vadd.f32 %v5442_v6, %v377_v7 }
 0x138   :  { %v4727_v10 = vpop.f32.mrf.mxu1 }
 0x139   :  { %v297_v5 = vpop.f32.mrf.mxu0  ;;  %389 = vrot.lane.b32.xlu0 %v378_v9, %s5276_s23 }
 0x13a   :  { %v298_v12 = vadd.f32 %v5449_v11, %v297_v5 }
 0x13b   :  { %v4720_v8 = vpop.f32.mrf.mxu0 }
 0x13c   :  { %v381_v13 = vadd.f32 %v378_v9, %v298_v12 }
 0x13d   :  { %v484_v39 = vpop.f32.mrf.mxu0 }
 0x13e   :  { %v4576_v14 = vmul.f32 -1.442695, %v381_v13  ;;  %v485_v58 = vadd.f32 %v5449_v11, %v484_v39 }
 0x13f   :  { %v4732_v40 = vpop.f32.mrf.mxu0 }
 0x140   :  { %4862 = vpow2.f32 %v4576_v14 }
 0x141   :  { %v5537_v41 = vpop.f32.mrf.mxu0 }
 0x143   :  { %v4744_v42 = vpop.f32.mrf.mxu0 }
 0x145   :  { %v5539_v43 = vpop.f32.mrf.mxu0 }
 0x147   :  { %v4756_v44 = vpop.f32.mrf.mxu0 }
 0x148   :  { %v843_v44 = vadd.f32 %v5449_v11, %v5539_v43 }
 0x149   :  { %v5541_v45 = vpop.f32.mrf.mxu0 }
 0x14b   :  { %v4768_v46 = vpop.f32.mrf.mxu0 }
 0x14d   :  { %v4863_v15 = vpop.eup %4862  ;;  %v5543_v47 = vpop.f32.mrf.mxu0 }
 0x14e   :  { %v385_v16 = vadd.f32 1.0, %v4863_v15 }
 0x14f   :  { %v4780_v48 = vpop.f32.mrf.mxu0 }
 0x150   :  { %4864 = vrcp.f32 %v385_v16 }
 0x151   :  { %v5555_v51 = vpop.f32.mrf.mxu0 }
 0x153   :  { %v4792_v52 = vpop.f32.mrf.mxu0 }
 0x155   :  { %v5557_v53 = vpop.f32.mrf.mxu0 }
 0x157   :  { %v4804_v54 = vpop.f32.mrf.mxu0 }
 0x15d   :  { %v4865_v17 = vpop.eup %4864 }
 0x15e   :  { %v399_v34 = vsub.f32 1.0, %v4865_v17  ;;  %v405_v36 = vmul.f32 0.0, %v4865_v17 }
 0x1ab   :  { %v390_v18 = vpop.permute.xlu0 %389 }
 0x1ac   :  { %v392_v19 = vmul.f32 %v4865_v17, %v390_v18 }
 0x1ae   :  { %394 = vrot.lane.b32.xlu0 %v392_v19, %s5277_s8  ;;  %v664_v19 = vadd.f32 %v5449_v11, %v5537_v41 }
 0x220   :  { %v395_v20 = vpop.permute.xlu0 %394 }
 0x221   :  { %v397_v21 = vadd.f32 %v395_v20, %v298_v12 }
 0x223   :  { %4866 = vtanh.f32 %v397_v21 }
 0x230   :  { %v4867_v25 = vpop.eup %4866 }
 0x231   :  { %401 = vrot.lane.b32.xlu1 %v4867_v25, %s5278_s30 }
 0x2a3   :  { %v402_v35 = vpop.permute.xlu1 %401 }
 0x2a4   :  { %v404_v37 = vmul.f32 %v402_v35, %v399_v34 }
 0x2a6   :  { %v406_v38 = vadd.f32 %v405_v36, %v404_v37 }
 0x2a8   :  { %408 = vrot.lane.b32.xlu1 %v406_v38, %s5278_s30 }
 0x31a   :  { %v409_v49 = vpop.permute.xlu1 %408 }
 0x31b   :  { %412 = vst.msk [vmem:[#allocation2] sm:$0x3] %vm411_vm3, %v409_v49  ;;  %4738 = vmatmul.mubr.msk.f32.vlgmr.msra.gmra.mxu1 %vm307_vm4, %v409_v49 }
 0x31c   :  { %4746 = vmatpush3.msra.mxu1 %v5410_v1  ;;  %4749 = vmatprep.mubr.msk.f32.mxu1 %vm5275_vm0, %v6564_v0 }
 0x31d   :  { %4747 = vmatprep.subr.mxu1 %v6564_v0 }
 0x31e   :  { %4748 = vmatpush3.msra.mxu1 %v5417_v3 }
 0x31f   :  { %4757 = vmatprep.subr.mxu1 %v6564_v0 }
 0x322   :  { %v1666_v50 = vld [vmem:[#allocation2] sm:$0x3] }
 0x323   :  { %4612 = vmatmul.mubr.msk.f32.vlgmr.msra.gmra.mxu0 %vm307_vm4, %v1666_v50 }
 0x324   :  { %1934 = vmatprep.mubr.f32.mxu0 %v6564_v0 }
 0x3db   :  { %v556_v55 = vpop.f32.mrf.mxu1 }
 0x3dc   :  { %v557_v56 = vadd.f32 %v5442_v6, %v556_v55 }
 0x3dd   :  { %v4739_v57 = vpop.f32.mrf.mxu1 }
 0x3de   :  { %568 = vrot.lane.b32.xlu0 %v557_v56, %s5276_s23  ;;  %v560_v59 = vadd.f32 %v557_v56, %v485_v58 }
 0x3e0   :  { %v4581_v60 = vmul.f32 -1.442695, %v560_v59 }
 0x3e2   :  { %4868 = vpow2.f32 %v4581_v60 }
 0x3ef   :  { %v4869_v61 = vpop.eup %4868 }
 0x3f0   :  { %v564_v62 = vadd.f32 1.0, %v4869_v61 }
 0x3f2   :  { %4870 = vrcp.f32 %v564_v62 }
 0x3ff   :  { %v4871_v63 = vpop.eup %4870 }
 0x400   :  { %v578_v9 = vsub.f32 1.0, %v4871_v63  ;;  %v584_v12 = vmul.f32 %v4871_v63, %v406_v38 }
 0x450   :  { %v569_v2 = vpop.permute.xlu0 %568 }
 0x451   :  { %v571_v4 = vmul.f32 %v4871_v63, %v569_v2 }
 0x453   :  { %573 = vrot.lane.b32.xlu1 %v571_v4, %s5277_s8 }
 0x4c5   :  { %v574_v5 = vpop.permute.xlu1 %573 }
 0x4c6   :  { %v576_v7 = vadd.f32 %v574_v5, %v485_v58 }
 0x4c8   :  { %4872 = vtanh.f32 %v576_v7  ;;  %v1022_v7 = vadd.f32 %v5449_v11, %v5541_v45 }
 0x4d5   :  { %v4873_v8 = vpop.eup %4872 }
 0x4d6   :  { %580 = vrot.lane.b32.xlu0 %v4873_v8, %s5278_s30 }
 0x548   :  { %v581_v10 = vpop.permute.xlu0 %580 }
 0x549   :  { %v583_v13 = vmul.f32 %v581_v10, %v578_v9 }
 0x54b   :  { %v585_v14 = vadd.f32 %v584_v12, %v583_v13 }
 0x54d   :  { %587 = vrot.lane.b32.xlu1 %v585_v14, %s5278_s30 }
 0x5bf   :  { %v588_v15 = vpop.permute.xlu1 %587 }
 0x5c0   :  { %591 = vst.msk [vmem:[#allocation2 + $0x2] sm:$0x3] %vm411_vm3, %v588_v15  ;;  %4750 = vmatmul.mubr.msk.f32.vlgmr.msra.gmra.mxu1 %vm307_vm4, %v588_v15 }
 0x5c1   :  { %4758 = vmatpush3.msra.mxu1 %v5410_v1  ;;  %4761 = vmatprep.mubr.msk.f32.mxu1 %vm5275_vm0, %v6564_v0 }
 0x5c2   :  { %4759 = vmatprep.subr.mxu1 %v6564_v0 }
 0x5c3   :  { %4760 = vmatpush3.msra.mxu1 %v5417_v3 }
 0x5c4   :  { %4769 = vmatprep.subr.mxu1 %v6564_v0 }
 0x680   :  { %v735_v16 = vpop.f32.mrf.mxu1 }
 0x681   :  { %v736_v17 = vadd.f32 %v5442_v6, %v735_v16 }
 0x682   :  { %v4751_v18 = vpop.f32.mrf.mxu1 }
 0x683   :  { %747 = vrot.lane.b32.xlu0 %v736_v17, %s5276_s23  ;;  %v739_v20 = vadd.f32 %v736_v17, %v664_v19 }
 0x685   :  { %v4586_v21 = vmul.f32 -1.442695, %v739_v20 }
 0x687   :  { %4874 = vpow2.f32 %v4586_v21 }
 0x694   :  { %v4875_v22 = vpop.eup %4874 }
 0x695   :  { %v743_v23 = vadd.f32 1.0, %v4875_v22 }
 0x697   :  { %4876 = vrcp.f32 %v743_v23 }
 0x6a4   :  { %v4877_v24 = vpop.eup %4876 }
 0x6a5   :  { %v757_v34 = vsub.f32 1.0, %v4877_v24  ;;  %v763_v36 = vmul.f32 %v4877_v24, %v585_v14 }
 0x6f5   :  { %v748_v25 = vpop.permute.xlu0 %747 }
 0x6f6   :  { %v750_v26 = vmul.f32 %v4877_v24, %v748_v25 }
 0x6f8   :  { %752 = vrot.lane.b32.xlu1 %v750_v26, %s5277_s8 }
 0x76a   :  { %v753_v27 = vpop.permute.xlu1 %752 }
 0x76b   :  { %v755_v28 = vadd.f32 %v753_v27, %v664_v19  ;;  %v1201_v27 = vadd.f32 %v5449_v11, %v5543_v47 }
 0x76d   :  { %4878 = vtanh.f32 %v755_v28 }
 0x77a   :  { %v4879_v30 = vpop.eup %4878 }
 0x77b   :  { %759 = vrot.lane.b32.xlu0 %v4879_v30, %s5278_s30 }
 0x7ed   :  { %v760_v35 = vpop.permute.xlu0 %759 }
 0x7ee   :  { %v762_v37 = vmul.f32 %v760_v35, %v757_v34 }
 0x7f0   :  { %v764_v38 = vadd.f32 %v763_v36, %v762_v37 }
 0x7f2   :  { %766 = vrot.lane.b32.xlu1 %v764_v38, %s5278_s30 }
 0x864   :  { %v767_v39 = vpop.permute.xlu1 %766 }
 0x865   :  { %770 = vst.msk [vmem:[#allocation2 + $0x4] sm:$0x3] %vm411_vm3, %v767_v39  ;;  %4762 = vmatmul.mubr.msk.f32.vlgmr.msra.gmra.mxu1 %vm307_vm4, %v767_v39 }
 0x866   :  { %4770 = vmatpush3.msra.mxu1 %v5410_v1  ;;  %4773 = vmatprep.mubr.msk.f32.mxu1 %vm5275_vm0, %v6564_v0 }
 0x867   :  { %4771 = vmatprep.subr.mxu1 %v6564_v0 }
 0x868   :  { %4772 = vmatpush3.msra.mxu1 %v5417_v3 }
 0x869   :  { %4781 = vmatprep.subr.mxu1 %v6564_v0 }
 0x925   :  { %v914_v40 = vpop.f32.mrf.mxu1 }
 0x926   :  { %v915_v41 = vadd.f32 %v5442_v6, %v914_v40 }
 0x927   :  { %v4763_v42 = vpop.f32.mrf.mxu1 }
 0x928   :  { %926 = vrot.lane.b32.xlu0 %v915_v41, %s5276_s23  ;;  %v918_v46 = vadd.f32 %v915_v41, %v843_v44 }
 0x92a   :  { %v4591_v48 = vmul.f32 -1.442695, %v918_v46 }
 0x92c   :  { %4880 = vpow2.f32 %v4591_v48 }
 0x939   :  { %v4881_v49 = vpop.eup %4880 }
 0x93a   :  { %v922_v50 = vadd.f32 1.0, %v4881_v49 }
 0x93c   :  { %4882 = vrcp.f32 %v922_v50 }
 0x949   :  { %v4883_v52 = vpop.eup %4882 }
 0x94a   :  { %v936_v59 = vsub.f32 1.0, %v4883_v52  ;;  %v942_v43 = vmul.f32 %v4883_v52, %v764_v38 }
 0x99a   :  { %v927_v54 = vpop.permute.xlu0 %926 }
 0x99b   :  { %v929_v55 = vmul.f32 %v4883_v52, %v927_v54 }
 0x99d   :  { %931 = vrot.lane.b32.xlu1 %v929_v55, %s5277_s8  ;;  %v1380_v55 = vadd.f32 %v5449_v11, %v5555_v51 }
 0xa0f   :  { %v932_v56 = vpop.permute.xlu1 %931 }
 0xa10   :  { %v934_v57 = vadd.f32 %v932_v56, %v843_v44 }
 0xa12   :  { %4884 = vtanh.f32 %v934_v57 }
 0xa1f   :  { %v4885_v58 = vpop.eup %4884 }
 0xa20   :  { %938 = vrot.lane.b32.xlu0 %v4885_v58, %s5278_s30 }
 0xa92   :  { %v939_v60 = vpop.permute.xlu0 %938 }
 0xa93   :  { %v941_v61 = vmul.f32 %v939_v60, %v936_v59 }
 0xa95   :  { %v943_v62 = vadd.f32 %v942_v43, %v941_v61 }
 0xa97   :  { %945 = vrot.lane.b32.xlu1 %v943_v62, %s5278_s30 }
 0xb09   :  { %v946_v63 = vpop.permute.xlu1 %945 }
 0xb0a   :  { %949 = vst.msk [vmem:[#allocation2 + $0x6] sm:$0x3] %vm411_vm3, %v946_v63  ;;  %4774 = vmatmul.mubr.msk.f32.vlgmr.msra.gmra.mxu1 %vm307_vm4, %v946_v63 }
 0xb0b   :  { %4782 = vmatpush3.msra.mxu1 %v5410_v1  ;;  %4785 = vmatprep.mubr.msk.f32.mxu1 %vm5275_vm0, %v6564_v0 }
 0xb0c   :  { %4783 = vmatprep.subr.mxu1 %v6564_v0 }
 0xb0d   :  { %4784 = vmatpush3.msra.mxu1 %v5417_v3 }
 0xb0e   :  { %4793 = vmatprep.subr.mxu1 %v6564_v0 }
 0xbca   :  { %v1093_v2 = vpop.f32.mrf.mxu1 }
 0xbcb   :  { %v1094_v4 = vadd.f32 %v5442_v6, %v1093_v2 }
 0xbcc   :  { %v4775_v5 = vpop.f32.mrf.mxu1 }
 0xbcd   :  { %1105 = vrot.lane.b32.xlu0 %v1094_v4, %s5276_s23  ;;  %v1097_v8 = vadd.f32 %v1094_v4, %v1022_v7 }
 0xbcf   :  { %v4596_v9 = vmul.f32 -1.442695, %v1097_v8  ;;  %v5651_v8 = vld [vmem:[%s6551_s6 + $0x70] sm:$0xff] }
 0xbd1   :  { %4886 = vpow2.f32 %v4596_v9 }
 0xbde   :  { %v4887_v10 = vpop.eup %4886 }
 0xbdf   :  { %v1101_v12 = vadd.f32 1.0, %v4887_v10  ;;  %v5656_v10 = vld [vmem:[%s6551_s6 + $0x68] sm:$0xff] }
 0xbe1   :  { %4888 = vrcp.f32 %v1101_v12  ;;  %v5663_v12 = vld [vmem:[%s6551_s6 + $0x60] sm:$0xff] }
 0xbee   :  { %v4889_v13 = vpop.eup %4888 }
 0xbef   :  { %v1115_v19 = vsub.f32 1.0, %v4889_v13  ;;  %v1121_v45 = vmul.f32 %v4889_v13, %v943_v62  ;;  %v5640_v62 = vld [vmem:[%s6551_s6 + $0x78] sm:$0xff] }
 0xc3f   :  { %v1106_v14 = vpop.permute.xlu0 %1105 }
 0xc40   :  { %v1108_v15 = vmul.f32 %v4889_v13, %v1106_v14  ;;  %v5669_v13 = vld [vmem:[%s6551_s6 + $0x58] sm:$0xff]  ;;  %v5676_v14 = vld [vmem:[%s6551_s6 + $0x50] sm:$0xff] }
 0xc42   :  { %1110 = vrot.lane.b32.xlu1 %v1108_v15, %s5277_s8  ;;  %v5682_v15 = vld [vmem:[%s6551_s6 + $0x48] sm:$0xff] }
 0xcb4   :  { %v1111_v16 = vpop.permute.xlu1 %1110 }
 0xcb5   :  { %v1113_v17 = vadd.f32 %v1111_v16, %v1022_v7  ;;  %v5688_v16 = vld [vmem:[%s6551_s6 + $0x40] sm:$0xff] }
 0xcb7   :  { %4890 = vtanh.f32 %v1113_v17  ;;  %v5694_v17 = vld [vmem:[%s6551_s6 + $0x38] sm:$0xff] }
 0xcc4   :  { %v4891_v18 = vpop.eup %4890 }
 0xcc5   :  { %1117 = vrot.lane.b32.xlu0 %v4891_v18, %s5278_s30  ;;  %v5700_v18 = vld [vmem:[%s6551_s6 + $0x30] sm:$0xff] }
 0xd37   :  { %v1118_v20 = vpop.permute.xlu0 %1117 }
 0xd38   :  { %v1120_v21 = vmul.f32 %v1118_v20, %v1115_v19  ;;  %v5706_v19 = vld [vmem:[%s6551_s6 + $0x28] sm:$0xff]  ;;  %v5712_v20 = vld [vmem:[%s6551_s6 + $0x20] sm:$0xff] }
 0xd3a   :  { %v1122_v22 = vadd.f32 %v1121_v45, %v1120_v21  ;;  %v5718_v45 = vld [vmem:[%s6551_s6 + $0x18] sm:$0xff]  ;;  %v5724_v21 = vld [vmem:[%s6551_s6 + $0x10] sm:$0xff] }
 0xd3c   :  { %1124 = vrot.lane.b32.xlu1 %v1122_v22, %s5278_s30 }
 0xdae   :  { %v1125_v23 = vpop.permute.xlu1 %1124 }
 0xdaf   :  { %1128 = vst.msk [vmem:[#allocation2 + $0x8] sm:$0x3] %vm411_vm3, %v1125_v23  ;;  %4786 = vmatmul.mubr.msk.f32.vlgmr.msra.gmra.mxu1 %vm307_vm4, %v1125_v23  ;;  %v5736_v23 = vld [vmem:[%s6551_s6] sm:$0xff] }
 0xdb0   :  { %4794 = vmatpush3.msra.mxu1 %v5410_v1  ;;  %4797 = vmatprep.mubr.msk.f32.mxu1 %vm5275_vm0, %v6564_v0 }
 0xdb1   :  { %4795 = vmatprep.subr.mxu1 %v6564_v0 }
 0xdb2   :  { %4796 = vmatpush3.msra.mxu1 %v5417_v3 }
 0xdb3   :  { %4805 = vmatprep.subr.mxu1 %v6564_v0 }
 0xe6f   :  { %v1272_v24 = vpop.f32.mrf.mxu1 }
 0xe70   :  { %v1273_v25 = vadd.f32 %v5442_v6, %v1272_v24  ;;  %v2041_v24 = vld [vmem:[#allocation2 + $0x2] sm:$0x3] }
 0xe71   :  { %v4787_v26 = vpop.f32.mrf.mxu1 }
 0xe72   :  { %1284 = vrot.lane.b32.xlu0 %v1273_v25, %s5276_s23  ;;  %v1276_v28 = vadd.f32 %v1273_v25, %v1201_v27 }
 0xe74   :  { %v4601_v30 = vmul.f32 -1.442695, %v1276_v28  ;;  %v1559_v28 = vadd.f32 %v5449_v11, %v5557_v53 }
 0xe76   :  { %4892 = vpow2.f32 %v4601_v30 }
 0xe83   :  { %v4893_v34 = vpop.eup %4892 }
 0xe84   :  { %v1280_v35 = vadd.f32 1.0, %v4893_v34 }
 0xe86   :  { %4894 = vrcp.f32 %v1280_v35 }
 0xe93   :  { %v4895_v36 = vpop.eup %4894 }
 0xe94   :  { %v1294_v42 = vsub.f32 1.0, %v4895_v36  ;;  %v1300_v47 = vmul.f32 %v4895_v36, %v1122_v22  ;;  %v5730_v22 = vld [vmem:[%s6551_s6 + $0x8] sm:$0xff] }
 0xee4   :  { %v1285_v37 = vpop.permute.xlu0 %1284 }
 0xee5   :  { %v1287_v38 = vmul.f32 %v4895_v36, %v1285_v37 }
 0xee7   :  { %1289 = vrot.lane.b32.xlu1 %v1287_v38, %s5277_s8 }
 0xf59   :  { %v1290_v39 = vpop.permute.xlu1 %1289 }
 0xf5a   :  { %v1292_v40 = vadd.f32 %v1290_v39, %v1201_v27 }
 0xf5c   :  { %4896 = vtanh.f32 %v1292_v40  ;;  %v1668_v40 = vlaneseq }
 0xf69   :  { %v4897_v41 = vpop.eup %4896 }
 0xf6a   :  { %1296 = vrot.lane.b32.xlu0 %v4897_v41, %s5278_s30  ;;  %v1669_v41 = vshrl.u32 %v1668_v40, 7 }
 0xfdc   :  { %v1297_v44 = vpop.permute.xlu0 %1296 }
 0xfdd   :  { %v1299_v46 = vmul.f32 %v1297_v44, %v1294_v42  ;;  %v5771_v42 = vsub.s32 0, %v1669_v41  ;;  %v192_v44 = vld [vmem:[#allocation8] sm:$0x3] }
 0xfdf   :  { %v1301_v48 = vadd.f32 %v1300_v47, %v1299_v46  ;;  %v5777_v53 = vrot.slane %v192_v44, %v5771_v42  ;;  %v1747_v46 = vpop.f32.mrf.mxu0 }
 0xfe1   :  { %1303 = vrot.lane.b32.xlu1 %v1301_v48, %s5278_s30 }
0x1053   :  { %v1304_v49 = vpop.permute.xlu1 %1303 }
0x1054   :  { %1307 = vst.msk [vmem:[#allocation2 + $0xa] sm:$0x3] %vm411_vm3, %v1304_v49  ;;  %4798 = vmatmul.mubr.msk.f32.vlgmr.msra.gmra.mxu1 %vm307_vm4, %v1304_v49  ;;  %v1748_v49 = vadd.f32 %v1747_v46, %v5777_v53  ;;  %v5822_v46 = vld [vmem:[#allocation2 + $0x4] sm:$0x3] }
0x1055   :  { %4806 = vmatpush3.msra.mxu1 %v5410_v1  ;;  %4809 = vmatprep.mubr.msk.f32.mxu1 %vm5275_vm0, %v6564_v0  ;;  %6586 = vst [vmem:[#allocation27_spill] sm:$0xff] %v5822_v46 }
0x1056   :  { %4807 = vmatprep.subr.mxu1 %v6564_v0 }
0x1057   :  { %4808 = vmatpush3.msra.mxu1 %v5417_v3 }
0x1058   :  { %1782 = vmatprep.subr.mxu1 %v5640_v62 }
0x1114   :  { %v1451_v50 = vpop.f32.mrf.mxu1 }
0x1115   :  { %v1452_v52 = vadd.f32 %v5442_v6, %v1451_v50 }
0x1116   :  { %v4799_v54 = vpop.f32.mrf.mxu1 }
0x1117   :  { %1463 = vrot.lane.b32.xlu0 %v1452_v52, %s5276_s23  ;;  %v1455_v56 = vadd.f32 %v1452_v52, %v1380_v55 }
0x1119   :  { %v4606_v57 = vmul.f32 -1.442695, %v1455_v56  ;;  %v5781_v56 = vsub.s32 1, %v1669_v41 }
0x111b   :  { %4898 = vpow2.f32 %v4606_v57 }
0x1128   :  { %v4899_v1 = vpop.eup %4898 }
0x1129   :  { %v1459_v58 = vadd.f32 1.0, %v4899_v1 }
0x112b   :  { %4900 = vrcp.f32 %v1459_v58 }
0x1138   :  { %v4901_v59 = vpop.eup %4900 }
0x1139   :  { %v1473_v63 = vsub.f32 1.0, %v4901_v59  ;;  %v1479_v4 = vmul.f32 %v4901_v59, %v1301_v48 }
0x1189   :  { %v1464_v60 = vpop.permute.xlu0 %1463 }
0x118a   :  { %v1466_v43 = vmul.f32 %v4901_v59, %v1464_v60  ;;  %v5788_v60 = vrot.slane %v192_v44, %v5781_v56 }
0x118c   :  { %1468 = vrot.lane.b32.xlu1 %v1466_v43, %s5277_s8  ;;  %v1749_v43 = vpop.f32.mrf.mxu0 }
0x11fe   :  { %v1469_v3 = vpop.permute.xlu1 %1468 }
0x11ff   :  { %v1471_v61 = vadd.f32 %v1469_v3, %v1380_v55 }
0x1201   :  { %4902 = vtanh.f32 %v1471_v61 }
0x120e   :  { %v4903_v51 = vpop.eup %4902 }
0x120f   :  { %1475 = vrot.lane.b32.xlu0 %v4903_v51, %s5278_s30  ;;  %v1750_v51 = vadd.f32 %v1749_v43, %v5788_v60  ;;  %v5872_v43 = vld [vmem:[#allocation12 + $0x8] sm:$0xff] }
0x1210   :  { %6588 = vst [vmem:[#allocation29_spill] sm:$0xff] %v5872_v43 }
0x1281   :  { %v1476_v2 = vpop.permute.xlu0 %1475 }
0x1282   :  { %v1478_v5 = vmul.f32 %v1476_v2, %v1473_v63 }
0x1284   :  { %v5644_v7 = vadd.f32 %v1479_v4, %v1478_v5 }
0x1286   :  { %1482 = vrot.lane.b32.xlu1 %v5644_v7, %s5278_s30 }
0x12f8   :  { %v1483_v9 = vpop.permute.xlu1 %1482 }
0x12f9   :  { %1486 = vst.msk [vmem:[#allocation2 + $0xc] sm:$0x3] %vm411_vm3, %v1483_v9  ;;  %4810 = vmatmul.mubr.msk.f32.vlgmr.msra.gmra.mxu1 %vm307_vm4, %v1483_v9  ;;  %v5793_v9 = vld [vmem:[#allocation11 + $0x18] sm:$0xff] }
0x12fa   :  { %1783 = vmatpush1.msra.mxu1 %v5651_v8  ;;  %1830 = vmatprep.mubr.f32.mxu1 %v6564_v0  ;;  %6585 = vst [vmem:[#allocation26_spill] sm:$0xff] %v5793_v9 }
0x12fb   :  { %1784 = vmatprep.subr.mxu1 %v5656_v10  ;;  %1898 = vmatprep.subr.mxu0 %v5793_v9 }
0x12fc   :  { %1785 = vmatpush1.msra.mxu1 %v5663_v12 }
0x12fd   :  { %1786 = vmatprep.subr.mxu1 %v5669_v13 }
0x12fe   :  { %1787 = vmatpush1.msra.mxu1 %v5676_v14 }
0x12ff   :  { %1788 = vmatprep.subr.mxu1 %v5682_v15 }
0x1300   :  { %1789 = vmatpush1.msra.mxu1 %v5688_v16 }
0x1301   :  { %1790 = vmatprep.subr.mxu1 %v5694_v17 }
0x1302   :  { %1791 = vmatpush1.msra.mxu1 %v5700_v18 }
0x1303   :  { %1792 = vmatprep.subr.mxu1 %v5706_v19 }
0x1304   :  { %1793 = vmatpush1.msra.mxu1 %v5712_v20 }
0x1305   :  { %1794 = vmatprep.subr.mxu1 %v5718_v45 }
0x1306   :  { %1795 = vmatpush1.msra.mxu1 %v5724_v21 }
0x1307   :  { %1796 = vmatprep.subr.mxu1 %v5730_v22 }
0x1308   :  { %1797 = vmatpush1.msra.mxu1 %v5736_v23 }
0x1309   :  { %1831 = vmatmul.mubr.f32.vlgmr.msra.gmra.mxu1 %v6564_v0  ;;  %2073 = vmatprep.subr.mxu1 %v5506_v29 }
0x130a   :  { %2074 = vmatpush1.msra.mxu1 %v5519_v31  ;;  %2109 = vmatprep.mubr.f32.mxu1 %v6564_v0 }
0x130b   :  { %2075 = vmatprep.subr.mxu1 %v5524_v32 }
0x130c   :  { %2076 = vmatpush1.msra.mxu1 %v5530_v33 }
0x130d   :  { %4616 = vmatmul.mubr.msk.f32.vlgmr.msra.gmra.mxu1 %vm307_vm4, %v2041_v24  ;;  %2137 = vmatprep.subr.mxu1 %v5640_v62  ;;  %v5796_v24 = vld [vmem:[#allocation11 + $0x10] sm:$0xff] }
0x130e   :  { %2138 = vmatpush1.msra.mxu1 %v5651_v8  ;;  %2185 = vmatprep.mubr.f32.mxu1 %v6564_v0 }
0x130f   :  { %2139 = vmatprep.subr.mxu1 %v5656_v10  ;;  %1899 = vmatpush1.msra.mxu0 %v5796_v24 }
0x1310   :  { %2140 = vmatpush1.msra.mxu1 %v5663_v12 }
0x1311   :  { %2141 = vmatprep.subr.mxu1 %v5669_v13 }
0x1312   :  { %2142 = vmatpush1.msra.mxu1 %v5676_v14 }
0x1313   :  { %2143 = vmatprep.subr.mxu1 %v5682_v15 }
0x1314   :  { %2144 = vmatpush1.msra.mxu1 %v5688_v16 }
0x1315   :  { %2145 = vmatprep.subr.mxu1 %v5694_v17 }
0x1316   :  { %2146 = vmatpush1.msra.mxu1 %v5700_v18 }
0x1317   :  { %2147 = vmatprep.subr.mxu1 %v5706_v19 }
0x1318   :  { %2148 = vmatpush1.msra.mxu1 %v5712_v20 }
0x1319   :  { %2149 = vmatprep.subr.mxu1 %v5718_v45 }
0x131a   :  { %2150 = vmatpush1.msra.mxu1 %v5724_v21 }
0x131b   :  { %2151 = vmatprep.subr.mxu1 %v5730_v22 }
0x131c   :  { %2152 = vmatpush1.msra.mxu1 %v5736_v23 }
0x131d   :  { %2411 = vmatprep.subr.mxu1 %v5506_v29 }
0x13b9   :  { %v1630_v25 = vpop.f32.mrf.mxu1 }
0x13ba   :  { %v1631_v26 = vadd.f32 %v5442_v6, %v1630_v25  ;;  %v193_v6 = vld [vmem:[#allocation9] sm:$0x3]  ;;  %v5799_v25 = vld [vmem:[#allocation11 + $0x8] sm:$0xff] }
0x13bb   :  { %v4811_v27 = vpop.f32.mrf.mxu1  ;;  %v5774_v47 = vrot.slane %v193_v6, %v5771_v42  ;;  %v5784_v57 = vrot.slane %v193_v6, %v5781_v56  ;;  %1900 = vmatprep.subr.mxu0 %v5799_v25 }
0x13bc   :  { %1642 = vrot.lane.b32.xlu0 %v1631_v26, %s5276_s23  ;;  %v1634_v30 = vadd.f32 %v1631_v26, %v1559_v28  ;;  %s5279_s23 = smov 64   ;;  %v5802_v26 = vld [vmem:[#allocation11] sm:$0xff]  ;;  %v5805_v27 = vld [vmem:[#allocation12 + $0x78] sm:$0xff] }
0x13bd   :  { %6584 = vst [vmem:[#allocation25_spill] sm:$0xff] %v5774_v47  ;;  %1901 = vmatpush1.msra.mxu0 %v5802_v26 }
0x13be   :  { %v4611_v34 = vmul.f32 -1.442695, %v1634_v30  ;;  %1968 = vmatprep.subr.mxu0 %v5805_v27 }
0x13c0   :  { %4904 = vpow2.f32 %v4611_v34 }
0x13c9   :  { %v1832_v11 = vpop.f32.mrf.mxu1 }
0x13ca   :  { %v1833_v48 = vadd.f32 %v1832_v11, %v5774_v47 }
0x13cb   :  { %v1834_v1 = vpop.f32.mrf.mxu1 }
0x13cc   :  { %v1837_v50 = vadd.f32 %v1833_v48, %v1748_v49  ;;  %v1835_v58 = vadd.f32 %v1834_v1, %v5784_v57  ;;  %v5824_v48 = vld [vmem:[#allocation12 + $0x68] sm:$0xff]  ;;  %v5829_v49 = vld [vmem:[#allocation12 + $0x60] sm:$0xff] }
0x13cd   :  { %v4905_v35 = vpop.eup %4904  ;;  %v5860_v1 = vld [vmem:[#allocation12 + $0x20] sm:$0xff] }
0x13ce   :  { %v1638_v36 = vadd.f32 1.0, %v4905_v35  ;;  %v4613_v52 = vmul.f32 -1.442695, %v1837_v50  ;;  %v5844_v50 = vld [vmem:[#allocation12 + $0x40] sm:$0xff] }
0x13d0   :  { %4906 = vrcp.f32 %v1638_v36 }
0x13d1   :  { %4908 = vpow2.f32 %v4613_v52  ;;  %v5848_v52 = vld [vmem:[#allocation12 + $0x38] sm:$0xff] }
0x13dd   :  { %v4907_v37 = vpop.eup %4906 }
0x13de   :  { %v4909_v54 = vpop.eup %4908  ;;  %v1658_v34 = vmul.f32 %v4907_v37, %v5644_v7  ;;  %v5819_v7 = vld [vmem:[#allocation12 + $0x70] sm:$0xff] }
0x13df   :  { %v1841_v55 = vadd.f32 1.0, %v4909_v54  ;;  %v5852_v54 = vld [vmem:[#allocation12 + $0x30] sm:$0xff] }
0x13e1   :  { %4910 = vrcp.f32 %v1841_v55  ;;  %v5856_v55 = vld [vmem:[#allocation12 + $0x28] sm:$0xff] }
0x13ee   :  { %v4911_v59 = vpop.eup %4910 }
0x13ef   :  { %v1844_v3 = vmul.f32 %v4911_v59, %v1835_v58  ;;  %v1853_v40 = vmul.f32 0.0, %v4911_v59  ;;  %v5864_v58 = vld [vmem:[#allocation12 + $0x18] sm:$0xff] }
0x13f1   :  { %v1845_v2 = vadd.f32 %v1844_v3, %v1750_v51  ;;  %v5876_v3 = vld [vmem:[#allocation12] sm:$0xff] }
0x13f2   :  { %6589 = vst [vmem:[#allocation30_spill] sm:$0xff] %v5876_v3 }
0x142e   :  { %v1643_v38 = vpop.permute.xlu0 %1642 }
0x142f   :  { %v1645_v39 = vmul.f32 %v4907_v37, %v1643_v38  ;;  %v1847_v38 = vsub.f32 1.0, %v4911_v59  ;;  %v5868_v59 = vld [vmem:[#allocation12 + $0x10] sm:$0xff] }
0x1430   :  { %6587 = vst [vmem:[#allocation28_spill] sm:$0xff] %v5868_v59 }
0x1431   :  { %1647 = vrot.lane.b32.xlu1 %v1645_v39, %s5277_s8 }
0x14a3   :  { %v1648_v61 = vpop.permute.xlu1 %1647 }
0x14a4   :  { %v1650_v63 = vadd.f32 %v1648_v61, %v1559_v28  ;;  %v1652_v28 = vsub.f32 1.0, %v4907_v37  ;;  %v5892_v61 = vld [vmem:[#allocation2 + $0xc] sm:$0x3] }
0x14a5   :  { %6590 = vst [vmem:[#allocation31_spill] sm:$0xff] %v5892_v61 }
0x14a6   :  { %4912 = vtanh.f32 %v1650_v63 }
0x14a7   :  { %4914 = vtanh.f32 %v1845_v2 }
0x14b3   :  { %v4913_v4 = vpop.eup %4912 }
0x14b4   :  { %1654 = vrot.lane.b32.xlu0 %v4913_v4, %s5278_s30  ;;  %v4915_v5 = vpop.eup %4914 }
0x14b8   :  { %1849 = vrot.lane.b32.xlu0 %v4915_v5, %s5279_s23 }
0x1526   :  { %v1655_v30 = vpop.permute.xlu0 %1654 }
0x1527   :  { %v1657_v35 = vmul.f32 %v1655_v30, %v1652_v28  ;;  %v214_v30 = vld [vmem:[#allocation14] sm:$0x3] }
0x1529   :  { %v1659_v36 = vadd.f32 %v1658_v34, %v1657_v35  ;;  %v215_v35 = vld [vmem:[#allocation15] sm:$0x3] }
0x152a   :  { %v1850_v39 = vpop.permute.xlu0 %1849 }
0x152b   :  { %v1852_v41 = vmul.f32 %v1850_v39, %v1847_v38  ;;  %1661 = vrot.lane.b32.xlu1 %v1659_v36, %s5278_s30  ;;  %v5920_v36 = vrot.slane %v214_v30, %v5771_v42  ;;  %v5923_v38 = vrot.slane %v215_v35, %v5771_v42 }
0x152d   :  { %v5810_v6 = vadd.f32 %v1853_v40, %v1852_v41 }
0x152f   :  { %2117 = vrot.lane.b32.xlu0 %v5810_v6, %s5279_s23 }
0x159d   :  { %v1662_v44 = vpop.permute.xlu1 %1661 }
0x159e   :  { %1665 = vst.msk [vmem:[#allocation2 + $0xe] sm:$0x3] %vm411_vm3, %v1662_v44 }
0x15a1   :  { %v2118_v11 = vpop.permute.xlu0 %2117 }
0x15a2   :  { %4617 = vmatmul.mubr.msk.f32.vlgmr.msra.gmra.mxu1 %vm1763_vm5, %v2118_v11 }
0x15a3   :  { %2412 = vmatpush1.msra.mxu1 %v5519_v31  ;;  %2447 = vmatprep.mubr.f32.mxu1 %v6564_v0  ;;  %v5832_v31 = vld [vmem:[#allocation12 + $0x58] sm:$0xff] }
0x15a4   :  { %2413 = vmatprep.subr.mxu1 %v5524_v32  ;;  %v5836_v32 = vld [vmem:[#allocation12 + $0x50] sm:$0xff] }
0x15a5   :  { %2414 = vmatpush1.msra.mxu1 %v5530_v33  ;;  %v1855_v37 = vld [vmem:[#allocation2 + $0xe] sm:$0x3] }
0x15a6   :  { %4614 = vmatmul.mubr.msk.f32.vlgmr.msra.gmra.mxu0 %vm307_vm4, %v1855_v37  ;;  %4622 = vmatmul.mubr.msk.f32.vlgmr.msra.gmra.mxu1 %vm307_vm4, %v5822_v46  ;;  %v5840_v33 = vld [vmem:[#allocation12 + $0x48] sm:$0xff] }
0x15a7   :  { %1969 = vmatpush1.msra.mxu0 %v5819_v7  ;;  %2016 = vmatprep.mubr.f32.mxu0 %v6564_v0 }
0x15a8   :  { %1970 = vmatprep.subr.mxu0 %v5824_v48  ;;  %2475 = vmatprep.subr.mxu1 %v5640_v62 }
0x15a9   :  { %1971 = vmatpush1.msra.mxu0 %v5829_v49  ;;  %2476 = vmatpush1.msra.mxu1 %v5651_v8 }
0x15aa   :  { %1972 = vmatprep.subr.mxu0 %v5832_v31  ;;  %2477 = vmatprep.subr.mxu1 %v5656_v10 }
0x15ab   :  { %1973 = vmatpush1.msra.mxu0 %v5836_v32  ;;  %2478 = vmatpush1.msra.mxu1 %v5663_v12 }
0x15ac   :  { %1974 = vmatprep.subr.mxu0 %v5840_v33  ;;  %2479 = vmatprep.subr.mxu1 %v5669_v13 }
0x15ad   :  { %1975 = vmatpush1.msra.mxu0 %v5844_v50  ;;  %2480 = vmatpush1.msra.mxu1 %v5676_v14 }
0x15ae   :  { %1976 = vmatprep.subr.mxu0 %v5848_v52  ;;  %2481 = vmatprep.subr.mxu1 %v5682_v15 }
0x15af   :  { %1977 = vmatpush1.msra.mxu0 %v5852_v54  ;;  %2482 = vmatpush1.msra.mxu1 %v5688_v16 }
0x15b0   :  { %1978 = vmatprep.subr.mxu0 %v5856_v55  ;;  %2483 = vmatprep.subr.mxu1 %v5694_v17 }
0x15b1   :  { %1979 = vmatpush1.msra.mxu0 %v5860_v1  ;;  %2484 = vmatpush1.msra.mxu1 %v5700_v18 }
0x15b2   :  { %1980 = vmatprep.subr.mxu0 %v5864_v58  ;;  %2485 = vmatprep.subr.mxu1 %v5706_v19 }
0x15b3   :  { %1981 = vmatpush1.msra.mxu0 %v5868_v59  ;;  %2486 = vmatpush1.msra.mxu1 %v5712_v20 }
0x15b4   :  { %1982 = vmatprep.subr.mxu0 %v5872_v43  ;;  %2487 = vmatprep.subr.mxu1 %v5718_v45 }
0x15b5   :  { %1983 = vmatpush1.msra.mxu0 %v5876_v3  ;;  %2488 = vmatpush1.msra.mxu1 %v5724_v21 }
0x15b6   :  { %2017 = vmatmul.mubr.f32.vlgmr.msra.gmra.mxu0 %v6564_v0  ;;  %2242 = vmatprep.subr.mxu0 %v5793_v9 }
0x15b7   :  { %2243 = vmatpush1.msra.mxu0 %v5796_v24  ;;  %2278 = vmatprep.mubr.f32.mxu0 %v6564_v0 }
0x15b8   :  { %2244 = vmatprep.subr.mxu0 %v5799_v25  ;;  %2489 = vmatprep.subr.mxu1 %v5730_v22 }
0x15b9   :  { %2245 = vmatpush1.msra.mxu0 %v5802_v26  ;;  %2490 = vmatpush1.msra.mxu1 %v5736_v23 }
0x15ba   :  { %4619 = vmatmul.mubr.msk.f32.vlgmr.msra.gmra.mxu0 %vm307_vm4, %v5892_v61  ;;  %2523 = vmatprep.mubr.f32.mxu1 %v6564_v0 }
0x15bb   :  { %2749 = vmatprep.subr.mxu1 %v5506_v29  ;;  %2306 = vmatprep.subr.mxu0 %v5805_v27  ;;  %v2111_v29 = vpop.f32.mrf.mxu1 }
0x15bc   :  { %2307 = vmatpush1.msra.mxu0 %v5819_v7  ;;  %2354 = vmatprep.mubr.f32.mxu0 %v6564_v0  ;;  %v2112_v2 = vadd.f32 %v2111_v29, %v5777_v53 }
0x15bd   :  { %2308 = vmatprep.subr.mxu0 %v5824_v48  ;;  %v2113_v51 = vpop.f32.mrf.mxu1 }
0x15be   :  { %2309 = vmatpush1.msra.mxu0 %v5829_v49 }
0x15bf   :  { %2310 = vmatprep.subr.mxu0 %v5832_v31 }
0x15c0   :  { %2311 = vmatpush1.msra.mxu0 %v5836_v32 }
0x15c1   :  { %2312 = vmatprep.subr.mxu0 %v5840_v33 }
0x15c2   :  { %2313 = vmatpush1.msra.mxu0 %v5844_v50 }
0x15c3   :  { %2314 = vmatprep.subr.mxu0 %v5848_v52 }
0x15c4   :  { %2315 = vmatpush1.msra.mxu0 %v5852_v54 }
0x15c5   :  { %2316 = vmatprep.subr.mxu0 %v5856_v55 }
0x15c6   :  { %2317 = vmatpush1.msra.mxu0 %v5860_v1 }
0x15c7   :  { %2318 = vmatprep.subr.mxu0 %v5864_v58 }
0x15c8   :  { %2319 = vmatpush1.msra.mxu0 %v5868_v59 }
0x15c9   :  { %2320 = vmatprep.subr.mxu0 %v5872_v43 }
0x15ca   :  { %2321 = vmatpush1.msra.mxu0 %v5876_v3 }
0x15cb   :  { %2580 = vmatprep.subr.mxu0 %v5793_v9 }
0x1662   :  { %v2187_v63 = vpop.f32.mrf.mxu1 }
0x1663   :  { %v2188_v4 = vadd.f32 %v2187_v63, %v5774_v47 }
0x1665   :  { %v2192_v5 = vadd.f32 %v2188_v4, %v2112_v2  ;;  %v2189_v2 = vpop.f32.mrf.mxu1 }
0x1666   :  { %v1936_v34 = vpop.f32.mrf.mxu0  ;;  %v2190_v4 = vadd.f32 %v2189_v2, %v5784_v57 }
0x1667   :  { %v4618_v28 = vmul.f32 -1.442695, %v2192_v5  ;;  %v1937_v11 = vadd.f32 %v1936_v34, %v5920_v36  ;;  %v5930_v34 = vrot.slane %v215_v35, %v5781_v56 }
0x1668   :  { %v1938_v39 = vpop.f32.mrf.mxu0 }
0x1669   :  { %4916 = vpow2.f32 %v4618_v28  ;;  %v2114_v28 = vadd.f32 %v2113_v51, %v5788_v60 }
0x1676   :  { %v4917_v40 = vpop.eup %4916  ;;  %v2018_v41 = vpop.f32.mrf.mxu0 }
0x1677   :  { %v2196_v44 = vadd.f32 1.0, %v4917_v40  ;;  %v2019_v37 = vadd.f32 %v2018_v41, %v5923_v38  ;;  %v5933_v41 = vrot.slane %v214_v30, %v5781_v56 }
0x1678   :  { %v2020_v40 = vpop.f32.mrf.mxu0 }
0x1679   :  { %4918 = vrcp.f32 %v2196_v44  ;;  %v2023_v29 = vadd.f32 %v2019_v37, %v1937_v11  ;;  %v2021_v11 = vadd.f32 %v2020_v40, %v5930_v34  ;;  %v1939_v51 = vadd.f32 %v1938_v39, %v5933_v41 }
0x167b   :  { %v4615_v63 = vmul.f32 -1.442695, %v2023_v29 }
0x167d   :  { %4920 = vpow2.f32 %v4615_v63 }
0x1686   :  { %v4919_v5 = vpop.eup %4918 }
0x1687   :  { %v2199_v42 = vmul.f32 %v4919_v5, %v2190_v4  ;;  %v2208_v35 = vmul.f32 %v4919_v5, %v5810_v6  ;;  %v5952_v6 = vld [vmem:[%s6550_s5 + $0x10] sm:$0xff] }
0x1689   :  { %v2200_v0 = vadd.f32 %v2199_v42, %v2114_v28 }
0x168a   :  { %v4921_v46 = vpop.eup %4920 }
0x168b   :  { %4922 = vtanh.f32 %v2200_v0  ;;  %v2027_v61 = vadd.f32 1.0, %v4921_v46  ;;  %v2202_v46 = vsub.f32 1.0, %v4919_v5  ;;  %v6591_v5 = vmov 0.0  }
0x168d   :  { %4924 = vrcp.f32 %v2027_v61 }
0x1698   :  { %v4923_v44 = vpop.eup %4922 }
0x1699   :  { %2204 = vrot.lane.b32.xlu0 %v4923_v44, %s5279_s23  ;;  %v5959_v44 = vld [vmem:[%s6550_s5 + $0x8] sm:$0xff] }
0x169a   :  { %v4925_v37 = vpop.eup %4924 }
0x169b   :  { %v2030_v29 = vmul.f32 %v4925_v37, %v2021_v11  ;;  %v2033_v2 = vsub.f32 1.0, %v4925_v37  ;;  %v2039_v28 = vmul.f32 0.0, %v4925_v37  ;;  %v5965_v11 = vld [vmem:[%s6550_s5] sm:$0xff] }
0x169c   :  { %v5968_v37 = vld [vmem:[#allocation2 + $0x6] sm:$0x3] }
0x169d   :  { %v2031_v63 = vadd.f32 %v2030_v29, %v1939_v51  ;;  %6592 = vst [vmem:[#allocation32_spill] sm:$0xff] %v5968_v37  ;;  %v5993_v29 = vld [vmem:[%s6550_s5 + $0x18] sm:$0xff] }
0x169f   :  { %4926 = vtanh.f32 %v2031_v63  ;;  %v6000_v63 = vld [vmem:[#allocation2 + $0xa] sm:$0x3] }
0x16a0   :  { %6593 = vst [vmem:[#allocation33_spill] sm:$0xff] %v6000_v63 }
0x16ac   :  { %v4927_v0 = vpop.eup %4926 }
0x16ad   :  { %2035 = vrot.lane.b32.xlu1 %v4927_v0, %s5279_s23  ;;  %v2449_v0 = vpop.f32.mrf.mxu1 }
0x170b   :  { %v2205_v61 = vpop.permute.xlu0 %2204 }
0x170c   :  { %v2207_v56 = vmul.f32 %v2205_v61, %v2202_v46  ;;  %v2451_v46 = vpop.f32.mrf.mxu1 }
0x170e   :  { %v5940_v30 = vadd.f32 %v2208_v35, %v2207_v56  ;;  %v2450_v35 = vadd.f32 %v2449_v0, %v5777_v53 }
0x1710   :  { %2455 = vrot.lane.b32.xlu0 %v5940_v30, %s5279_s23 }
0x171f   :  { %v2036_v4 = vpop.permute.xlu1 %2035 }
0x1720   :  { %v2038_v39 = vmul.f32 %v2036_v4, %v2033_v2 }
0x1722   :  { %v5944_v42 = vadd.f32 %v2039_v28, %v2038_v39  ;;  %v2280_v28 = vpop.f32.mrf.mxu0 }
0x1724   :  { %2286 = vrot.lane.b32.xlu1 %v5944_v42, %s5279_s23  ;;  %v2282_v39 = vpop.f32.mrf.mxu0 }
0x1782   :  { %v2456_v40 = vpop.permute.xlu0 %2455 }
0x1783   :  { %4623 = vmatmul.mubr.msk.f32.vlgmr.msra.gmra.mxu1 %vm1763_vm5, %v2456_v40 }
0x1784   :  { %2750 = vmatpush1.msra.mxu1 %v5952_v6  ;;  %2785 = vmatprep.mubr.f32.mxu1 %v6591_v5 }
0x1785   :  { %2751 = vmatprep.subr.mxu1 %v5959_v44 }
0x1786   :  { %2752 = vmatpush1.msra.mxu1 %v5965_v11 }
0x1787   :  { %4628 = vmatmul.mubr.msk.f32.vlgmr.msra.gmra.mxu1 %vm307_vm4, %v5968_v37  ;;  %2813 = vmatprep.subr.mxu1 %v5640_v62  ;;  %v2281_v37 = vadd.f32 %v2280_v28, %v5920_v36 }
0x1788   :  { %2814 = vmatpush1.msra.mxu1 %v5651_v8  ;;  %2861 = vmatprep.mubr.f32.mxu1 %v6591_v5 }
0x1789   :  { %2815 = vmatprep.subr.mxu1 %v5656_v10 }
0x178a   :  { %2816 = vmatpush1.msra.mxu1 %v5663_v12 }
0x178b   :  { %2817 = vmatprep.subr.mxu1 %v5669_v13 }
0x178c   :  { %2818 = vmatpush1.msra.mxu1 %v5676_v14 }
0x178d   :  { %2819 = vmatprep.subr.mxu1 %v5682_v15 }
0x178e   :  { %2820 = vmatpush1.msra.mxu1 %v5688_v16 }
0x178f   :  { %2821 = vmatprep.subr.mxu1 %v5694_v17 }
0x1790   :  { %2822 = vmatpush1.msra.mxu1 %v5700_v18 }
0x1791   :  { %2823 = vmatprep.subr.mxu1 %v5706_v19 }
0x1792   :  { %2824 = vmatpush1.msra.mxu1 %v5712_v20 }
0x1793   :  { %2825 = vmatprep.subr.mxu1 %v5718_v45 }
0x1794   :  { %2826 = vmatpush1.msra.mxu1 %v5724_v21 }
0x1795   :  { %2827 = vmatprep.subr.mxu1 %v5730_v22 }
0x1796   :  { %v2287_v51 = vpop.permute.xlu1 %2286  ;;  %2828 = vmatpush1.msra.mxu1 %v5736_v23 }
0x1797   :  { %4620 = vmatmul.mubr.msk.f32.vlgmr.msra.gmra.mxu0 %vm1763_vm5, %v2287_v51  ;;  %3083 = vmatprep.subr.mxu1 %v5993_v29 }
0x1798   :  { %2581 = vmatpush1.msra.mxu0 %v5796_v24  ;;  %2616 = vmatprep.mubr.f32.mxu0 %v6591_v5 }
0x1799   :  { %2582 = vmatprep.subr.mxu0 %v5799_v25 }
0x179a   :  { %2583 = vmatpush1.msra.mxu0 %v5802_v26 }
0x179b   :  { %4625 = vmatmul.mubr.msk.f32.vlgmr.msra.gmra.mxu0 %vm307_vm4, %v6000_v63  ;;  %2644 = vmatprep.subr.mxu0 %v5805_v27 }
0x179c   :  { %2645 = vmatpush1.msra.mxu0 %v5819_v7  ;;  %2692 = vmatprep.mubr.f32.mxu0 %v6591_v5 }
0x179d   :  { %2646 = vmatprep.subr.mxu0 %v5824_v48 }
0x179e   :  { %2647 = vmatpush1.msra.mxu0 %v5829_v49 }
0x179f   :  { %2648 = vmatprep.subr.mxu0 %v5832_v31 }
0x17a0   :  { %2649 = vmatpush1.msra.mxu0 %v5836_v32 }
0x17a1   :  { %2650 = vmatprep.subr.mxu0 %v5840_v33 }
0x17a2   :  { %2651 = vmatpush1.msra.mxu0 %v5844_v50 }
0x17a3   :  { %2652 = vmatprep.subr.mxu0 %v5848_v52 }
0x17a4   :  { %2653 = vmatpush1.msra.mxu0 %v5852_v54 }
0x17a5   :  { %2654 = vmatprep.subr.mxu0 %v5856_v55 }
0x17a6   :  { %2655 = vmatpush1.msra.mxu0 %v5860_v1 }
0x17a7   :  { %2656 = vmatprep.subr.mxu0 %v5864_v58 }
0x17a8   :  { %2657 = vmatpush1.msra.mxu0 %v5868_v59 }
0x17a9   :  { %2658 = vmatprep.subr.mxu0 %v5872_v43 }
0x17aa   :  { %2659 = vmatpush1.msra.mxu0 %v5876_v3 }
0x17ab   :  { %2918 = vmatprep.subr.mxu0 %v5793_v9 }
0x1843   :  { %v2525_v61 = vpop.f32.mrf.mxu1 }
0x1844   :  { %v2526_v56 = vadd.f32 %v2525_v61, %v5774_v47 }
0x1845   :  { %v2527_v59 = vpop.f32.mrf.mxu1 }
0x1846   :  { %v2530_v2 = vadd.f32 %v2526_v56, %v2450_v35  ;;  %v2528_v0 = vadd.f32 %v2527_v59, %v5784_v57  ;;  %v2452_v35 = vadd.f32 %v2451_v46, %v5788_v60 }
0x1848   :  { %v4624_v4 = vmul.f32 -1.442695, %v2530_v2 }
0x184a   :  { %4928 = vpow2.f32 %v4624_v4 }
0x1857   :  { %v4929_v40 = vpop.eup %4928  ;;  %v2356_v51 = vpop.f32.mrf.mxu0 }
0x1858   :  { %v2534_v63 = vadd.f32 1.0, %v4929_v40  ;;  %v2357_v3 = vadd.f32 %v2356_v51, %v5923_v38 }
0x1859   :  { %v2358_v28 = vpop.f32.mrf.mxu0 }
0x185a   :  { %4930 = vrcp.f32 %v2534_v63  ;;  %v2361_v9 = vadd.f32 %v2357_v3, %v2281_v37  ;;  %v2359_v51 = vadd.f32 %v2358_v28, %v5930_v34 }
0x185c   :  { %v4621_v43 = vmul.f32 -1.442695, %v2361_v9 }
0x185e   :  { %4932 = vpow2.f32 %v4621_v43  ;;  %v2283_v43 = vadd.f32 %v2282_v39, %v5933_v41 }
0x1867   :  { %v4931_v61 = vpop.eup %4930 }
0x1868   :  { %v2537_v56 = vmul.f32 %v4931_v61, %v2528_v0  ;;  %v2540_v63 = vsub.f32 1.0, %v4931_v61  ;;  %v2546_v0 = vmul.f32 %v4931_v61, %v5940_v30  ;;  %v2886_v30 = vld [vmem:[#allocation2 + $0x8] sm:$0x3] }
0x1869   :  { %v6594_v61 = vld [vmem:[#allocation28_spill] sm:$0xff] }
0x186a   :  { %v2538_v2 = vadd.f32 %v2537_v56, %v2452_v35 }
0x186b   :  { %v4933_v4 = vpop.eup %4932 }
0x186c   :  { %4934 = vtanh.f32 %v2538_v2  ;;  %v2365_v47 = vadd.f32 1.0, %v4933_v4 }
0x186e   :  { %4936 = vrcp.f32 %v2365_v47 }
0x1879   :  { %v4935_v40 = vpop.eup %4934 }
0x187a   :  { %2542 = vrot.lane.b32.xlu0 %v4935_v40, %s5279_s23 }
0x187b   :  { %v4937_v9 = vpop.eup %4936 }
0x187c   :  { %v2368_v3 = vmul.f32 %v4937_v9, %v2359_v51  ;;  %v2371_v56 = vsub.f32 1.0, %v4937_v9  ;;  %v2377_v39 = vmul.f32 %v4937_v9, %v5944_v42  ;;  %v6595_v51 = vld [vmem:[#allocation29_spill] sm:$0xff]  ;;  %v6596_v9 = vld [vmem:[#allocation30_spill] sm:$0xff] }
0x187e   :  { %v2369_v59 = vadd.f32 %v2368_v3, %v2283_v43  ;;  %v6597_v43 = vld [vmem:[#allocation26_spill] sm:$0xff]  ;;  %v2787_v3 = vpop.f32.mrf.mxu1 }
0x1880   :  { %4938 = vtanh.f32 %v2369_v59  ;;  %v2789_v59 = vpop.f32.mrf.mxu1 }
0x188d   :  { %v4939_v37 = vpop.eup %4938 }
0x188e   :  { %2373 = vrot.lane.b32.xlu1 %v4939_v37, %s5279_s23 }
0x18ec   :  { %v2543_v46 = vpop.permute.xlu0 %2542 }
0x18ed   :  { %v2545_v47 = vmul.f32 %v2543_v46, %v2540_v63  ;;  %v2788_v63 = vadd.f32 %v2787_v3, %v5777_v53  ;;  %v6598_v46 = vld [vmem:[#allocation25_spill] sm:$0xff] }
0x18ef   :  { %v6033_v35 = vadd.f32 %v2546_v0, %v2545_v47 }
0x18f1   :  { %2793 = vrot.lane.b32.xlu0 %v6033_v35, %s5279_s23 }
0x1900   :  { %v2374_v2 = vpop.permute.xlu1 %2373 }
0x1901   :  { %v2376_v4 = vmul.f32 %v2374_v2, %v2371_v56  ;;  %v2618_v2 = vpop.f32.mrf.mxu0 }
0x1903   :  { %v6038_v28 = vadd.f32 %v2377_v39, %v2376_v4  ;;  %v2620_v39 = vpop.f32.mrf.mxu0 }
0x1905   :  { %2624 = vrot.lane.b32.xlu1 %v6038_v28, %s5279_s23 }
0x1963   :  { %v2794_v40 = vpop.permute.xlu0 %2793 }
0x1964   :  { %4629 = vmatmul.mubr.msk.f32.vlgmr.msra.gmra.mxu1 %vm1763_vm5, %v2794_v40 }
0x1965   :  { %3084 = vmatpush1.msra.mxu1 %v5952_v6  ;;  %3119 = vmatprep.mubr.f32.mxu1 %v6591_v5 }
0x1966   :  { %3085 = vmatprep.subr.mxu1 %v5959_v44 }
0x1967   :  { %3086 = vmatpush1.msra.mxu1 %v5965_v11 }
0x1968   :  { %4634 = vmatmul.mubr.msk.f32.vlgmr.msra.gmra.mxu1 %vm307_vm4, %v2886_v30  ;;  %3147 = vmatprep.subr.mxu1 %v5640_v62 }
0x1969   :  { %3148 = vmatpush1.msra.mxu1 %v5651_v8  ;;  %3195 = vmatprep.mubr.f32.mxu1 %v6591_v5 }
0x196a   :  { %3149 = vmatprep.subr.mxu1 %v5656_v10 }
0x196b   :  { %3150 = vmatpush1.msra.mxu1 %v5663_v12 }
0x196c   :  { %3151 = vmatprep.subr.mxu1 %v5669_v13 }
0x196d   :  { %3152 = vmatpush1.msra.mxu1 %v5676_v14 }
0x196e   :  { %3153 = vmatprep.subr.mxu1 %v5682_v15 }
0x196f   :  { %3154 = vmatpush1.msra.mxu1 %v5688_v16 }
0x1970   :  { %3155 = vmatprep.subr.mxu1 %v5694_v17 }
0x1971   :  { %3156 = vmatpush1.msra.mxu1 %v5700_v18 }
0x1972   :  { %3157 = vmatprep.subr.mxu1 %v5706_v19 }
0x1973   :  { %3158 = vmatpush1.msra.mxu1 %v5712_v20 }
0x1974   :  { %3159 = vmatprep.subr.mxu1 %v5718_v45 }
0x1975   :  { %3160 = vmatpush1.msra.mxu1 %v5724_v21 }
0x1976   :  { %3161 = vmatprep.subr.mxu1 %v5730_v22 }
0x1977   :  { %v2625_v42 = vpop.permute.xlu1 %2624  ;;  %3162 = vmatpush1.msra.mxu1 %v5736_v23 }
0x1978   :  { %4626 = vmatmul.mubr.msk.f32.vlgmr.msra.gmra.mxu0 %vm1763_vm5, %v2625_v42  ;;  %3413 = vmatprep.subr.mxu1 %v5993_v29 }
0x1979   :  { %2919 = vmatpush1.msra.mxu0 %v5796_v24  ;;  %2954 = vmatprep.mubr.f32.mxu0 %v6591_v5 }
0x197a   :  { %2920 = vmatprep.subr.mxu0 %v5799_v25 }
0x197b   :  { %2921 = vmatpush1.msra.mxu0 %v5802_v26 }
0x197c   :  { %4631 = vmatmul.mubr.msk.f32.vlgmr.msra.gmra.mxu0 %vm307_vm4, %v2886_v30  ;;  %2982 = vmatprep.subr.mxu0 %v5805_v27  ;;  %v2619_v30 = vadd.f32 %v2618_v2, %v5920_v36 }
0x197d   :  { %2983 = vmatpush1.msra.mxu0 %v5819_v7  ;;  %3030 = vmatprep.mubr.f32.mxu0 %v6591_v5 }
0x197e   :  { %2984 = vmatprep.subr.mxu0 %v5824_v48 }
0x197f   :  { %2985 = vmatpush1.msra.mxu0 %v5829_v49 }
0x1980   :  { %2986 = vmatprep.subr.mxu0 %v5832_v31 }
0x1981   :  { %2987 = vmatpush1.msra.mxu0 %v5836_v32 }
0x1982   :  { %2988 = vmatprep.subr.mxu0 %v5840_v33 }
0x1983   :  { %2989 = vmatpush1.msra.mxu0 %v5844_v50 }
0x1984   :  { %2990 = vmatprep.subr.mxu0 %v5848_v52 }
0x1985   :  { %2991 = vmatpush1.msra.mxu0 %v5852_v54 }
0x1986   :  { %2992 = vmatprep.subr.mxu0 %v5856_v55 }
0x1987   :  { %2993 = vmatpush1.msra.mxu0 %v5860_v1 }
0x1988   :  { %2994 = vmatprep.subr.mxu0 %v5864_v58 }
0x1989   :  { %2995 = vmatpush1.msra.mxu0 %v6594_v61 }
0x198a   :  { %2996 = vmatprep.subr.mxu0 %v6595_v51 }
0x198b   :  { %2997 = vmatpush1.msra.mxu0 %v6596_v9 }
0x198c   :  { %3248 = vmatprep.subr.mxu0 %v6597_v43 }
0x1a24   :  { %v2863_v37 = vpop.f32.mrf.mxu1 }
0x1a25   :  { %v2864_v0 = vadd.f32 %v2863_v37, %v6598_v46 }
0x1a26   :  { %v2865_v61 = vpop.f32.mrf.mxu1 }
0x1a27   :  { %v2868_v47 = vadd.f32 %v2864_v0, %v2788_v63  ;;  %v2866_v3 = vadd.f32 %v2865_v61, %v5784_v57  ;;  %v2790_v63 = vadd.f32 %v2789_v59, %v5788_v60 }
0x1a29   :  { %v4630_v56 = vmul.f32 -1.442695, %v2868_v47 }
0x1a2b   :  { %4940 = vpow2.f32 %v4630_v56 }
0x1a38   :  { %v4941_v4 = vpop.eup %4940  ;;  %v2694_v40 = vpop.f32.mrf.mxu0 }
0x1a39   :  { %v2872_v42 = vadd.f32 1.0, %v4941_v4  ;;  %v2695_v9 = vadd.f32 %v2694_v40, %v5923_v38 }
0x1a3a   :  { %v2696_v2 = vpop.f32.mrf.mxu0 }
0x1a3b   :  { %4942 = vrcp.f32 %v2872_v42  ;;  %v2699_v43 = vadd.f32 %v2695_v9, %v2619_v30  ;;  %v2697_v40 = vadd.f32 %v2696_v2, %v5930_v34 }
0x1a3d   :  { %v4627_v51 = vmul.f32 -1.442695, %v2699_v43 }
0x1a3f   :  { %4944 = vpow2.f32 %v4627_v51  ;;  %v2621_v51 = vadd.f32 %v2620_v39, %v5933_v41 }
0x1a48   :  { %v4943_v37 = vpop.eup %4942 }
0x1a49   :  { %v2875_v0 = vmul.f32 %v4943_v37, %v2866_v3  ;;  %v2878_v59 = vsub.f32 1.0, %v4943_v37  ;;  %v2884_v3 = vmul.f32 %v4943_v37, %v6033_v35  ;;  %v6599_v35 = vld [vmem:[#allocation33_spill] sm:$0xff] }
0x1a4b   :  { %v2876_v47 = vadd.f32 %v2875_v0, %v2790_v63 }
0x1a4c   :  { %v4945_v56 = vpop.eup %4944 }
0x1a4d   :  { %4946 = vtanh.f32 %v2876_v47  ;;  %v2703_v46 = vadd.f32 1.0, %v4945_v56 }
0x1a4f   :  { %4948 = vrcp.f32 %v2703_v46 }
0x1a5a   :  { %v4947_v4 = vpop.eup %4946 }
0x1a5b   :  { %2880 = vrot.lane.b32.xlu0 %v4947_v4, %s5279_s23 }
0x1a5c   :  { %v4949_v9 = vpop.eup %4948 }
0x1a5d   :  { %v2706_v43 = vmul.f32 %v4949_v9, %v2697_v40  ;;  %v2709_v0 = vsub.f32 1.0, %v4949_v9  ;;  %v2715_v39 = vmul.f32 %v4949_v9, %v6038_v28 }
0x1a5f   :  { %v2707_v61 = vadd.f32 %v2706_v43, %v2621_v51 }
0x1a61   :  { %4950 = vtanh.f32 %v2707_v61 }
0x1a6e   :  { %v4951_v30 = vpop.eup %4950 }
0x1a6f   :  { %2711 = vrot.lane.b32.xlu1 %v4951_v30, %s5279_s23 }
0x1acd   :  { %v2881_v42 = vpop.permute.xlu0 %2880 }
0x1ace   :  { %v2883_v46 = vmul.f32 %v2881_v42, %v2878_v59 }
0x1ad0   :  { %v6101_v63 = vadd.f32 %v2884_v3, %v2883_v46 }
0x1ad2   :  { %3127 = vrot.lane.b32.xlu0 %v6101_v63, %s5279_s23 }
0x1ae1   :  { %v2712_v47 = vpop.permute.xlu1 %2711 }
0x1ae2   :  { %v2714_v56 = vmul.f32 %v2712_v47, %v2709_v0 }
0x1ae4   :  { %v6106_v2 = vadd.f32 %v2715_v39, %v2714_v56 }
0x1ae6   :  { %2962 = vrot.lane.b32.xlu1 %v6106_v2, %s5279_s23 }
0x1b44   :  { %v3128_v4 = vpop.permute.xlu0 %3127 }
0x1b45   :  { %4635 = vmatmul.mubr.msk.f32.vlgmr.msra.gmra.mxu1 %vm1763_vm5, %v3128_v4 }
0x1b46   :  { %3414 = vmatpush1.msra.mxu1 %v5952_v6  ;;  %3449 = vmatprep.mubr.f32.mxu1 %v6591_v5 }
0x1b47   :  { %3415 = vmatprep.subr.mxu1 %v5959_v44 }
0x1b48   :  { %3416 = vmatpush1.msra.mxu1 %v5965_v11 }
0x1b49   :  { %4640 = vmatmul.mubr.msk.f32.vlgmr.msra.gmra.mxu1 %vm307_vm4, %v6599_v35  ;;  %3477 = vmatprep.subr.mxu1 %v5640_v62 }
0x1b4a   :  { %3478 = vmatpush1.msra.mxu1 %v5651_v8  ;;  %3525 = vmatprep.mubr.f32.mxu1 %v6591_v5  ;;  %v6600_v8 = vld [vmem:[#allocation32_spill] sm:$0xff] }
0x1b4b   :  { %3479 = vmatprep.subr.mxu1 %v5656_v10  ;;  %v6601_v10 = vld [vmem:[#allocation28_spill] sm:$0xff] }
0x1b4c   :  { %3480 = vmatpush1.msra.mxu1 %v5663_v12  ;;  %v6602_v12 = vld [vmem:[#allocation29_spill] sm:$0xff] }
0x1b4d   :  { %3481 = vmatprep.subr.mxu1 %v5669_v13  ;;  %v6603_v13 = vld [vmem:[#allocation30_spill] sm:$0xff] }
0x1b4e   :  { %3482 = vmatpush1.msra.mxu1 %v5676_v14  ;;  %v6604_v14 = vld [vmem:[#allocation26_spill] sm:$0xff] }
0x1b4f   :  { %3483 = vmatprep.subr.mxu1 %v5682_v15  ;;  %v3121_v15 = vpop.f32.mrf.mxu1 }
0x1b50   :  { %3484 = vmatpush1.msra.mxu1 %v5688_v16 }
0x1b51   :  { %3485 = vmatprep.subr.mxu1 %v5694_v17  ;;  %v3123_v16 = vpop.f32.mrf.mxu1 }
0x1b52   :  { %3486 = vmatpush1.msra.mxu1 %v5700_v18  ;;  %v3122_v18 = vadd.f32 %v3121_v15, %v5777_v53  ;;  %v3124_v3 = vadd.f32 %v3123_v16, %v5788_v60 }
0x1b53   :  { %3487 = vmatprep.subr.mxu1 %v5706_v19  ;;  %v6605_v19 = vld [vmem:[#allocation25_spill] sm:$0xff] }
0x1b54   :  { %3488 = vmatpush1.msra.mxu1 %v5712_v20 }
0x1b55   :  { %3489 = vmatprep.subr.mxu1 %v5718_v45 }
0x1b56   :  { %3490 = vmatpush1.msra.mxu1 %v5724_v21 }
0x1b57   :  { %3491 = vmatprep.subr.mxu1 %v5730_v22  ;;  %v2956_v22 = vpop.f32.mrf.mxu0 }
0x1b58   :  { %v2963_v62 = vpop.permute.xlu1 %2962  ;;  %3492 = vmatpush1.msra.mxu1 %v5736_v23  ;;  %v2957_v40 = vadd.f32 %v2956_v22, %v5920_v36 }
0x1b59   :  { %4632 = vmatmul.mubr.msk.f32.vlgmr.msra.gmra.mxu0 %vm1763_vm5, %v2963_v62  ;;  %3743 = vmatprep.subr.mxu1 %v5993_v29  ;;  %v2958_v23 = vpop.f32.mrf.mxu0 }
0x1b5a   :  { %3249 = vmatpush1.msra.mxu0 %v5796_v24  ;;  %3284 = vmatprep.mubr.f32.mxu0 %v6591_v5 }
0x1b5b   :  { %3250 = vmatprep.subr.mxu0 %v5799_v25 }
0x1b5c   :  { %3251 = vmatpush1.msra.mxu0 %v5802_v26 }
0x1b5d   :  { %4637 = vmatmul.mubr.msk.f32.vlgmr.msra.gmra.mxu0 %vm307_vm4, %v6600_v8  ;;  %3312 = vmatprep.subr.mxu0 %v5805_v27  ;;  %v2959_v8 = vadd.f32 %v2958_v23, %v5933_v41 }
0x1b5e   :  { %3313 = vmatpush1.msra.mxu0 %v5819_v7  ;;  %3360 = vmatprep.mubr.f32.mxu0 %v6591_v5 }
0x1b5f   :  { %3314 = vmatprep.subr.mxu0 %v5824_v48 }
0x1b60   :  { %3315 = vmatpush1.msra.mxu0 %v5829_v49 }
0x1b61   :  { %3316 = vmatprep.subr.mxu0 %v5832_v31 }
0x1b62   :  { %3317 = vmatpush1.msra.mxu0 %v5836_v32 }
0x1b63   :  { %3318 = vmatprep.subr.mxu0 %v5840_v33 }
0x1b64   :  { %3319 = vmatpush1.msra.mxu0 %v5844_v50 }
0x1b65   :  { %3320 = vmatprep.subr.mxu0 %v5848_v52 }
0x1b66   :  { %3321 = vmatpush1.msra.mxu0 %v5852_v54 }
0x1b67   :  { %3322 = vmatprep.subr.mxu0 %v5856_v55 }
0x1b68   :  { %3323 = vmatpush1.msra.mxu0 %v5860_v1 }
0x1b69   :  { %3324 = vmatprep.subr.mxu0 %v5864_v58 }
0x1b6a   :  { %3325 = vmatpush1.msra.mxu0 %v6601_v10 }
0x1b6b   :  { %3326 = vmatprep.subr.mxu0 %v6602_v12 }
0x1b6c   :  { %3327 = vmatpush1.msra.mxu0 %v6603_v13 }
0x1b6d   :  { %3578 = vmatprep.subr.mxu0 %v6604_v14 }
0x1c05   :  { %v3197_v17 = vpop.f32.mrf.mxu1 }
0x1c06   :  { %v3198_v20 = vadd.f32 %v3197_v17, %v6605_v19 }
0x1c07   :  { %v3199_v30 = vpop.f32.mrf.mxu1 }
0x1c08   :  { %v3202_v45 = vadd.f32 %v3198_v20, %v3122_v18  ;;  %v3200_v59 = vadd.f32 %v3199_v30, %v5784_v57  ;;  %v6215_v30 = vld [vmem:[%s6551_s6 + $0x58] sm:$0xff] }
0x1c0a   :  { %v4636_v21 = vmul.f32 -1.442695, %v3202_v45 }
0x1c0c   :  { %4952 = vpow2.f32 %v4636_v21 }
0x1c19   :  { %v4953_v28 = vpop.eup %4952  ;;  %v3032_v37 = vpop.f32.mrf.mxu0 }
0x1c1a   :  { %v3206_v9 = vadd.f32 1.0, %v4953_v28  ;;  %v3033_v51 = vadd.f32 %v3032_v37, %v5923_v38 }
0x1c1b   :  { %v3034_v56 = vpop.f32.mrf.mxu0 }
0x1c1c   :  { %4954 = vrcp.f32 %v3206_v9  ;;  %v3037_v43 = vadd.f32 %v3033_v51, %v2957_v40  ;;  %v3035_v35 = vadd.f32 %v3034_v56, %v5930_v34  ;;  %v6196_v51 = vld [vmem:[%s6551_s6 + $0x70] sm:$0xff]  ;;  %v6263_v56 = vld [vmem:[%s6551_s6 + $0x18] sm:$0xff] }
0x1c1e   :  { %v4633_v61 = vmul.f32 -1.442695, %v3037_v43  ;;  %v6203_v43 = vld [vmem:[%s6551_s6 + $0x68] sm:$0xff] }
0x1c20   :  { %4956 = vpow2.f32 %v4633_v61  ;;  %v6209_v61 = vld [vmem:[%s6551_s6 + $0x60] sm:$0xff] }
0x1c29   :  { %v4955_v42 = vpop.eup %4954 }
0x1c2a   :  { %v3209_v46 = vmul.f32 %v4955_v42, %v3200_v59  ;;  %v3212_v16 = vsub.f32 1.0, %v4955_v42  ;;  %v3218_v20 = vmul.f32 %v4955_v42, %v6101_v63  ;;  %v6606_v63 = vld [vmem:[#allocation31_spill] sm:$0xff]  ;;  %v6221_v59 = vld [vmem:[%s6551_s6 + $0x50] sm:$0xff]  ;;  %v6227_v42 = vld [vmem:[%s6551_s6 + $0x48] sm:$0xff] }
0x1c2c   :  { %v3210_v0 = vadd.f32 %v3209_v46, %v3124_v3  ;;  %v6233_v3 = vld [vmem:[%s6551_s6 + $0x40] sm:$0xff]  ;;  %v6239_v46 = vld [vmem:[%s6551_s6 + $0x38] sm:$0xff] }
0x1c2d   :  { %v4957_v47 = vpop.eup %4956 }
0x1c2e   :  { %4958 = vtanh.f32 %v3210_v0  ;;  %v3041_v39 = vadd.f32 1.0, %v4957_v47  ;;  %v6245_v0 = vld [vmem:[%s6551_s6 + $0x30] sm:$0xff]  ;;  %v6251_v47 = vld [vmem:[%s6551_s6 + $0x28] sm:$0xff] }
0x1c30   :  { %4960 = vrcp.f32 %v3041_v39  ;;  %v6257_v39 = vld [vmem:[%s6551_s6 + $0x20] sm:$0xff] }
0x1c3b   :  { %v4959_v4 = vpop.eup %4958 }
0x1c3c   :  { %3214 = vrot.lane.b32.xlu0 %v4959_v4, %s5279_s23  ;;  %v6269_v4 = vld [vmem:[%s6551_s6 + $0x10] sm:$0xff] }
0x1c3d   :  { %v4961_v62 = vpop.eup %4960 }
0x1c3e   :  { %v3044_v14 = vmul.f32 %v4961_v62, %v3035_v35  ;;  %v3047_v22 = vsub.f32 1.0, %v4961_v62  ;;  %v3053_v23 = vmul.f32 %v4961_v62, %v6106_v2  ;;  %v6190_v2 = vld [vmem:[%s6551_s6 + $0x78] sm:$0xff]  ;;  %v6275_v35 = vld [vmem:[%s6551_s6 + $0x8] sm:$0xff] }
0x1c40   :  { %v3045_v15 = vadd.f32 %v3044_v14, %v2959_v8  ;;  %v6281_v8 = vld [vmem:[%s6551_s6] sm:$0xff] }
0x1c41   :  { %v6607_v14 = vld [vmem:[#allocation27_spill] sm:$0xff] }
0x1c42   :  { %4962 = vtanh.f32 %v3045_v15 }
0x1c4f   :  { %v4963_v17 = vpop.eup %4962 }
0x1c50   :  { %3049 = vrot.lane.b32.xlu1 %v4963_v17, %s5279_s23 }
0x1cae   :  { %v3215_v18 = vpop.permute.xlu0 %3214 }
0x1caf   :  { %v3217_v45 = vmul.f32 %v3215_v18, %v3212_v16 }
0x1cb1   :  { %v6171_v21 = vadd.f32 %v3218_v20, %v3217_v45 }
0x1cb3   :  { %3457 = vrot.lane.b32.xlu0 %v6171_v21, %s5279_s23 }
0x1cc2   :  { %v3050_v28 = vpop.permute.xlu1 %3049 }
0x1cc3   :  { %v3052_v37 = vmul.f32 %v3050_v28, %v3047_v22 }
0x1cc5   :  { %v6176_v40 = vadd.f32 %v3053_v23, %v3052_v37 }
0x1cc7   :  { %3292 = vrot.lane.b32.xlu1 %v6176_v40, %s5279_s23 }
0x1d25   :  { %v3458_v9 = vpop.permute.xlu0 %3457 }
0x1d26   :  { %4641 = vmatmul.mubr.msk.f32.vlgmr.msra.gmra.mxu1 %vm1763_vm5, %v3458_v9 }
0x1d27   :  { %3744 = vmatpush1.msra.mxu1 %v5952_v6  ;;  %3779 = vmatprep.mubr.f32.mxu1 %v6591_v5 }
0x1d28   :  { %3745 = vmatprep.subr.mxu1 %v5959_v44 }
0x1d29   :  { %3746 = vmatpush1.msra.mxu1 %v5965_v11 }
0x1d2a   :  { %4646 = vmatmul.mubr.msk.f32.vlgmr.msra.gmra.mxu1 %vm307_vm4, %v6606_v63  ;;  %3807 = vmatprep.subr.mxu1 %v6190_v2 }
0x1d2b   :  { %3808 = vmatpush1.msra.mxu1 %v6196_v51  ;;  %3855 = vmatprep.mubr.f32.mxu1 %v6591_v5 }
0x1d2c   :  { %3809 = vmatprep.subr.mxu1 %v6203_v43 }
0x1d2d   :  { %3810 = vmatpush1.msra.mxu1 %v6209_v61 }
0x1d2e   :  { %3811 = vmatprep.subr.mxu1 %v6215_v30 }
0x1d2f   :  { %3812 = vmatpush1.msra.mxu1 %v6221_v59 }
0x1d30   :  { %3813 = vmatprep.subr.mxu1 %v6227_v42 }
0x1d31   :  { %3814 = vmatpush1.msra.mxu1 %v6233_v3 }
0x1d32   :  { %3815 = vmatprep.subr.mxu1 %v6239_v46 }
0x1d33   :  { %3816 = vmatpush1.msra.mxu1 %v6245_v0 }
0x1d34   :  { %3817 = vmatprep.subr.mxu1 %v6251_v47 }
0x1d35   :  { %3818 = vmatpush1.msra.mxu1 %v6257_v39 }
0x1d36   :  { %3819 = vmatprep.subr.mxu1 %v6263_v56 }
0x1d37   :  { %3820 = vmatpush1.msra.mxu1 %v6269_v4 }
0x1d38   :  { %3821 = vmatprep.subr.mxu1 %v6275_v35 }
0x1d39   :  { %v3293_v62 = vpop.permute.xlu1 %3292  ;;  %3822 = vmatpush1.msra.mxu1 %v6281_v8 }
0x1d3a   :  { %4638 = vmatmul.mubr.msk.f32.vlgmr.msra.gmra.mxu0 %vm1763_vm5, %v3293_v62  ;;  %4073 = vmatprep.subr.mxu1 %v5993_v29 }
0x1d3b   :  { %3579 = vmatpush1.msra.mxu0 %v5796_v24  ;;  %3614 = vmatprep.mubr.f32.mxu0 %v6591_v5  ;;  %v6309_v24 = vld [vmem:[#allocation11 + $0x18] sm:$0xff] }
0x1d3c   :  { %3580 = vmatprep.subr.mxu0 %v5799_v25  ;;  %v3451_v25 = vpop.f32.mrf.mxu1 }
0x1d3d   :  { %3581 = vmatpush1.msra.mxu0 %v5802_v26 }
0x1d3e   :  { %4643 = vmatmul.mubr.msk.f32.vlgmr.msra.gmra.mxu0 %vm307_vm4, %v6607_v14  ;;  %3642 = vmatprep.subr.mxu0 %v5805_v27  ;;  %v3453_v26 = vpop.f32.mrf.mxu1 }
0x1d3f   :  { %3643 = vmatpush1.msra.mxu0 %v5819_v7  ;;  %3690 = vmatprep.mubr.f32.mxu0 %v6591_v5  ;;  %v3452_v7 = vadd.f32 %v3451_v25, %v5777_v53  ;;  %v3454_v15 = vadd.f32 %v3453_v26, %v5788_v60 }
0x1d40   :  { %3644 = vmatprep.subr.mxu0 %v5824_v48 }
0x1d41   :  { %3645 = vmatpush1.msra.mxu0 %v5829_v49 }
0x1d42   :  { %3646 = vmatprep.subr.mxu0 %v5832_v31 }
0x1d43   :  { %3647 = vmatpush1.msra.mxu0 %v5836_v32  ;;  %v3286_v32 = vpop.f32.mrf.mxu0 }
0x1d44   :  { %3648 = vmatprep.subr.mxu0 %v5840_v33 }
0x1d45   :  { %3649 = vmatpush1.msra.mxu0 %v5844_v50  ;;  %v3288_v33 = vpop.f32.mrf.mxu0 }
0x1d46   :  { %3650 = vmatprep.subr.mxu0 %v5848_v52  ;;  %v3289_v37 = vadd.f32 %v3288_v33, %v5933_v41 }
0x1d47   :  { %3651 = vmatpush1.msra.mxu0 %v5852_v54  ;;  %v3287_v54 = vadd.f32 %v3286_v32, %v5920_v36 }
0x1d48   :  { %3652 = vmatprep.subr.mxu0 %v5856_v55 }
0x1d49   :  { %3653 = vmatpush1.msra.mxu0 %v5860_v1 }
0x1d4a   :  { %3654 = vmatprep.subr.mxu0 %v5864_v58 }
0x1d4b   :  { %3655 = vmatpush1.msra.mxu0 %v6601_v10 }
0x1d4c   :  { %3656 = vmatprep.subr.mxu0 %v6602_v12 }
0x1d4d   :  { %3657 = vmatpush1.msra.mxu0 %v6603_v13 }
0x1d4e   :  { %3908 = vmatprep.subr.mxu0 %v6309_v24 }
0x1de6   :  { %v3527_v27 = vpop.f32.mrf.mxu1 }
0x1de7   :  { %v3528_v48 = vadd.f32 %v3527_v27, %v6605_v19 }
0x1de8   :  { %v3529_v10 = vpop.f32.mrf.mxu1 }
0x1de9   :  { %v3532_v49 = vadd.f32 %v3528_v48, %v3452_v7  ;;  %v3530_v12 = vadd.f32 %v3529_v10, %v5784_v57 }
0x1deb   :  { %v4642_v31 = vmul.f32 -1.442695, %v3532_v49 }
0x1ded   :  { %4964 = vpow2.f32 %v4642_v31 }
0x1dfa   :  { %v4965_v50 = vpop.eup %4964  ;;  %v3362_v52 = vpop.f32.mrf.mxu0 }
0x1dfb   :  { %v3536_v55 = vadd.f32 1.0, %v4965_v50  ;;  %v3363_v1 = vadd.f32 %v3362_v52, %v5923_v38  ;;  %v6414_v52 = vld [vmem:[#allocation12] sm:$0xff] }
0x1dfc   :  { %v3364_v45 = vpop.f32.mrf.mxu0 }
0x1dfd   :  { %4966 = vrcp.f32 %v3536_v55  ;;  %v3367_v58 = vadd.f32 %v3363_v1, %v3287_v54  ;;  %v3365_v28 = vadd.f32 %v3364_v45, %v5930_v34  ;;  %v3781_v54 = vpop.f32.mrf.mxu1 }
0x1dff   :  { %v4639_v29 = vmul.f32 -1.442695, %v3367_v58  ;;  %v3783_v55 = vpop.f32.mrf.mxu1  ;;  %v3782_v58 = vadd.f32 %v3781_v54, %v5777_v53 }
0x1e01   :  { %4968 = vpow2.f32 %v4639_v29 }
0x1e0a   :  { %v4967_v13 = vpop.eup %4966 }
0x1e0b   :  { %v3539_v17 = vmul.f32 %v4967_v13, %v3530_v12  ;;  %v3542_v14 = vsub.f32 1.0, %v4967_v13  ;;  %v3548_v26 = vmul.f32 %v4967_v13, %v6171_v21  ;;  %v5027_v21 = vld [vmem:[#allocation2 + $0xe] sm:$0x3]  ;;  %v3616_v13 = vpop.f32.mrf.mxu0 }
0x1e0d   :  { %v3540_v16 = vadd.f32 %v3539_v17, %v3454_v15  ;;  %v3618_v15 = vpop.f32.mrf.mxu0 }
0x1e0e   :  { %v4969_v18 = vpop.eup %4968 }
0x1e0f   :  { %4970 = vtanh.f32 %v3540_v16  ;;  %v3371_v20 = vadd.f32 1.0, %v4969_v18  ;;  %v3617_v18 = vadd.f32 %v3616_v13, %v5920_v36 }
0x1e11   :  { %4972 = vrcp.f32 %v3371_v20 }
0x1e1c   :  { %v4971_v22 = vpop.eup %4970 }
0x1e1d   :  { %3544 = vrot.lane.b32.xlu0 %v4971_v22, %s5279_s23 }
0x1e1e   :  { %v4973_v23 = vpop.eup %4972 }
0x1e1f   :  { %v3374_v9 = vmul.f32 %v4973_v23, %v3365_v28  ;;  %v3377_v48 = vsub.f32 1.0, %v4973_v23  ;;  %v3383_v31 = vmul.f32 %v4973_v23, %v6176_v40  ;;  %v6364_v40 = vld [vmem:[#allocation11] sm:$0xff] }
0x1e21   :  { %v3375_v63 = vadd.f32 %v3374_v9, %v3289_v37  ;;  %v3784_v9 = vadd.f32 %v3783_v55, %v5788_v60 }
0x1e23   :  { %4974 = vtanh.f32 %v3375_v63 }
0x1e30   :  { %v4975_v62 = vpop.eup %4974 }
0x1e31   :  { %3379 = vrot.lane.b32.xlu1 %v4975_v62, %s5279_s23 }
0x1e8f   :  { %v3545_v25 = vpop.permute.xlu0 %3544 }
0x1e90   :  { %v3547_v27 = vmul.f32 %v3545_v25, %v3542_v14 }
0x1e92   :  { %v6323_v7 = vadd.f32 %v3548_v26, %v3547_v27 }
0x1e94   :  { %3787 = vrot.lane.b32.xlu0 %v6323_v7, %s5279_s23 }
0x1ea3   :  { %v3380_v49 = vpop.permute.xlu1 %3379 }
0x1ea4   :  { %v3382_v32 = vmul.f32 %v3380_v49, %v3377_v48 }
0x1ea6   :  { %v6328_v33 = vadd.f32 %v3383_v31, %v3382_v32  ;;  %v3619_v31 = vadd.f32 %v3618_v15, %v5933_v41 }
0x1ea8   :  { %3622 = vrot.lane.b32.xlu1 %v6328_v33, %s5279_s23 }
0x1f06   :  { %v3788_v50 = vpop.permute.xlu0 %3787 }
0x1f07   :  { %4647 = vmatmul.mubr.msk.f32.vlgmr.msra.gmra.mxu1 %vm1763_vm5, %v3788_v50 }
0x1f08   :  { %4074 = vmatpush1.msra.mxu1 %v5952_v6  ;;  %4109 = vmatprep.mubr.f32.mxu1 %v6591_v5 }
0x1f09   :  { %4075 = vmatprep.subr.mxu1 %v5959_v44  ;;  %v6357_v44 = vld [vmem:[#allocation11 + $0x10] sm:$0xff] }
0x1f0a   :  { %4076 = vmatpush1.msra.mxu1 %v5965_v11  ;;  %v6361_v11 = vld [vmem:[#allocation11 + $0x8] sm:$0xff] }
0x1f0b   :  { %4652 = vmatmul.mubr.msk.f32.vlgmr.msra.gmra.mxu1 %vm307_vm4, %v5027_v21  ;;  %4137 = vmatprep.subr.mxu1 %v6190_v2  ;;  %v5031_v2 = vld [vmem:[#allocation2 + $0x2] sm:$0x3] }
0x1f0c   :  { %4138 = vmatpush1.msra.mxu1 %v6196_v51  ;;  %4185 = vmatprep.mubr.f32.mxu1 %v6591_v5  ;;  %v6368_v51 = vld [vmem:[#allocation12 + $0x78] sm:$0xff] }
0x1f0d   :  { %4139 = vmatprep.subr.mxu1 %v6203_v43  ;;  %v6371_v43 = vld [vmem:[#allocation12 + $0x70] sm:$0xff] }
0x1f0e   :  { %4140 = vmatpush1.msra.mxu1 %v6209_v61  ;;  %v6375_v61 = vld [vmem:[#allocation12 + $0x68] sm:$0xff] }
0x1f0f   :  { %4141 = vmatprep.subr.mxu1 %v6215_v30  ;;  %v6378_v30 = vld [vmem:[#allocation12 + $0x60] sm:$0xff] }
0x1f10   :  { %4142 = vmatpush1.msra.mxu1 %v6221_v59  ;;  %v6381_v59 = vld [vmem:[#allocation12 + $0x58] sm:$0xff] }
0x1f11   :  { %4143 = vmatprep.subr.mxu1 %v6227_v42  ;;  %v6384_v42 = vld [vmem:[#allocation12 + $0x50] sm:$0xff] }
0x1f12   :  { %4144 = vmatpush1.msra.mxu1 %v6233_v3  ;;  %v6387_v3 = vld [vmem:[#allocation12 + $0x48] sm:$0xff] }
0x1f13   :  { %4145 = vmatprep.subr.mxu1 %v6239_v46  ;;  %v6390_v46 = vld [vmem:[#allocation12 + $0x40] sm:$0xff] }
0x1f14   :  { %4146 = vmatpush1.msra.mxu1 %v6245_v0  ;;  %v6393_v0 = vld [vmem:[#allocation12 + $0x38] sm:$0xff] }
0x1f15   :  { %4147 = vmatprep.subr.mxu1 %v6251_v47  ;;  %v6396_v47 = vld [vmem:[#allocation12 + $0x30] sm:$0xff] }
0x1f16   :  { %4148 = vmatpush1.msra.mxu1 %v6257_v39  ;;  %v6399_v39 = vld [vmem:[#allocation12 + $0x28] sm:$0xff] }
0x1f17   :  { %4149 = vmatprep.subr.mxu1 %v6263_v56  ;;  %v6402_v56 = vld [vmem:[#allocation12 + $0x20] sm:$0xff] }
0x1f18   :  { %4150 = vmatpush1.msra.mxu1 %v6269_v4  ;;  %v6405_v4 = vld [vmem:[#allocation12 + $0x18] sm:$0xff] }
0x1f19   :  { %4151 = vmatprep.subr.mxu1 %v6275_v35  ;;  %v6408_v35 = vld [vmem:[#allocation12 + $0x10] sm:$0xff] }
0x1f1a   :  { %v3623_v6 = vpop.permute.xlu1 %3622  ;;  %4152 = vmatpush1.msra.mxu1 %v6281_v8  ;;  %v6411_v8 = vld [vmem:[#allocation12 + $0x8] sm:$0xff] }
0x1f1b   :  { %4644 = vmatmul.mubr.msk.f32.vlgmr.msra.gmra.mxu0 %vm1763_vm5, %v3623_v6  ;;  %4812 = vmatprep.subr.mxu1 %v6591_v5 }
0x1f1c   :  { %3909 = vmatpush1.msra.mxu0 %v6357_v44  ;;  %3944 = vmatprep.mubr.f32.mxu0 %v6591_v5 }
0x1f1d   :  { %3910 = vmatprep.subr.mxu0 %v6361_v11 }
0x1f1e   :  { %3911 = vmatpush1.msra.mxu0 %v6364_v40 }
0x1f1f   :  { %4649 = vmatmul.mubr.msk.f32.vlgmr.msra.gmra.mxu0 %vm307_vm4, %v5031_v2  ;;  %3972 = vmatprep.subr.mxu0 %v6368_v51 }
0x1f20   :  { %3973 = vmatpush1.msra.mxu0 %v6371_v43  ;;  %4020 = vmatprep.mubr.f32.mxu0 %v6591_v5 }
0x1f21   :  { %3974 = vmatprep.subr.mxu0 %v6375_v61 }
0x1f22   :  { %3975 = vmatpush1.msra.mxu0 %v6378_v30 }
0x1f23   :  { %3976 = vmatprep.subr.mxu0 %v6381_v59 }
0x1f24   :  { %3977 = vmatpush1.msra.mxu0 %v6384_v42 }
0x1f25   :  { %3978 = vmatprep.subr.mxu0 %v6387_v3 }
0x1f26   :  { %3979 = vmatpush1.msra.mxu0 %v6390_v46 }
0x1f27   :  { %3980 = vmatprep.subr.mxu0 %v6393_v0 }
0x1f28   :  { %3981 = vmatpush1.msra.mxu0 %v6396_v47 }
0x1f29   :  { %3982 = vmatprep.subr.mxu0 %v6399_v39 }
0x1f2a   :  { %3983 = vmatpush1.msra.mxu0 %v6402_v56 }
0x1f2b   :  { %3984 = vmatprep.subr.mxu0 %v6405_v4 }
0x1f2c   :  { %3985 = vmatpush1.msra.mxu0 %v6408_v35 }
0x1f2d   :  { %3986 = vmatprep.subr.mxu0 %v6411_v8 }
0x1f2e   :  { %3987 = vmatpush1.msra.mxu0 %v6414_v52 }
0x1f2f   :  { %4238 = vmatprep.subr.mxu0 %v6309_v24 }
0x1fc7   :  { %v3857_v1 = vpop.f32.mrf.mxu1 }
0x1fc8   :  { %v3858_v29 = vadd.f32 %v3857_v1, %v6605_v19 }
0x1fc9   :  { %v3859_v28 = vpop.f32.mrf.mxu1 }
0x1fca   :  { %v3862_v10 = vadd.f32 %v3858_v29, %v3782_v58  ;;  %v3860_v23 = vadd.f32 %v3859_v28, %v5784_v57 }
0x1fcc   :  { %v4648_v12 = vmul.f32 -1.442695, %v3862_v10 }
0x1fce   :  { %4976 = vpow2.f32 %v4648_v12 }
0x1fdb   :  { %v4977_v17 = vpop.eup %4976  ;;  %v3692_v16 = vpop.f32.mrf.mxu0 }
0x1fdc   :  { %v3866_v20 = vadd.f32 1.0, %v4977_v17  ;;  %v3693_v45 = vadd.f32 %v3692_v16, %v5923_v38 }
0x1fdd   :  { %v3694_v26 = vpop.f32.mrf.mxu0 }
0x1fde   :  { %4978 = vrcp.f32 %v3866_v20  ;;  %v3697_v24 = vadd.f32 %v3693_v45, %v3617_v18  ;;  %v3695_v48 = vadd.f32 %v3694_v26, %v5930_v34 }
0x1fe0   :  { %v4645_v22 = vmul.f32 -1.442695, %v3697_v24 }
0x1fe2   :  { %4980 = vpow2.f32 %v4645_v22 }
0x1feb   :  { %v4979_v37 = vpop.eup %4978 }
0x1fec   :  { %v3869_v63 = vmul.f32 %v4979_v37, %v3860_v23  ;;  %v3872_v6 = vsub.f32 1.0, %v4979_v37  ;;  %v3878_v54 = vmul.f32 %v4979_v37, %v6323_v7 }
0x1fee   :  { %v3870_v62 = vadd.f32 %v3869_v63, %v3784_v9 }
0x1fef   :  { %v4981_v14 = vpop.eup %4980 }
0x1ff0   :  { %4982 = vtanh.f32 %v3870_v62  ;;  %v3701_v25 = vadd.f32 1.0, %v4981_v14 }
0x1ff2   :  { %4984 = vrcp.f32 %v3701_v25 }
0x1ffd   :  { %v4983_v27 = vpop.eup %4982 }
0x1ffe   :  { %3874 = vrot.lane.b32.xlu0 %v4983_v27, %s5279_s23 }
0x1fff   :  { %v4985_v49 = vpop.eup %4984 }
0x2000   :  { %v3704_v32 = vmul.f32 %v4985_v49, %v3695_v48  ;;  %v3707_v58 = vsub.f32 1.0, %v4985_v49  ;;  %v3713_v10 = vmul.f32 %v4985_v49, %v6328_v33  ;;  %v5048_v33 = vld [vmem:[#allocation2] sm:$0x3] }
0x2002   :  { %v3705_v50 = vadd.f32 %v3704_v32, %v3619_v31 }
0x2004   :  { %4986 = vtanh.f32 %v3705_v50 }
0x2011   :  { %v4987_v21 = vpop.eup %4986 }
0x2012   :  { %3709 = vrot.lane.b32.xlu1 %v4987_v21, %s5279_s23 }
0x2070   :  { %v3875_v2 = vpop.permute.xlu0 %3874 }
0x2071   :  { %v3877_v55 = vmul.f32 %v3875_v2, %v3872_v6 }
0x2073   :  { %v6429_v1 = vadd.f32 %v3878_v54, %v3877_v55 }
0x2075   :  { %4117 = vrot.lane.b32.xlu0 %v6429_v1, %s5279_s23 }
0x2084   :  { %v3710_v29 = vpop.permute.xlu1 %3709 }
0x2085   :  { %v3712_v12 = vmul.f32 %v3710_v29, %v3707_v58 }
0x2087   :  { %v6434_v13 = vadd.f32 %v3713_v10, %v3712_v12 }
0x2089   :  { %3952 = vrot.lane.b32.xlu1 %v6434_v13, %s5279_s23 }
0x20e7   :  { %v4118_v15 = vpop.permute.xlu0 %4117 }
0x20e8   :  { %4653 = vmatmul.mubr.msk.f32.vlgmr.msra.gmra.mxu1 %vm1763_vm5, %v4118_v15  ;;  %v4378_v15 = vld [vmem:[%s6558_s13 + $0x10] sm:$0xff] }
0x20e9   :  { %4828 = vmatprep.mubr.msk.f32.mxu1 %vm5275_vm0, %v6591_v5 }
0x20fb   :  { %v3953_v7 = vpop.permute.xlu1 %3952 }
0x20fc   :  { %4650 = vmatmul.mubr.msk.f32.vlgmr.msra.gmra.mxu0 %vm1763_vm5, %v3953_v7  ;;  %v4377_v7 = vld [vmem:[%s6558_s13 + $0x8] sm:$0xff] }
0x20fd   :  { %4239 = vmatpush1.msra.mxu0 %v6357_v44  ;;  %4274 = vmatprep.mubr.f32.mxu0 %v6591_v5  ;;  %v4111_v44 = vpop.f32.mrf.mxu1 }
0x20fe   :  { %4240 = vmatprep.subr.mxu0 %v6361_v11 }
0x20ff   :  { %4241 = vmatpush1.msra.mxu0 %v6364_v40  ;;  %v4113_v11 = vpop.f32.mrf.mxu1 }
0x2100   :  { %4655 = vmatmul.mubr.msk.f32.vlgmr.msra.gmra.mxu0 %vm307_vm4, %v5048_v33  ;;  %4302 = vmatprep.subr.mxu0 %v6368_v51  ;;  %v4112_v51 = vadd.f32 %v4111_v44, %v5777_v53  ;;  %v4376_v33 = vld [vmem:[%s6558_s13] sm:$0xff]  ;;  %v4469_v44 = vld [vmem:[%s6560_s15 + $0x18] sm:$0xff] }
0x2101   :  { %4303 = vmatpush1.msra.mxu0 %v6371_v43  ;;  %4350 = vmatprep.mubr.f32.mxu0 %v6591_v5 }
0x2102   :  { %4304 = vmatprep.subr.mxu0 %v6375_v61 }
0x2103   :  { %4305 = vmatpush1.msra.mxu0 %v6378_v30 }
0x2104   :  { %4306 = vmatprep.subr.mxu0 %v6381_v59  ;;  %v3946_v59 = vpop.f32.mrf.mxu0 }
0x2105   :  { %4307 = vmatpush1.msra.mxu0 %v6384_v42 }
0x2106   :  { %4308 = vmatprep.subr.mxu0 %v6387_v3  ;;  %v3948_v42 = vpop.f32.mrf.mxu0 }
0x2107   :  { %4309 = vmatpush1.msra.mxu0 %v6390_v46 }
0x2108   :  { %4310 = vmatprep.subr.mxu0 %v6393_v0  ;;  %v3947_v0 = vadd.f32 %v3946_v59, %v5920_v36 }
0x2109   :  { %4311 = vmatpush1.msra.mxu0 %v6396_v47 }
0x210a   :  { %4312 = vmatprep.subr.mxu0 %v6399_v39 }
0x210b   :  { %4313 = vmatpush1.msra.mxu0 %v6402_v56 }
0x210c   :  { %4314 = vmatprep.subr.mxu0 %v6405_v4 }
0x210d   :  { %4315 = vmatpush1.msra.mxu0 %v6408_v35 }
0x210e   :  { %4316 = vmatprep.subr.mxu0 %v6411_v8  ;;  %v4114_v8 = vadd.f32 %v4113_v11, %v5788_v60  ;;  %v4468_v11 = vld [vmem:[%s6560_s15 + $0x10] sm:$0xff] }
0x210f   :  { %4317 = vmatpush1.msra.mxu0 %v6414_v52 }
0x2110   :  { %4831 = vmatprep.subr.mxu0 %v6591_v5 }
0x21a8   :  { %v4187_v40 = vpop.f32.mrf.mxu1 }
0x21a9   :  { %v4188_v43 = vadd.f32 %v4187_v40, %v6605_v19 }
0x21aa   :  { %v4189_v35 = vpop.f32.mrf.mxu1 }
0x21ab   :  { %v4192_v61 = vadd.f32 %v4188_v43, %v4112_v51  ;;  %v4190_v53 = vadd.f32 %v4189_v35, %v5784_v57  ;;  %v3949_v57 = vadd.f32 %v3948_v42, %v5933_v41 }
0x21ad   :  { %v4654_v30 = vmul.f32 -1.442695, %v4192_v61 }
0x21af   :  { %4988 = vpow2.f32 %v4654_v30 }
0x21bc   :  { %v4989_v3 = vpop.eup %4988  ;;  %v4022_v46 = vpop.f32.mrf.mxu0 }
0x21bd   :  { %v4196_v47 = vadd.f32 1.0, %v4989_v3  ;;  %v4023_v39 = vadd.f32 %v4022_v46, %v5923_v38 }
0x21be   :  { %v4024_v20 = vpop.f32.mrf.mxu0 }
0x21bf   :  { %4990 = vrcp.f32 %v4196_v47  ;;  %v4027_v56 = vadd.f32 %v4023_v39, %v3947_v0  ;;  %v4025_v24 = vadd.f32 %v4024_v20, %v5930_v34 }
0x21c0   :  { %v4276_v26 = vpop.f32.mrf.mxu0 }
0x21c1   :  { %v4651_v4 = vmul.f32 -1.442695, %v4027_v56  ;;  %v4277_v49 = vadd.f32 %v4276_v26, %v5920_v36  ;;  %v4383_v36 = vld [vmem:[%s6558_s13 + $0x38] sm:$0xff]  ;;  %v4467_v56 = vld [vmem:[%s6560_s15 + $0x8] sm:$0xff] }
0x21c2   :  { %v4278_v27 = vpop.f32.mrf.mxu0  ;;  %4813 = vmatpush3.msra.mxu1 %v4383_v36 }
0x21c3   :  { %4992 = vpow2.f32 %v4651_v4  ;;  %v4279_v58 = vadd.f32 %v4278_v27, %v5933_v41  ;;  %4814 = vmatprep.subr.mxu1 %v6591_v5  ;;  %v4380_v41 = vld [vmem:[%s6558_s13 + $0x20] sm:$0xff]  ;;  %v4658_v4 = vld [vmem:[#allocation17] ss:$0 sm:$0xff] }
0x21cc   :  { %v6470_v19 = vpop.eup %4990 }
0x21cd   :  { %v4199_v52 = vmul.f32 %v6470_v19, %v4190_v53  ;;  %v4202_v51 = vsub.f32 1.0, %v6470_v19  ;;  %v4208_v59 = vmul.f32 %v6470_v19, %v6429_v1  ;;  %v4466_v1 = vld [vmem:[%s6560_s15] sm:$0xff]  ;;  %s5229_s15 = scalar_lea.vmem %s4560_s27, 32 }
0x21ce   :  { %p5230_p3 = scmp.ne.s32.totalorder %s4560_s27, %s5229_s15  ;;  %p5235_p5 = scmp.lt.s32.totalorder %s5229_s15, %s5229_s15 }
0x21cf   :  { %v4200_v17 = vadd.f32 %v4199_v52, %v4114_v8  ;;  %v4660_v8 = vld [vmem:[%s6561_s16] ss:$0 sm:$0xff] }
0x21d0   :  { %v4993_v16 = vpop.eup %4992  ;;  %p5236_p6 = por %p5235_p5, %p5234_p4 }
0x21d1   :  { %4994 = vtanh.f32 %v4200_v17  ;;  %v4031_v18 = vadd.f32 1.0, %v4993_v16 }
0x21d2   :  { %p5237_p7 = pnand %p5236_p6, %p5230_p3 }
0x21d3   :  { %4996 = vrcp.f32 %v4031_v18 }
0x21de   :  { %v4995_v45 = vpop.eup %4994 }
0x21df   :  { %4204 = vrot.lane.b32.xlu0 %v4995_v45, %s5279_s23 }
0x21e0   :  { %v4997_v22 = vpop.eup %4996 }
0x21e1   :  { %v4034_v28 = vmul.f32 %v4997_v22, %v4025_v24  ;;  %v4037_v37 = vsub.f32 1.0, %v4997_v22  ;;  %v4043_v63 = vmul.f32 %v4997_v22, %v6434_v13  ;;  %v4379_v13 = vld [vmem:[%s6558_s13 + $0x18] sm:$0xff] }
0x21e3   :  { %v4035_v23 = vadd.f32 %v4034_v28, %v3949_v57 }
0x21e5   :  { %4998 = vtanh.f32 %v4035_v23 }
0x21f2   :  { %v4999_v60 = vpop.eup %4998 }
0x21f3   :  { %4039 = vrot.lane.b32.xlu1 %v4999_v60, %s5279_s23 }
0x2251   :  { %v4205_v40 = vpop.permute.xlu0 %4204 }
0x2252   :  { %v4207_v43 = vmul.f32 %v4205_v40, %v4202_v51 }
0x2254   :  { %v4209_v46 = vadd.f32 %v4208_v59, %v4207_v43 }
0x2265   :  { %v4040_v9 = vpop.permute.xlu1 %4039 }
0x2266   :  { %v4042_v62 = vmul.f32 %v4040_v9, %v4037_v37 }
0x2268   :  { %v4044_v14 = vadd.f32 %v4043_v63, %v4042_v62 }
0x226a   :  { %4282 = vrot.lane.b32.xlu1 %v4044_v14, %s5279_s23 }
0x22dc   :  { %v4283_v25 = vpop.permute.xlu1 %4282 }
0x22dd   :  { %4656 = vmatmul.mubr.msk.f32.vlgmr.msra.gmra.mxu0 %vm1763_vm5, %v4283_v25 }
0x22de   :  { %4839 = vmatprep.mubr.msk.f32.mxu0 %vm5275_vm0, %v6591_v5  ;;  %4832 = vmatpush3.msra.mxu0 %v4469_v44 }
0x22df   :  { %4833 = vmatprep.subr.mxu0 %v6591_v5 }
0x22e0   :  { %4834 = vmatpush3.msra.mxu0 %v4468_v11 }
0x22e1   :  { %4835 = vmatprep.subr.mxu0 %v6591_v5 }
0x22e2   :  { %4836 = vmatpush3.msra.mxu0 %v4467_v56 }
0x22e3   :  { %4837 = vmatprep.subr.mxu0 %v6591_v5 }
0x22e4   :  { %4838 = vmatpush3.msra.mxu0 %v4466_v1 }
0x239d   :  { %v4352_v48 = vpop.f32.mrf.mxu0 }
0x239e   :  { %v4353_v31 = vadd.f32 %v4352_v48, %v5923_v38  ;;  %v4382_v38 = vld [vmem:[%s6558_s13 + $0x30] sm:$0xff] }
0x239f   :  { %v4354_v2 = vpop.f32.mrf.mxu0  ;;  %4815 = vmatpush3.msra.mxu1 %v4382_v38 }
0x23a0   :  { %v4357_v32 = vadd.f32 %v4353_v31, %v4277_v49  ;;  %v4355_v54 = vadd.f32 %v4354_v2, %v5930_v34  ;;  %v4381_v34 = vld [vmem:[%s6558_s13 + $0x28] sm:$0xff]  ;;  %4816 = vmatprep.subr.mxu1 %v6591_v5 }
0x23a1   :  { %4817 = vmatpush3.msra.mxu1 %v4381_v34 }
0x23a2   :  { %v4657_v50 = vmul.f32 -1.442695, %v4357_v32  ;;  %4818 = vmatprep.subr.mxu1 %v6591_v5 }
0x23a3   :  { %4819 = vmatpush3.msra.mxu1 %v4380_v41 }
0x23a4   :  { %5000 = vpow2.f32 %v4657_v50  ;;  %4820 = vmatprep.subr.mxu1 %v6591_v5 }
0x23a5   :  { %4821 = vmatpush3.msra.mxu1 %v4379_v13 }
0x23a6   :  { %4822 = vmatprep.subr.mxu1 %v6591_v5 }
0x23a7   :  { %4823 = vmatpush3.msra.mxu1 %v4378_v15 }
0x23a8   :  { %4824 = vmatprep.subr.mxu1 %v6591_v5 }
0x23a9   :  { %4825 = vmatpush3.msra.mxu1 %v4377_v7 }
0x23aa   :  { %4826 = vmatprep.subr.mxu1 %v6591_v5 }
0x23ab   :  { %4827 = vmatpush3.msra.mxu1 %v4376_v33 }
0x23b1   :  { %v5001_v21 = vpop.eup %5000 }
0x23b2   :  { %v4361_v6 = vadd.f32 1.0, %v5001_v21 }
0x23b4   :  { %5002 = vrcp.f32 %v4361_v6 }
0x23c1   :  { %v5003_v55 = vpop.eup %5002 }
0x23c2   :  { %v4364_v29 = vmul.f32 %v5003_v55, %v4355_v54  ;;  %v4367_v61 = vsub.f32 1.0, %v5003_v55  ;;  %v4373_v42 = vmul.f32 %v5003_v55, %v4044_v14 }
0x23c4   :  { %v4365_v10 = vadd.f32 %v4364_v29, %v4279_v58 }
0x23c6   :  { %5004 = vtanh.f32 %v4365_v10 }
0x23d3   :  { %v5005_v12 = vpop.eup %5004 }
0x23d4   :  { %4369 = vrot.lane.b32.xlu1 %v5005_v12, %s5279_s23 }
0x2446   :  { %v4370_v30 = vpop.permute.xlu1 %4369 }
0x2447   :  { %v4372_v3 = vmul.f32 %v4370_v30, %v4367_v61 }
0x2449   :  { %v4374_v0 = vadd.f32 %v4373_v42, %v4372_v3 }
0x244b   :  { %v4375_v47 = vadd.f32 %v4374_v0, %v4209_v46 }
0x244d   :  { %4392 = vrot.lane.b32.xlu0 %v4375_v47, %s5279_s23 }
0x24bf   :  { %v4393_v39 = vpop.permute.xlu0 %4392 }
0x24c0   :  { %4829 = vmatmul.mubr.msk.f32.vlgmr.msra.gmra.mxu1 %vm1763_vm5, %v4393_v39 }
0x2580   :  { %v4462_v35 = vpop.f32.mrf.mxu1 }
0x2581   :  { %v4463_v53 = vadd.f32 %v4658_v4, %v4462_v35 }
0x2582   :  { %v4830_v19 = vpop.f32.mrf.mxu1 }
0x2583   :  { %4840 = vmatmul.mubr.msk.f32.vlgmr.msra.gmra.mxu0 %vm4477_vm6, %v4463_v53 }
0x2643   :  { %v4547_v52 = vpop.f32.mrf.mxu0 }
0x2644   :  { %v4548_v5 = vadd.f32 %v4660_v8, %v4547_v52 }
0x2645   :  { %v4841_v17 = vpop.f32.mrf.mxu0 }
0x2646   :  { %4552 = vst.msk [vmem:[#allocation18] sm:$0x3] %vm4551_vm7, %v4548_v5 }
0x2647   :  { %5240 = shalt.err (!%p5237_p7)
}
0x2648   :  { %4562 = dma.vmem_to_hbm [thread:$0]  %s4560_s27, 32, %s6562_s17, [#allocation5]  }
0x2649   :  { %5259 = dma.done.wait [#allocation5], 32  }
0x264a   :  { %5260 = vsyncadd [#allocation5], 4294967264 }
0x264b   :  { %4566 = vsyncpa [#allocation4], 1 }
0x264c   :  { %4567 = vsyncpa [#allocation7], 1 }
0x264d   :  { %4568 = vsyncpa [#allocation10], 1 }
0x264e   :  { %4569 = vsyncpa [#allocation13], 1 }
0x264f   :  { %4570 = vsyncpa [#allocation16], 1 }
0x2650   :  { %4571 = vsyncpa [#allocation5], 1 }

</bundles_post_ra>
